<compile_context>
chip_gen: v7x
topology: tpu7x:2x2x1
jax: 0.10.0
libtpu: 0.0.40
codegen_flags: <defaults>
</compile_context>

<pallas_src>
import functools

import jax
import jax.numpy as jnp
import numpy as np
from jax.experimental import pallas as pl

_EPS = 1e-12  # matches nn.LayerNorm(dimensions, eps=1e-12) in the reference module


def _round_up(x, m):
    return (x + m - 1) // m * m


# ---------------------------------------------------------------------------
# Single fused kernel: both encoders + all cross-attention layers
# ---------------------------------------------------------------------------
def _fused_forward_kernel(text_ref, image_ref,
                          lang_w1_ref, lang_w2_ref, lang_vec_ref,
                          visn_w1_ref, visn_w2_ref, visn_vec_ref,
                          layer_w_ref, layer_vec_ref,
                          to_ref, vo_ref,
                          *, b, lt, li, n_layers, eps):
    d = lang_w2_ref.shape[1]

    def layernorm(x, gamma, beta):
        mean = jnp.mean(x, axis=-1, keepdims=True)
        var = jnp.mean((x - mean) ** 2, axis=-1, keepdims=True)
        return (x - mean) * jax.lax.rsqrt(var + eps) * gamma + beta

    def encoder(x2d, w1, w2, vec):
        # vec rows: [b1, b2, gamma, beta]
        h = jnp.dot(x2d, w1, preferred_element_type=jnp.float32) + vec[0:1]
        h = jnp.maximum(h, 0.0)
        h = jnp.dot(h, w2, preferred_element_type=jnp.float32) + vec[1:2]
        return layernorm(h, vec[2:3], vec[3:4])

    # --- Encoders (Linear -> ReLU -> Linear -> LayerNorm) ---
    t = encoder(text_ref[...], lang_w1_ref[...], lang_w2_ref[...],
                lang_vec_ref[...]).reshape(b, lt, d)
    v = encoder(image_ref[...], visn_w1_ref[...], visn_w2_ref[...],
                visn_vec_ref[...]).reshape(b, li, d)

    def attend(q, c, w_lin, b_lin, gamma, beta):
        # AttentionWide: raw dot-product scores, no 1/sqrt(D) scaling (matches torch).
        scores = jnp.einsum("bqd,bkd->bqk", q, c, preferred_element_type=jnp.float32)
        m = jnp.max(scores, axis=-1, keepdims=True)
        e = jnp.exp(scores - m)
        attn = e / jnp.sum(e, axis=-1, keepdims=True)   # exact divide (tiny tensor)
        mix = jnp.einsum("bqk,bkd->bqd", attn, c, preferred_element_type=jnp.float32)
        bsz, lq, dd = mix.shape
        lin = jnp.dot(mix.reshape(bsz * lq, dd), w_lin,
                      preferred_element_type=jnp.float32) + b_lin
        return layernorm(lin.reshape(bsz, lq, dd) + q, gamma, beta)

    # Fully unrolled layer loop (L=3, D=32 -> negligible vreg pressure).
    # TODO(synk): switch to lax.fori_loop with dynamic layer indexing if D/L grow.
    for layer in range(n_layers):
        w = layer_w_ref[layer]      # (2, D, D): [linear_q.W, linear_c.W] as (in, out)
        vec = layer_vec_ref[layer]  # (6, D):    [bq, gamma1, beta1, bc, gamma2, beta2]
        new_t = attend(t, v, w[0], vec[0:1], vec[1:2], vec[2:3])
        new_v = attend(v, t, w[1], vec[3:4], vec[4:5], vec[5:6])
        t, v = new_t, new_v

    to_ref[...] = t
    vo_ref[...] = v


# ---------------------------------------------------------------------------
# Parameter init (deterministic, synthetic; weights stored as (in, out))
# ---------------------------------------------------------------------------
def init_params(key, dim, n_layers=3, text_feat=300, visn_feat=2048):
    def w(k, shape, scale=0.02):
        return (scale * jax.random.normal(k, shape)).astype(jnp.float32)

    keys = iter(jax.random.split(key, 16))
    ones = jnp.ones((dim,), jnp.float32)
    zeros = jnp.zeros((dim,), jnp.float32)

    # Per-encoder vectors packed as (4, D): [b1, b2, gamma, beta] -> one DMA each.
    lang_vec = jnp.stack([w(next(keys), (dim,)), w(next(keys), (dim,)), ones, zeros])
    visn_vec = jnp.stack([w(next(keys), (dim,)), w(next(keys), (dim,)), ones, zeros])

    # Stacked per-layer parameters -> the fused kernel gets them in 2 DMAs.
    wq = w(next(keys), (n_layers, dim, dim))
    wc = w(next(keys), (n_layers, dim, dim))
    bq = w(next(keys), (n_layers, dim))
    bc = w(next(keys), (n_layers, dim))
    g = jnp.ones((n_layers, dim), jnp.float32)
    z = jnp.zeros((n_layers, dim), jnp.float32)
    layer_w = jnp.stack([wq, wc], axis=1)                 # (L, 2, D, D)
    layer_vec = jnp.stack([bq, g, z, bc, g, z], axis=1)   # (L, 6, D)

    return {
        # TODO(synk): `FullyConnected` is not defined in the reference source; assumed
        # to be Linear -> ReLU -> Linear matching dims=[in, D, D], layers=2.
        "lang_w1": w(next(keys), (text_feat, dim)),
        "lang_w2": w(next(keys), (dim, dim)),
        "lang_vec": lang_vec,
        "visn_w1": w(next(keys), (visn_feat, dim)),
        "visn_w2": w(next(keys), (dim, dim)),
        "visn_vec": visn_vec,
        "layer_w": layer_w,
        "layer_vec": layer_vec,
    }


# ---------------------------------------------------------------------------
# Forward pass: a single pallas_call under one jit dispatch
# ---------------------------------------------------------------------------
@jax.jit
def cross_attention_wide_forward(text, image, params):
    b, lt, tfeat = text.shape
    li, vfeat = image.shape[1], image.shape[2]
    d = params["lang_w2"].shape[1]
    n_layers = params["layer_w"].shape[0]

    text2d = text.reshape(b * lt, tfeat)
    image2d = image.reshape(b * li, vfeat)

    # Pad contraction dims to multiples of 128 so every MXU pass is full width and the
    # activation DMA is lane-aligned (zero-padded W1 rows contribute nothing).
    lang_w1, visn_w1 = params["lang_w1"], params["visn_w1"]
    tpad = _round_up(tfeat, 128)
    if tpad != tfeat:
        text2d = jnp.pad(text2d, ((0, 0), (0, tpad - tfeat)))
        lang_w1 = jnp.pad(lang_w1, ((0, tpad - tfeat), (0, 0)))
    vpad = _round_up(vfeat, 128)
    if vpad != vfeat:
        image2d = jnp.pad(image2d, ((0, 0), (0, vpad - vfeat)))
        visn_w1 = jnp.pad(visn_w1, ((0, vpad - vfeat), (0, 0)))

    # Advisory cost estimate so XLA schedules the surrounding pad/reshape sensibly.
    enc_flops = 2 * (b * lt * (tpad * d + d * d) + b * li * (vpad * d + d * d))
    layer_flops = n_layers * (8 * b * lt * li * d + 2 * b * (lt + li) * d * d)
    in_arrays = (text2d, image2d, lang_w1, params["lang_w2"], params["lang_vec"],
                 visn_w1, params["visn_w2"], params["visn_vec"],
                 params["layer_w"], params["layer_vec"])
    bytes_accessed = 4 * (sum(int(np.prod(a.shape)) for a in in_arrays)
                          + b * lt * d + b * li * d)
    cost = pl.CostEstimate(flops=int(enc_flops + layer_flops),
                           transcendentals=int(2 * n_layers * b * lt * li),
                           bytes_accessed=int(bytes_accessed))

    kernel = functools.partial(_fused_forward_kernel,
                               b=b, lt=lt, li=li, n_layers=n_layers, eps=_EPS)
    out_t, out_v = pl.pallas_call(
        kernel,
        out_shape=(jax.ShapeDtypeStruct((b, lt, d), jnp.float32),
                   jax.ShapeDtypeStruct((b, li, d), jnp.float32)),
        cost_estimate=cost,
    )(*in_arrays)
    return out_t, out_v


# ---------------------------------------------------------------------------
# Pure-JAX reference (same math, HIGHEST-precision matmuls) for a sanity check
# ---------------------------------------------------------------------------
def _reference_forward(text, image, params):
    hp = jax.lax.Precision.HIGHEST

    def layernorm(x, gamma, beta):
        mean = jnp.mean(x, axis=-1, keepdims=True)
        var = jnp.mean((x - mean) ** 2, axis=-1, keepdims=True)
        return (x - mean) * jax.lax.rsqrt(var + _EPS) * gamma + beta

    def encoder(x, w1, w2, vec):
        h = jnp.dot(x, w1, precision=hp) + vec[0:1]
        h = jnp.maximum(h, 0.0)
        h = jnp.dot(h, w2, precision=hp) + vec[1:2]
        return layernorm(h, vec[2:3], vec[3:4])

    b, lt, tfeat = text.shape
    li, vfeat = image.shape[1], image.shape[2]
    d = params["lang_w2"].shape[1]
    t = encoder(text.reshape(b * lt, tfeat), params["lang_w1"],
                params["lang_w2"], params["lang_vec"]).reshape(b, lt, d)
    v = encoder(image.reshape(b * li, vfeat), params["visn_w1"],
                params["visn_w2"], params["visn_vec"]).reshape(b, li, d)

    def attend(q, c, w_lin, b_lin, gamma, beta):
        scores = jnp.einsum("bqd,bkd->bqk", q, c, precision=hp)
        attn = jax.nn.softmax(scores, axis=-1)
        mix = jnp.einsum("bqk,bkd->bqd", attn, c, precision=hp)
        lin = jnp.einsum("bqd,de->bqe", mix, w_lin, precision=hp) + b_lin
        return layernorm(lin + q, gamma, beta)

    for layer in range(params["layer_w"].shape[0]):
        w = params["layer_w"][layer]
        vec = params["layer_vec"][layer]
        nt = attend(t, v, w[0], vec[0:1], vec[1:2], vec[2:3])
        nv = attend(v, t, w[1], vec[3:4], vec[4:5], vec[5:6])
        t, v = nt, nv
    return t, v


# ---------------------------------------------------------------------------
if __name__ == "__main__":
    DIM = 32
    B, LT, LI = 2, 8, 8
    TEXT_FEAT, VISN_FEAT = 300, 2048

    key = jax.random.PRNGKey(0)
    k_text, k_img, k_params = jax.random.split(key, 3)
    text = jax.random.normal(k_text, (B, LT, TEXT_FEAT), dtype=jnp.float32)
    image = jax.random.normal(k_img, (B, LI, VISN_FEAT), dtype=jnp.float32)

    params = init_params(k_params, DIM, n_layers=3,
                         text_feat=TEXT_FEAT, visn_feat=VISN_FEAT)

    out_text, out_image = cross_attention_wide_forward(text, image, params)
    jax.block_until_ready((out_text, out_image))

    assert out_text.shape == (B, LT, DIM)
    assert out_image.shape == (B, LI, DIM)
    assert bool(jnp.all(jnp.isfinite(out_text))) and bool(jnp.all(jnp.isfinite(out_image)))

    # Numerical sanity check against the pure-JAX reference (loose tol: MXU f32 path).
    ref_t, ref_v = _reference_forward(text, image, params)
    assert float(jnp.max(jnp.abs(out_text - ref_t))) < 3e-2
    assert float(jnp.max(jnp.abs(out_image - ref_v))) < 3e-2

    print("KERNEL_OK")
</pallas_src>

<mosaic_0001>
module attributes {stable_mosaic.version = 11 : i64} {
  func.func @_fused_forward_kernel(%arg0: memref<16x384xf32, #tpu.memory_space<vmem>>, %arg1: memref<16x2048xf32, #tpu.memory_space<vmem>>, %arg2: memref<384x32xf32, #tpu.memory_space<vmem>>, %arg3: memref<32x32xf32, #tpu.memory_space<vmem>>, %arg4: memref<4x32xf32, #tpu.memory_space<vmem>>, %arg5: memref<2048x32xf32, #tpu.memory_space<vmem>>, %arg6: memref<32x32xf32, #tpu.memory_space<vmem>>, %arg7: memref<4x32xf32, #tpu.memory_space<vmem>>, %arg8: memref<3x2x32x32xf32, #tpu.memory_space<vmem>>, %arg9: memref<3x6x32xf32, #tpu.memory_space<vmem>>, %arg10: memref<2x8x32xf32, #tpu.memory_space<vmem>>, %arg11: memref<2x8x32xf32, #tpu.memory_space<vmem>>) attributes {dimension_semantics = [], scalar_prefetch = 0 : i64, scratch_operands = 0 : i64, tpu.core_type = #tpu.core_type<tc>} {
    %c0 = arith.constant 0 : index
    %c0_0 = arith.constant 0 : index
    %0 = vector.load %arg0[%c0, %c0_0] : memref<16x384xf32, #tpu.memory_space<vmem>>, vector<16x384xf32>
    %c0_1 = arith.constant 0 : index
    %c0_2 = arith.constant 0 : index
    %1 = vector.load %arg2[%c0_1, %c0_2] : memref<384x32xf32, #tpu.memory_space<vmem>>, vector<384x32xf32>
    %c0_3 = arith.constant 0 : index
    %c0_4 = arith.constant 0 : index
    %2 = vector.load %arg3[%c0_3, %c0_4] : memref<32x32xf32, #tpu.memory_space<vmem>>, vector<32x32xf32>
    %c0_5 = arith.constant 0 : index
    %c0_6 = arith.constant 0 : index
    %3 = vector.load %arg4[%c0_5, %c0_6] : memref<4x32xf32, #tpu.memory_space<vmem>>, vector<4x32xf32>
    %cst = arith.constant dense<0.000000e+00> : vector<16x32xf32>
    %4 = tpu.matmul %0, %1, %cst {dimension_numbers = #tpu.dot_dimension_numbers<[1], [0], [0], [1], [0, 0, 1, 1], [], []>} : vector<16x384xf32>, vector<384x32xf32>, vector<16x32xf32> -> vector<16x32xf32>
    %5 = vector.extract_strided_slice %3 {offsets = [0, 0], sizes = [1, 32], strides = [1, 1]} : vector<4x32xf32> to vector<1x32xf32>
    %6 = vector.broadcast %5 : vector<1x32xf32> to vector<16x32xf32>
    %7 = arith.addf %4, %6 : vector<16x32xf32>
    %cst_7 = arith.constant 0.000000e+00 : f32
    %8 = vector.broadcast %cst_7 : f32 to vector<16x32xf32>
    %9 = arith.maximumf %7, %8 : vector<16x32xf32>
    %cst_8 = arith.constant dense<0.000000e+00> : vector<16x32xf32>
    %10 = tpu.matmul %9, %2, %cst_8 {dimension_numbers = #tpu.dot_dimension_numbers<[1], [0], [0], [1], [0, 0, 1, 1], [], []>} : vector<16x32xf32>, vector<32x32xf32>, vector<16x32xf32> -> vector<16x32xf32>
    %11 = vector.extract_strided_slice %3 {offsets = [1, 0], sizes = [1, 32], strides = [1, 1]} : vector<4x32xf32> to vector<1x32xf32>
    %12 = vector.broadcast %11 : vector<1x32xf32> to vector<16x32xf32>
    %13 = arith.addf %10, %12 : vector<16x32xf32>
    %14 = vector.extract_strided_slice %3 {offsets = [2, 0], sizes = [1, 32], strides = [1, 1]} : vector<4x32xf32> to vector<1x32xf32>
    %15 = vector.extract_strided_slice %3 {offsets = [3, 0], sizes = [1, 32], strides = [1, 1]} : vector<4x32xf32> to vector<1x32xf32>
    %cst_9 = arith.constant dense<0.000000e+00> : vector<16xf32>
    %16 = vector.multi_reduction <add>, %13, %cst_9 [1] : vector<16x32xf32> to vector<16xf32>
    %17 = vector.shape_cast %16 : vector<16xf32> to vector<16x1xf32>
    %cst_10 = arith.constant 3.200000e+01 : f32
    %18 = vector.broadcast %cst_10 : f32 to vector<16x1xf32>
    %19 = arith.divf %17, %18 : vector<16x1xf32>
    %20 = vector.broadcast %19 : vector<16x1xf32> to vector<16x32xf32>
    %21 = arith.subf %13, %20 : vector<16x32xf32>
    %22 = arith.mulf %21, %21 : vector<16x32xf32>
    %cst_11 = arith.constant dense<0.000000e+00> : vector<16xf32>
    %23 = vector.multi_reduction <add>, %22, %cst_11 [1] : vector<16x32xf32> to vector<16xf32>
    %24 = vector.shape_cast %23 : vector<16xf32> to vector<16x1xf32>
    %cst_12 = arith.constant 3.200000e+01 : f32
    %25 = vector.broadcast %cst_12 : f32 to vector<16x1xf32>
    %26 = arith.divf %24, %25 : vector<16x1xf32>
    %27 = vector.broadcast %19 : vector<16x1xf32> to vector<16x32xf32>
    %28 = arith.subf %13, %27 : vector<16x32xf32>
    %cst_13 = arith.constant 9.99999996E-13 : f32
    %29 = vector.broadcast %cst_13 : f32 to vector<16x1xf32>
    %30 = arith.addf %26, %29 : vector<16x1xf32>
    %31 = math.rsqrt %30 : vector<16x1xf32>
    %32 = vector.broadcast %31 : vector<16x1xf32> to vector<16x32xf32>
    %33 = arith.mulf %28, %32 : vector<16x32xf32>
    %34 = vector.broadcast %14 : vector<1x32xf32> to vector<16x32xf32>
    %35 = arith.mulf %33, %34 : vector<16x32xf32>
    %36 = vector.broadcast %15 : vector<1x32xf32> to vector<16x32xf32>
    %37 = arith.addf %35, %36 : vector<16x32xf32>
    %38 = vector.shape_cast %37 : vector<16x32xf32> to vector<2x8x32xf32>
    %c0_14 = arith.constant 0 : index
    %c0_15 = arith.constant 0 : index
    %39 = vector.load %arg1[%c0_14, %c0_15] : memref<16x2048xf32, #tpu.memory_space<vmem>>, vector<16x2048xf32>
    %c0_16 = arith.constant 0 : index
    %c0_17 = arith.constant 0 : index
    %40 = vector.load %arg5[%c0_16, %c0_17] : memref<2048x32xf32, #tpu.memory_space<vmem>>, vector<2048x32xf32>
    %c0_18 = arith.constant 0 : index
    %c0_19 = arith.constant 0 : index
    %41 = vector.load %arg6[%c0_18, %c0_19] : memref<32x32xf32, #tpu.memory_space<vmem>>, vector<32x32xf32>
    %c0_20 = arith.constant 0 : index
    %c0_21 = arith.constant 0 : index
    %42 = vector.load %arg7[%c0_20, %c0_21] : memref<4x32xf32, #tpu.memory_space<vmem>>, vector<4x32xf32>
    %cst_22 = arith.constant dense<0.000000e+00> : vector<16x32xf32>
    %43 = tpu.matmul %39, %40, %cst_22 {dimension_numbers = #tpu.dot_dimension_numbers<[1], [0], [0], [1], [0, 0, 1, 1], [], []>} : vector<16x2048xf32>, vector<2048x32xf32>, vector<16x32xf32> -> vector<16x32xf32>
    %44 = vector.extract_strided_slice %42 {offsets = [0, 0], sizes = [1, 32], strides = [1, 1]} : vector<4x32xf32> to vector<1x32xf32>
    %45 = vector.broadcast %44 : vector<1x32xf32> to vector<16x32xf32>
    %46 = arith.addf %43, %45 : vector<16x32xf32>
    %cst_23 = arith.constant 0.000000e+00 : f32
    %47 = vector.broadcast %cst_23 : f32 to vector<16x32xf32>
    %48 = arith.maximumf %46, %47 : vector<16x32xf32>
    %cst_24 = arith.constant dense<0.000000e+00> : vector<16x32xf32>
    %49 = tpu.matmul %48, %41, %cst_24 {dimension_numbers = #tpu.dot_dimension_numbers<[1], [0], [0], [1], [0, 0, 1, 1], [], []>} : vector<16x32xf32>, vector<32x32xf32>, vector<16x32xf32> -> vector<16x32xf32>
    %50 = vector.extract_strided_slice %42 {offsets = [1, 0], sizes = [1, 32], strides = [1, 1]} : vector<4x32xf32> to vector<1x32xf32>
    %51 = vector.broadcast %50 : vector<1x32xf32> to vector<16x32xf32>
    %52 = arith.addf %49, %51 : vector<16x32xf32>
    %53 = vector.extract_strided_slice %42 {offsets = [2, 0], sizes = [1, 32], strides = [1, 1]} : vector<4x32xf32> to vector<1x32xf32>
    %54 = vector.extract_strided_slice %42 {offsets = [3, 0], sizes = [1, 32], strides = [1, 1]} : vector<4x32xf32> to vector<1x32xf32>
    %cst_25 = arith.constant dense<0.000000e+00> : vector<16xf32>
    %55 = vector.multi_reduction <add>, %52, %cst_25 [1] : vector<16x32xf32> to vector<16xf32>
    %56 = vector.shape_cast %55 : vector<16xf32> to vector<16x1xf32>
    %cst_26 = arith.constant 3.200000e+01 : f32
    %57 = vector.broadcast %cst_26 : f32 to vector<16x1xf32>
    %58 = arith.divf %56, %57 : vector<16x1xf32>
    %59 = vector.broadcast %58 : vector<16x1xf32> to vector<16x32xf32>
    %60 = arith.subf %52, %59 : vector<16x32xf32>
    %61 = arith.mulf %60, %60 : vector<16x32xf32>
    %cst_27 = arith.constant dense<0.000000e+00> : vector<16xf32>
    %62 = vector.multi_reduction <add>, %61, %cst_27 [1] : vector<16x32xf32> to vector<16xf32>
    %63 = vector.shape_cast %62 : vector<16xf32> to vector<16x1xf32>
    %cst_28 = arith.constant 3.200000e+01 : f32
    %64 = vector.broadcast %cst_28 : f32 to vector<16x1xf32>
    %65 = arith.divf %63, %64 : vector<16x1xf32>
    %66 = vector.broadcast %58 : vector<16x1xf32> to vector<16x32xf32>
    %67 = arith.subf %52, %66 : vector<16x32xf32>
    %cst_29 = arith.constant 9.99999996E-13 : f32
    %68 = vector.broadcast %cst_29 : f32 to vector<16x1xf32>
    %69 = arith.addf %65, %68 : vector<16x1xf32>
    %70 = math.rsqrt %69 : vector<16x1xf32>
    %71 = vector.broadcast %70 : vector<16x1xf32> to vector<16x32xf32>
    %72 = arith.mulf %67, %71 : vector<16x32xf32>
    %73 = vector.broadcast %53 : vector<1x32xf32> to vector<16x32xf32>
    %74 = arith.mulf %72, %73 : vector<16x32xf32>
    %75 = vector.broadcast %54 : vector<1x32xf32> to vector<16x32xf32>
    %76 = arith.addf %74, %75 : vector<16x32xf32>
    %77 = vector.shape_cast %76 : vector<16x32xf32> to vector<2x8x32xf32>
    %c0_30 = arith.constant 0 : index
    %c0_31 = arith.constant 0 : index
    %c0_32 = arith.constant 0 : index
    %c0_33 = arith.constant 0 : index
    %78 = vector.load %arg8[%c0_30, %c0_31, %c0_32, %c0_33] : memref<3x2x32x32xf32, #tpu.memory_space<vmem>>, vector<1x2x32x32xf32>
    %79 = vector.shape_cast %78 : vector<1x2x32x32xf32> to vector<2x32x32xf32>
    %c0_34 = arith.constant 0 : index
    %c0_35 = arith.constant 0 : index
    %c0_36 = arith.constant 0 : index
    %80 = vector.load %arg9[%c0_34, %c0_35, %c0_36] : memref<3x6x32xf32, #tpu.memory_space<vmem>>, vector<1x6x32xf32>
    %81 = vector.shape_cast %80 : vector<1x6x32xf32> to vector<6x32xf32>
    %82 = vector.extract_strided_slice %79 {offsets = [0, 0, 0], sizes = [1, 32, 32], strides = [1, 1, 1]} : vector<2x32x32xf32> to vector<1x32x32xf32>
    %83 = vector.shape_cast %82 : vector<1x32x32xf32> to vector<32x32xf32>
    %84 = vector.extract_strided_slice %81 {offsets = [0, 0], sizes = [1, 32], strides = [1, 1]} : vector<6x32xf32> to vector<1x32xf32>
    %85 = vector.extract_strided_slice %81 {offsets = [1, 0], sizes = [1, 32], strides = [1, 1]} : vector<6x32xf32> to vector<1x32xf32>
    %86 = vector.extract_strided_slice %81 {offsets = [2, 0], sizes = [1, 32], strides = [1, 1]} : vector<6x32xf32> to vector<1x32xf32>
    "tpu.trace_start"() <{level = 10 : i32, message = "bqd,bkd->bqk"}> : () -> ()
    %cst_37 = arith.constant dense<0.000000e+00> : vector<2x8x8xf32>
    %87 = tpu.matmul %38, %77, %cst_37 {dimension_numbers = #tpu.dot_dimension_numbers<[2], [2], [1], [1], [0, 0, 0, 1, 1, 1], [0], [0]>} : vector<2x8x32xf32>, vector<2x8x32xf32>, vector<2x8x8xf32> -> vector<2x8x8xf32>
    "tpu.trace_stop"() : () -> ()
    %cst_38 = arith.constant dense<0xFF800000> : vector<2x8xf32>
    %88 = vector.multi_reduction <maximumf>, %87, %cst_38 [2] : vector<2x8x8xf32> to vector<2x8xf32>
    %89 = vector.shape_cast %88 : vector<2x8xf32> to vector<2x8x1xf32>
    %90 = vector.broadcast %89 : vector<2x8x1xf32> to vector<2x8x8xf32>
    %91 = arith.subf %87, %90 : vector<2x8x8xf32>
    %92 = math.exp %91 : vector<2x8x8xf32>
    %cst_39 = arith.constant dense<0.000000e+00> : vector<2x8xf32>
    %93 = vector.multi_reduction <add>, %92, %cst_39 [2] : vector<2x8x8xf32> to vector<2x8xf32>
    %94 = vector.shape_cast %93 : vector<2x8xf32> to vector<2x8x1xf32>
    %95 = vector.broadcast %94 : vector<2x8x1xf32> to vector<2x8x8xf32>
    %96 = arith.divf %92, %95 : vector<2x8x8xf32>
    "tpu.trace_start"() <{level = 10 : i32, message = "bqk,bkd->bqd"}> : () -> ()
    %cst_40 = arith.constant dense<0.000000e+00> : vector<2x8x32xf32>
    %97 = tpu.matmul %96, %77, %cst_40 {dimension_numbers = #tpu.dot_dimension_numbers<[2], [1], [1], [2], [0, 0, 0, 1, 1, 2], [0], [0]>} : vector<2x8x8xf32>, vector<2x8x32xf32>, vector<2x8x32xf32> -> vector<2x8x32xf32>
    "tpu.trace_stop"() : () -> ()
    %98 = vector.shape_cast %97 : vector<2x8x32xf32> to vector<16x32xf32>
    %cst_41 = arith.constant dense<0.000000e+00> : vector<16x32xf32>
    %99 = tpu.matmul %98, %83, %cst_41 {dimension_numbers = #tpu.dot_dimension_numbers<[1], [0], [0], [1], [0, 0, 1, 1], [], []>} : vector<16x32xf32>, vector<32x32xf32>, vector<16x32xf32> -> vector<16x32xf32>
    %100 = vector.broadcast %84 : vector<1x32xf32> to vector<16x32xf32>
    %101 = arith.addf %99, %100 : vector<16x32xf32>
    %102 = vector.shape_cast %101 : vector<16x32xf32> to vector<2x8x32xf32>
    %103 = arith.addf %102, %38 : vector<2x8x32xf32>
    %cst_42 = arith.constant dense<0.000000e+00> : vector<2x8xf32>
    %104 = vector.multi_reduction <add>, %103, %cst_42 [2] : vector<2x8x32xf32> to vector<2x8xf32>
    %105 = vector.shape_cast %104 : vector<2x8xf32> to vector<2x8x1xf32>
    %cst_43 = arith.constant 3.200000e+01 : f32
    %106 = vector.broadcast %cst_43 : f32 to vector<2x8x1xf32>
    %107 = arith.divf %105, %106 : vector<2x8x1xf32>
    %108 = vector.broadcast %107 : vector<2x8x1xf32> to vector<2x8x32xf32>
    %109 = arith.subf %103, %108 : vector<2x8x32xf32>
    %110 = arith.mulf %109, %109 : vector<2x8x32xf32>
    %cst_44 = arith.constant dense<0.000000e+00> : vector<2x8xf32>
    %111 = vector.multi_reduction <add>, %110, %cst_44 [2] : vector<2x8x32xf32> to vector<2x8xf32>
    %112 = vector.shape_cast %111 : vector<2x8xf32> to vector<2x8x1xf32>
    %cst_45 = arith.constant 3.200000e+01 : f32
    %113 = vector.broadcast %cst_45 : f32 to vector<2x8x1xf32>
    %114 = arith.divf %112, %113 : vector<2x8x1xf32>
    %115 = vector.broadcast %107 : vector<2x8x1xf32> to vector<2x8x32xf32>
    %116 = arith.subf %103, %115 : vector<2x8x32xf32>
    %cst_46 = arith.constant 9.99999996E-13 : f32
    %117 = vector.broadcast %cst_46 : f32 to vector<2x8x1xf32>
    %118 = arith.addf %114, %117 : vector<2x8x1xf32>
    %119 = math.rsqrt %118 : vector<2x8x1xf32>
    %120 = vector.broadcast %119 : vector<2x8x1xf32> to vector<2x8x32xf32>
    %121 = arith.mulf %116, %120 : vector<2x8x32xf32>
    %122 = vector.shape_cast %85 : vector<1x32xf32> to vector<1x1x32xf32>
    %123 = vector.broadcast %122 : vector<1x1x32xf32> to vector<2x8x32xf32>
    %124 = arith.mulf %121, %123 : vector<2x8x32xf32>
    %125 = vector.shape_cast %86 : vector<1x32xf32> to vector<1x1x32xf32>
    %126 = vector.broadcast %125 : vector<1x1x32xf32> to vector<2x8x32xf32>
    %127 = arith.addf %124, %126 : vector<2x8x32xf32>
    %128 = vector.extract_strided_slice %79 {offsets = [1, 0, 0], sizes = [1, 32, 32], strides = [1, 1, 1]} : vector<2x32x32xf32> to vector<1x32x32xf32>
    %129 = vector.shape_cast %128 : vector<1x32x32xf32> to vector<32x32xf32>
    %130 = vector.extract_strided_slice %81 {offsets = [3, 0], sizes = [1, 32], strides = [1, 1]} : vector<6x32xf32> to vector<1x32xf32>
    %131 = vector.extract_strided_slice %81 {offsets = [4, 0], sizes = [1, 32], strides = [1, 1]} : vector<6x32xf32> to vector<1x32xf32>
    %132 = vector.extract_strided_slice %81 {offsets = [5, 0], sizes = [1, 32], strides = [1, 1]} : vector<6x32xf32> to vector<1x32xf32>
    "tpu.trace_start"() <{level = 10 : i32, message = "bqd,bkd->bqk"}> : () -> ()
    %cst_47 = arith.constant dense<0.000000e+00> : vector<2x8x8xf32>
    %133 = tpu.matmul %77, %38, %cst_47 {dimension_numbers = #tpu.dot_dimension_numbers<[2], [2], [1], [1], [0, 0, 0, 1, 1, 1], [0], [0]>} : vector<2x8x32xf32>, vector<2x8x32xf32>, vector<2x8x8xf32> -> vector<2x8x8xf32>
    "tpu.trace_stop"() : () -> ()
    %cst_48 = arith.constant dense<0xFF800000> : vector<2x8xf32>
    %134 = vector.multi_reduction <maximumf>, %133, %cst_48 [2] : vector<2x8x8xf32> to vector<2x8xf32>
    %135 = vector.shape_cast %134 : vector<2x8xf32> to vector<2x8x1xf32>
    %136 = vector.broadcast %135 : vector<2x8x1xf32> to vector<2x8x8xf32>
    %137 = arith.subf %133, %136 : vector<2x8x8xf32>
    %138 = math.exp %137 : vector<2x8x8xf32>
    %cst_49 = arith.constant dense<0.000000e+00> : vector<2x8xf32>
    %139 = vector.multi_reduction <add>, %138, %cst_49 [2] : vector<2x8x8xf32> to vector<2x8xf32>
    %140 = vector.shape_cast %139 : vector<2x8xf32> to vector<2x8x1xf32>
    %141 = vector.broadcast %140 : vector<2x8x1xf32> to vector<2x8x8xf32>
    %142 = arith.divf %138, %141 : vector<2x8x8xf32>
    "tpu.trace_start"() <{level = 10 : i32, message = "bqk,bkd->bqd"}> : () -> ()
    %cst_50 = arith.constant dense<0.000000e+00> : vector<2x8x32xf32>
    %143 = tpu.matmul %142, %38, %cst_50 {dimension_numbers = #tpu.dot_dimension_numbers<[2], [1], [1], [2], [0, 0, 0, 1, 1, 2], [0], [0]>} : vector<2x8x8xf32>, vector<2x8x32xf32>, vector<2x8x32xf32> -> vector<2x8x32xf32>
    "tpu.trace_stop"() : () -> ()
    %144 = vector.shape_cast %143 : vector<2x8x32xf32> to vector<16x32xf32>
    %cst_51 = arith.constant dense<0.000000e+00> : vector<16x32xf32>
    %145 = tpu.matmul %144, %129, %cst_51 {dimension_numbers = #tpu.dot_dimension_numbers<[1], [0], [0], [1], [0, 0, 1, 1], [], []>} : vector<16x32xf32>, vector<32x32xf32>, vector<16x32xf32> -> vector<16x32xf32>
    %146 = vector.broadcast %130 : vector<1x32xf32> to vector<16x32xf32>
    %147 = arith.addf %145, %146 : vector<16x32xf32>
    %148 = vector.shape_cast %147 : vector<16x32xf32> to vector<2x8x32xf32>
    %149 = arith.addf %148, %77 : vector<2x8x32xf32>
    %cst_52 = arith.constant dense<0.000000e+00> : vector<2x8xf32>
    %150 = vector.multi_reduction <add>, %149, %cst_52 [2] : vector<2x8x32xf32> to vector<2x8xf32>
    %151 = vector.shape_cast %150 : vector<2x8xf32> to vector<2x8x1xf32>
    %cst_53 = arith.constant 3.200000e+01 : f32
    %152 = vector.broadcast %cst_53 : f32 to vector<2x8x1xf32>
    %153 = arith.divf %151, %152 : vector<2x8x1xf32>
    %154 = vector.broadcast %153 : vector<2x8x1xf32> to vector<2x8x32xf32>
    %155 = arith.subf %149, %154 : vector<2x8x32xf32>
    %156 = arith.mulf %155, %155 : vector<2x8x32xf32>
    %cst_54 = arith.constant dense<0.000000e+00> : vector<2x8xf32>
    %157 = vector.multi_reduction <add>, %156, %cst_54 [2] : vector<2x8x32xf32> to vector<2x8xf32>
    %158 = vector.shape_cast %157 : vector<2x8xf32> to vector<2x8x1xf32>
    %cst_55 = arith.constant 3.200000e+01 : f32
    %159 = vector.broadcast %cst_55 : f32 to vector<2x8x1xf32>
    %160 = arith.divf %158, %159 : vector<2x8x1xf32>
    %161 = vector.broadcast %153 : vector<2x8x1xf32> to vector<2x8x32xf32>
    %162 = arith.subf %149, %161 : vector<2x8x32xf32>
    %cst_56 = arith.constant 9.99999996E-13 : f32
    %163 = vector.broadcast %cst_56 : f32 to vector<2x8x1xf32>
    %164 = arith.addf %160, %163 : vector<2x8x1xf32>
    %165 = math.rsqrt %164 : vector<2x8x1xf32>
    %166 = vector.broadcast %165 : vector<2x8x1xf32> to vector<2x8x32xf32>
    %167 = arith.mulf %162, %166 : vector<2x8x32xf32>
    %168 = vector.shape_cast %131 : vector<1x32xf32> to vector<1x1x32xf32>
    %169 = vector.broadcast %168 : vector<1x1x32xf32> to vector<2x8x32xf32>
    %170 = arith.mulf %167, %169 : vector<2x8x32xf32>
    %171 = vector.shape_cast %132 : vector<1x32xf32> to vector<1x1x32xf32>
    %172 = vector.broadcast %171 : vector<1x1x32xf32> to vector<2x8x32xf32>
    %173 = arith.addf %170, %172 : vector<2x8x32xf32>
    %c1 = arith.constant 1 : index
    %c0_57 = arith.constant 0 : index
    %c0_58 = arith.constant 0 : index
    %c0_59 = arith.constant 0 : index
    %174 = vector.load %arg8[%c1, %c0_57, %c0_58, %c0_59] : memref<3x2x32x32xf32, #tpu.memory_space<vmem>>, vector<1x2x32x32xf32>
    %175 = vector.shape_cast %174 : vector<1x2x32x32xf32> to vector<2x32x32xf32>
    %c1_60 = arith.constant 1 : index
    %c0_61 = arith.constant 0 : index
    %c0_62 = arith.constant 0 : index
    %176 = vector.load %arg9[%c1_60, %c0_61, %c0_62] : memref<3x6x32xf32, #tpu.memory_space<vmem>>, vector<1x6x32xf32>
    %177 = vector.shape_cast %176 : vector<1x6x32xf32> to vector<6x32xf32>
    %178 = vector.extract_strided_slice %175 {offsets = [0, 0, 0], sizes = [1, 32, 32], strides = [1, 1, 1]} : vector<2x32x32xf32> to vector<1x32x32xf32>
    %179 = vector.shape_cast %178 : vector<1x32x32xf32> to vector<32x32xf32>
    %180 = vector.extract_strided_slice %177 {offsets = [0, 0], sizes = [1, 32], strides = [1, 1]} : vector<6x32xf32> to vector<1x32xf32>
    %181 = vector.extract_strided_slice %177 {offsets = [1, 0], sizes = [1, 32], strides = [1, 1]} : vector<6x32xf32> to vector<1x32xf32>
    %182 = vector.extract_strided_slice %177 {offsets = [2, 0], sizes = [1, 32], strides = [1, 1]} : vector<6x32xf32> to vector<1x32xf32>
    "tpu.trace_start"() <{level = 10 : i32, message = "bqd,bkd->bqk"}> : () -> ()
    %cst_63 = arith.constant dense<0.000000e+00> : vector<2x8x8xf32>
    %183 = tpu.matmul %127, %173, %cst_63 {dimension_numbers = #tpu.dot_dimension_numbers<[2], [2], [1], [1], [0, 0, 0, 1, 1, 1], [0], [0]>} : vector<2x8x32xf32>, vector<2x8x32xf32>, vector<2x8x8xf32> -> vector<2x8x8xf32>
    "tpu.trace_stop"() : () -> ()
    %cst_64 = arith.constant dense<0xFF800000> : vector<2x8xf32>
    %184 = vector.multi_reduction <maximumf>, %183, %cst_64 [2] : vector<2x8x8xf32> to vector<2x8xf32>
    %185 = vector.shape_cast %184 : vector<2x8xf32> to vector<2x8x1xf32>
    %186 = vector.broadcast %185 : vector<2x8x1xf32> to vector<2x8x8xf32>
    %187 = arith.subf %183, %186 : vector<2x8x8xf32>
    %188 = math.exp %187 : vector<2x8x8xf32>
    %cst_65 = arith.constant dense<0.000000e+00> : vector<2x8xf32>
    %189 = vector.multi_reduction <add>, %188, %cst_65 [2] : vector<2x8x8xf32> to vector<2x8xf32>
    %190 = vector.shape_cast %189 : vector<2x8xf32> to vector<2x8x1xf32>
    %191 = vector.broadcast %190 : vector<2x8x1xf32> to vector<2x8x8xf32>
    %192 = arith.divf %188, %191 : vector<2x8x8xf32>
    "tpu.trace_start"() <{level = 10 : i32, message = "bqk,bkd->bqd"}> : () -> ()
    %cst_66 = arith.constant dense<0.000000e+00> : vector<2x8x32xf32>
    %193 = tpu.matmul %192, %173, %cst_66 {dimension_numbers = #tpu.dot_dimension_numbers<[2], [1], [1], [2], [0, 0, 0, 1, 1, 2], [0], [0]>} : vector<2x8x8xf32>, vector<2x8x32xf32>, vector<2x8x32xf32> -> vector<2x8x32xf32>
    "tpu.trace_stop"() : () -> ()
    %194 = vector.shape_cast %193 : vector<2x8x32xf32> to vector<16x32xf32>
    %cst_67 = arith.constant dense<0.000000e+00> : vector<16x32xf32>
    %195 = tpu.matmul %194, %179, %cst_67 {dimension_numbers = #tpu.dot_dimension_numbers<[1], [0], [0], [1], [0, 0, 1, 1], [], []>} : vector<16x32xf32>, vector<32x32xf32>, vector<16x32xf32> -> vector<16x32xf32>
    %196 = vector.broadcast %180 : vector<1x32xf32> to vector<16x32xf32>
    %197 = arith.addf %195, %196 : vector<16x32xf32>
    %198 = vector.shape_cast %197 : vector<16x32xf32> to vector<2x8x32xf32>
    %199 = arith.addf %198, %127 : vector<2x8x32xf32>
    %cst_68 = arith.constant dense<0.000000e+00> : vector<2x8xf32>
    %200 = vector.multi_reduction <add>, %199, %cst_68 [2] : vector<2x8x32xf32> to vector<2x8xf32>
    %201 = vector.shape_cast %200 : vector<2x8xf32> to vector<2x8x1xf32>
    %cst_69 = arith.constant 3.200000e+01 : f32
    %202 = vector.broadcast %cst_69 : f32 to vector<2x8x1xf32>
    %203 = arith.divf %201, %202 : vector<2x8x1xf32>
    %204 = vector.broadcast %203 : vector<2x8x1xf32> to vector<2x8x32xf32>
    %205 = arith.subf %199, %204 : vector<2x8x32xf32>
    %206 = arith.mulf %205, %205 : vector<2x8x32xf32>
    %cst_70 = arith.constant dense<0.000000e+00> : vector<2x8xf32>
    %207 = vector.multi_reduction <add>, %206, %cst_70 [2] : vector<2x8x32xf32> to vector<2x8xf32>
    %208 = vector.shape_cast %207 : vector<2x8xf32> to vector<2x8x1xf32>
    %cst_71 = arith.constant 3.200000e+01 : f32
    %209 = vector.broadcast %cst_71 : f32 to vector<2x8x1xf32>
    %210 = arith.divf %208, %209 : vector<2x8x1xf32>
    %211 = vector.broadcast %203 : vector<2x8x1xf32> to vector<2x8x32xf32>
    %212 = arith.subf %199, %211 : vector<2x8x32xf32>
    %cst_72 = arith.constant 9.99999996E-13 : f32
    %213 = vector.broadcast %cst_72 : f32 to vector<2x8x1xf32>
    %214 = arith.addf %210, %213 : vector<2x8x1xf32>
    %215 = math.rsqrt %214 : vector<2x8x1xf32>
    %216 = vector.broadcast %215 : vector<2x8x1xf32> to vector<2x8x32xf32>
    %217 = arith.mulf %212, %216 : vector<2x8x32xf32>
    %218 = vector.shape_cast %181 : vector<1x32xf32> to vector<1x1x32xf32>
    %219 = vector.broadcast %218 : vector<1x1x32xf32> to vector<2x8x32xf32>
    %220 = arith.mulf %217, %219 : vector<2x8x32xf32>
    %221 = vector.shape_cast %182 : vector<1x32xf32> to vector<1x1x32xf32>
    %222 = vector.broadcast %221 : vector<1x1x32xf32> to vector<2x8x32xf32>
    %223 = arith.addf %220, %222 : vector<2x8x32xf32>
    %224 = vector.extract_strided_slice %175 {offsets = [1, 0, 0], sizes = [1, 32, 32], strides = [1, 1, 1]} : vector<2x32x32xf32> to vector<1x32x32xf32>
    %225 = vector.shape_cast %224 : vector<1x32x32xf32> to vector<32x32xf32>
    %226 = vector.extract_strided_slice %177 {offsets = [3, 0], sizes = [1, 32], strides = [1, 1]} : vector<6x32xf32> to vector<1x32xf32>
    %227 = vector.extract_strided_slice %177 {offsets = [4, 0], sizes = [1, 32], strides = [1, 1]} : vector<6x32xf32> to vector<1x32xf32>
    %228 = vector.extract_strided_slice %177 {offsets = [5, 0], sizes = [1, 32], strides = [1, 1]} : vector<6x32xf32> to vector<1x32xf32>
    "tpu.trace_start"() <{level = 10 : i32, message = "bqd,bkd->bqk"}> : () -> ()
    %cst_73 = arith.constant dense<0.000000e+00> : vector<2x8x8xf32>
    %229 = tpu.matmul %173, %127, %cst_73 {dimension_numbers = #tpu.dot_dimension_numbers<[2], [2], [1], [1], [0, 0, 0, 1, 1, 1], [0], [0]>} : vector<2x8x32xf32>, vector<2x8x32xf32>, vector<2x8x8xf32> -> vector<2x8x8xf32>
    "tpu.trace_stop"() : () -> ()
    %cst_74 = arith.constant dense<0xFF800000> : vector<2x8xf32>
    %230 = vector.multi_reduction <maximumf>, %229, %cst_74 [2] : vector<2x8x8xf32> to vector<2x8xf32>
    %231 = vector.shape_cast %230 : vector<2x8xf32> to vector<2x8x1xf32>
    %232 = vector.broadcast %231 : vector<2x8x1xf32> to vector<2x8x8xf32>
    %233 = arith.subf %229, %232 : vector<2x8x8xf32>
    %234 = math.exp %233 : vector<2x8x8xf32>
    %cst_75 = arith.constant dense<0.000000e+00> : vector<2x8xf32>
    %235 = vector.multi_reduction <add>, %234, %cst_75 [2] : vector<2x8x8xf32> to vector<2x8xf32>
    %236 = vector.shape_cast %235 : vector<2x8xf32> to vector<2x8x1xf32>
    %237 = vector.broadcast %236 : vector<2x8x1xf32> to vector<2x8x8xf32>
    %238 = arith.divf %234, %237 : vector<2x8x8xf32>
    "tpu.trace_start"() <{level = 10 : i32, message = "bqk,bkd->bqd"}> : () -> ()
    %cst_76 = arith.constant dense<0.000000e+00> : vector<2x8x32xf32>
    %239 = tpu.matmul %238, %127, %cst_76 {dimension_numbers = #tpu.dot_dimension_numbers<[2], [1], [1], [2], [0, 0, 0, 1, 1, 2], [0], [0]>} : vector<2x8x8xf32>, vector<2x8x32xf32>, vector<2x8x32xf32> -> vector<2x8x32xf32>
    "tpu.trace_stop"() : () -> ()
    %240 = vector.shape_cast %239 : vector<2x8x32xf32> to vector<16x32xf32>
    %cst_77 = arith.constant dense<0.000000e+00> : vector<16x32xf32>
    %241 = tpu.matmul %240, %225, %cst_77 {dimension_numbers = #tpu.dot_dimension_numbers<[1], [0], [0], [1], [0, 0, 1, 1], [], []>} : vector<16x32xf32>, vector<32x32xf32>, vector<16x32xf32> -> vector<16x32xf32>
    %242 = vector.broadcast %226 : vector<1x32xf32> to vector<16x32xf32>
    %243 = arith.addf %241, %242 : vector<16x32xf32>
    %244 = vector.shape_cast %243 : vector<16x32xf32> to vector<2x8x32xf32>
    %245 = arith.addf %244, %173 : vector<2x8x32xf32>
    %cst_78 = arith.constant dense<0.000000e+00> : vector<2x8xf32>
    %246 = vector.multi_reduction <add>, %245, %cst_78 [2] : vector<2x8x32xf32> to vector<2x8xf32>
    %247 = vector.shape_cast %246 : vector<2x8xf32> to vector<2x8x1xf32>
    %cst_79 = arith.constant 3.200000e+01 : f32
    %248 = vector.broadcast %cst_79 : f32 to vector<2x8x1xf32>
    %249 = arith.divf %247, %248 : vector<2x8x1xf32>
    %250 = vector.broadcast %249 : vector<2x8x1xf32> to vector<2x8x32xf32>
    %251 = arith.subf %245, %250 : vector<2x8x32xf32>
    %252 = arith.mulf %251, %251 : vector<2x8x32xf32>
    %cst_80 = arith.constant dense<0.000000e+00> : vector<2x8xf32>
    %253 = vector.multi_reduction <add>, %252, %cst_80 [2] : vector<2x8x32xf32> to vector<2x8xf32>
    %254 = vector.shape_cast %253 : vector<2x8xf32> to vector<2x8x1xf32>
    %cst_81 = arith.constant 3.200000e+01 : f32
    %255 = vector.broadcast %cst_81 : f32 to vector<2x8x1xf32>
    %256 = arith.divf %254, %255 : vector<2x8x1xf32>
    %257 = vector.broadcast %249 : vector<2x8x1xf32> to vector<2x8x32xf32>
    %258 = arith.subf %245, %257 : vector<2x8x32xf32>
    %cst_82 = arith.constant 9.99999996E-13 : f32
    %259 = vector.broadcast %cst_82 : f32 to vector<2x8x1xf32>
    %260 = arith.addf %256, %259 : vector<2x8x1xf32>
    %261 = math.rsqrt %260 : vector<2x8x1xf32>
    %262 = vector.broadcast %261 : vector<2x8x1xf32> to vector<2x8x32xf32>
    %263 = arith.mulf %258, %262 : vector<2x8x32xf32>
    %264 = vector.shape_cast %227 : vector<1x32xf32> to vector<1x1x32xf32>
    %265 = vector.broadcast %264 : vector<1x1x32xf32> to vector<2x8x32xf32>
    %266 = arith.mulf %263, %265 : vector<2x8x32xf32>
    %267 = vector.shape_cast %228 : vector<1x32xf32> to vector<1x1x32xf32>
    %268 = vector.broadcast %267 : vector<1x1x32xf32> to vector<2x8x32xf32>
    %269 = arith.addf %266, %268 : vector<2x8x32xf32>
    %c2 = arith.constant 2 : index
    %c0_83 = arith.constant 0 : index
    %c0_84 = arith.constant 0 : index
    %c0_85 = arith.constant 0 : index
    %270 = vector.load %arg8[%c2, %c0_83, %c0_84, %c0_85] : memref<3x2x32x32xf32, #tpu.memory_space<vmem>>, vector<1x2x32x32xf32>
    %271 = vector.shape_cast %270 : vector<1x2x32x32xf32> to vector<2x32x32xf32>
    %c2_86 = arith.constant 2 : index
    %c0_87 = arith.constant 0 : index
    %c0_88 = arith.constant 0 : index
    %272 = vector.load %arg9[%c2_86, %c0_87, %c0_88] : memref<3x6x32xf32, #tpu.memory_space<vmem>>, vector<1x6x32xf32>
    %273 = vector.shape_cast %272 : vector<1x6x32xf32> to vector<6x32xf32>
    %274 = vector.extract_strided_slice %271 {offsets = [0, 0, 0], sizes = [1, 32, 32], strides = [1, 1, 1]} : vector<2x32x32xf32> to vector<1x32x32xf32>
    %275 = vector.shape_cast %274 : vector<1x32x32xf32> to vector<32x32xf32>
    %276 = vector.extract_strided_slice %273 {offsets = [0, 0], sizes = [1, 32], strides = [1, 1]} : vector<6x32xf32> to vector<1x32xf32>
    %277 = vector.extract_strided_slice %273 {offsets = [1, 0], sizes = [1, 32], strides = [1, 1]} : vector<6x32xf32> to vector<1x32xf32>
    %278 = vector.extract_strided_slice %273 {offsets = [2, 0], sizes = [1, 32], strides = [1, 1]} : vector<6x32xf32> to vector<1x32xf32>
    "tpu.trace_start"() <{level = 10 : i32, message = "bqd,bkd->bqk"}> : () -> ()
    %cst_89 = arith.constant dense<0.000000e+00> : vector<2x8x8xf32>
    %279 = tpu.matmul %223, %269, %cst_89 {dimension_numbers = #tpu.dot_dimension_numbers<[2], [2], [1], [1], [0, 0, 0, 1, 1, 1], [0], [0]>} : vector<2x8x32xf32>, vector<2x8x32xf32>, vector<2x8x8xf32> -> vector<2x8x8xf32>
    "tpu.trace_stop"() : () -> ()
    %cst_90 = arith.constant dense<0xFF800000> : vector<2x8xf32>
    %280 = vector.multi_reduction <maximumf>, %279, %cst_90 [2] : vector<2x8x8xf32> to vector<2x8xf32>
    %281 = vector.shape_cast %280 : vector<2x8xf32> to vector<2x8x1xf32>
    %282 = vector.broadcast %281 : vector<2x8x1xf32> to vector<2x8x8xf32>
    %283 = arith.subf %279, %282 : vector<2x8x8xf32>
    %284 = math.exp %283 : vector<2x8x8xf32>
    %cst_91 = arith.constant dense<0.000000e+00> : vector<2x8xf32>
    %285 = vector.multi_reduction <add>, %284, %cst_91 [2] : vector<2x8x8xf32> to vector<2x8xf32>
    %286 = vector.shape_cast %285 : vector<2x8xf32> to vector<2x8x1xf32>
    %287 = vector.broadcast %286 : vector<2x8x1xf32> to vector<2x8x8xf32>
    %288 = arith.divf %284, %287 : vector<2x8x8xf32>
    "tpu.trace_start"() <{level = 10 : i32, message = "bqk,bkd->bqd"}> : () -> ()
    %cst_92 = arith.constant dense<0.000000e+00> : vector<2x8x32xf32>
    %289 = tpu.matmul %288, %269, %cst_92 {dimension_numbers = #tpu.dot_dimension_numbers<[2], [1], [1], [2], [0, 0, 0, 1, 1, 2], [0], [0]>} : vector<2x8x8xf32>, vector<2x8x32xf32>, vector<2x8x32xf32> -> vector<2x8x32xf32>
    "tpu.trace_stop"() : () -> ()
    %290 = vector.shape_cast %289 : vector<2x8x32xf32> to vector<16x32xf32>
    %cst_93 = arith.constant dense<0.000000e+00> : vector<16x32xf32>
    %291 = tpu.matmul %290, %275, %cst_93 {dimension_numbers = #tpu.dot_dimension_numbers<[1], [0], [0], [1], [0, 0, 1, 1], [], []>} : vector<16x32xf32>, vector<32x32xf32>, vector<16x32xf32> -> vector<16x32xf32>
    %292 = vector.broadcast %276 : vector<1x32xf32> to vector<16x32xf32>
    %293 = arith.addf %291, %292 : vector<16x32xf32>
    %294 = vector.shape_cast %293 : vector<16x32xf32> to vector<2x8x32xf32>
    %295 = arith.addf %294, %223 : vector<2x8x32xf32>
    %cst_94 = arith.constant dense<0.000000e+00> : vector<2x8xf32>
    %296 = vector.multi_reduction <add>, %295, %cst_94 [2] : vector<2x8x32xf32> to vector<2x8xf32>
    %297 = vector.shape_cast %296 : vector<2x8xf32> to vector<2x8x1xf32>
    %cst_95 = arith.constant 3.200000e+01 : f32
    %298 = vector.broadcast %cst_95 : f32 to vector<2x8x1xf32>
    %299 = arith.divf %297, %298 : vector<2x8x1xf32>
    %300 = vector.broadcast %299 : vector<2x8x1xf32> to vector<2x8x32xf32>
    %301 = arith.subf %295, %300 : vector<2x8x32xf32>
    %302 = arith.mulf %301, %301 : vector<2x8x32xf32>
    %cst_96 = arith.constant dense<0.000000e+00> : vector<2x8xf32>
    %303 = vector.multi_reduction <add>, %302, %cst_96 [2] : vector<2x8x32xf32> to vector<2x8xf32>
    %304 = vector.shape_cast %303 : vector<2x8xf32> to vector<2x8x1xf32>
    %cst_97 = arith.constant 3.200000e+01 : f32
    %305 = vector.broadcast %cst_97 : f32 to vector<2x8x1xf32>
    %306 = arith.divf %304, %305 : vector<2x8x1xf32>
    %307 = vector.broadcast %299 : vector<2x8x1xf32> to vector<2x8x32xf32>
    %308 = arith.subf %295, %307 : vector<2x8x32xf32>
    %cst_98 = arith.constant 9.99999996E-13 : f32
    %309 = vector.broadcast %cst_98 : f32 to vector<2x8x1xf32>
    %310 = arith.addf %306, %309 : vector<2x8x1xf32>
    %311 = math.rsqrt %310 : vector<2x8x1xf32>
    %312 = vector.broadcast %311 : vector<2x8x1xf32> to vector<2x8x32xf32>
    %313 = arith.mulf %308, %312 : vector<2x8x32xf32>
    %314 = vector.shape_cast %277 : vector<1x32xf32> to vector<1x1x32xf32>
    %315 = vector.broadcast %314 : vector<1x1x32xf32> to vector<2x8x32xf32>
    %316 = arith.mulf %313, %315 : vector<2x8x32xf32>
    %317 = vector.shape_cast %278 : vector<1x32xf32> to vector<1x1x32xf32>
    %318 = vector.broadcast %317 : vector<1x1x32xf32> to vector<2x8x32xf32>
    %319 = arith.addf %316, %318 : vector<2x8x32xf32>
    %320 = vector.extract_strided_slice %271 {offsets = [1, 0, 0], sizes = [1, 32, 32], strides = [1, 1, 1]} : vector<2x32x32xf32> to vector<1x32x32xf32>
    %321 = vector.shape_cast %320 : vector<1x32x32xf32> to vector<32x32xf32>
    %322 = vector.extract_strided_slice %273 {offsets = [3, 0], sizes = [1, 32], strides = [1, 1]} : vector<6x32xf32> to vector<1x32xf32>
    %323 = vector.extract_strided_slice %273 {offsets = [4, 0], sizes = [1, 32], strides = [1, 1]} : vector<6x32xf32> to vector<1x32xf32>
    %324 = vector.extract_strided_slice %273 {offsets = [5, 0], sizes = [1, 32], strides = [1, 1]} : vector<6x32xf32> to vector<1x32xf32>
    "tpu.trace_start"() <{level = 10 : i32, message = "bqd,bkd->bqk"}> : () -> ()
    %cst_99 = arith.constant dense<0.000000e+00> : vector<2x8x8xf32>
    %325 = tpu.matmul %269, %223, %cst_99 {dimension_numbers = #tpu.dot_dimension_numbers<[2], [2], [1], [1], [0, 0, 0, 1, 1, 1], [0], [0]>} : vector<2x8x32xf32>, vector<2x8x32xf32>, vector<2x8x8xf32> -> vector<2x8x8xf32>
    "tpu.trace_stop"() : () -> ()
    %cst_100 = arith.constant dense<0xFF800000> : vector<2x8xf32>
    %326 = vector.multi_reduction <maximumf>, %325, %cst_100 [2] : vector<2x8x8xf32> to vector<2x8xf32>
    %327 = vector.shape_cast %326 : vector<2x8xf32> to vector<2x8x1xf32>
    %328 = vector.broadcast %327 : vector<2x8x1xf32> to vector<2x8x8xf32>
    %329 = arith.subf %325, %328 : vector<2x8x8xf32>
    %330 = math.exp %329 : vector<2x8x8xf32>
    %cst_101 = arith.constant dense<0.000000e+00> : vector<2x8xf32>
    %331 = vector.multi_reduction <add>, %330, %cst_101 [2] : vector<2x8x8xf32> to vector<2x8xf32>
    %332 = vector.shape_cast %331 : vector<2x8xf32> to vector<2x8x1xf32>
    %333 = vector.broadcast %332 : vector<2x8x1xf32> to vector<2x8x8xf32>
    %334 = arith.divf %330, %333 : vector<2x8x8xf32>
    "tpu.trace_start"() <{level = 10 : i32, message = "bqk,bkd->bqd"}> : () -> ()
    %cst_102 = arith.constant dense<0.000000e+00> : vector<2x8x32xf32>
    %335 = tpu.matmul %334, %223, %cst_102 {dimension_numbers = #tpu.dot_dimension_numbers<[2], [1], [1], [2], [0, 0, 0, 1, 1, 2], [0], [0]>} : vector<2x8x8xf32>, vector<2x8x32xf32>, vector<2x8x32xf32> -> vector<2x8x32xf32>
    "tpu.trace_stop"() : () -> ()
    %336 = vector.shape_cast %335 : vector<2x8x32xf32> to vector<16x32xf32>
    %cst_103 = arith.constant dense<0.000000e+00> : vector<16x32xf32>
    %337 = tpu.matmul %336, %321, %cst_103 {dimension_numbers = #tpu.dot_dimension_numbers<[1], [0], [0], [1], [0, 0, 1, 1], [], []>} : vector<16x32xf32>, vector<32x32xf32>, vector<16x32xf32> -> vector<16x32xf32>
    %338 = vector.broadcast %322 : vector<1x32xf32> to vector<16x32xf32>
    %339 = arith.addf %337, %338 : vector<16x32xf32>
    %340 = vector.shape_cast %339 : vector<16x32xf32> to vector<2x8x32xf32>
    %341 = arith.addf %340, %269 : vector<2x8x32xf32>
    %cst_104 = arith.constant dense<0.000000e+00> : vector<2x8xf32>
    %342 = vector.multi_reduction <add>, %341, %cst_104 [2] : vector<2x8x32xf32> to vector<2x8xf32>
    %343 = vector.shape_cast %342 : vector<2x8xf32> to vector<2x8x1xf32>
    %cst_105 = arith.constant 3.200000e+01 : f32
    %344 = vector.broadcast %cst_105 : f32 to vector<2x8x1xf32>
    %345 = arith.divf %343, %344 : vector<2x8x1xf32>
    %346 = vector.broadcast %345 : vector<2x8x1xf32> to vector<2x8x32xf32>
    %347 = arith.subf %341, %346 : vector<2x8x32xf32>
    %348 = arith.mulf %347, %347 : vector<2x8x32xf32>
    %cst_106 = arith.constant dense<0.000000e+00> : vector<2x8xf32>
    %349 = vector.multi_reduction <add>, %348, %cst_106 [2] : vector<2x8x32xf32> to vector<2x8xf32>
    %350 = vector.shape_cast %349 : vector<2x8xf32> to vector<2x8x1xf32>
    %cst_107 = arith.constant 3.200000e+01 : f32
    %351 = vector.broadcast %cst_107 : f32 to vector<2x8x1xf32>
    %352 = arith.divf %350, %351 : vector<2x8x1xf32>
    %353 = vector.broadcast %345 : vector<2x8x1xf32> to vector<2x8x32xf32>
    %354 = arith.subf %341, %353 : vector<2x8x32xf32>
    %cst_108 = arith.constant 9.99999996E-13 : f32
    %355 = vector.broadcast %cst_108 : f32 to vector<2x8x1xf32>
    %356 = arith.addf %352, %355 : vector<2x8x1xf32>
    %357 = math.rsqrt %356 : vector<2x8x1xf32>
    %358 = vector.broadcast %357 : vector<2x8x1xf32> to vector<2x8x32xf32>
    %359 = arith.mulf %354, %358 : vector<2x8x32xf32>
    %360 = vector.shape_cast %323 : vector<1x32xf32> to vector<1x1x32xf32>
    %361 = vector.broadcast %360 : vector<1x1x32xf32> to vector<2x8x32xf32>
    %362 = arith.mulf %359, %361 : vector<2x8x32xf32>
    %363 = vector.shape_cast %324 : vector<1x32xf32> to vector<1x1x32xf32>
    %364 = vector.broadcast %363 : vector<1x1x32xf32> to vector<2x8x32xf32>
    %365 = arith.addf %362, %364 : vector<2x8x32xf32>
    %c0_109 = arith.constant 0 : index
    %c0_110 = arith.constant 0 : index
    %c0_111 = arith.constant 0 : index
    %366 = vector.load %arg10[%c0_109, %c0_110, %c0_111] : memref<2x8x32xf32, #tpu.memory_space<vmem>>, vector<2x8x32xf32>
    tpu.vector_store %arg10[%c0_109, %c0_110, %c0_111], %319 {strides = array<i32>} : memref<2x8x32xf32, #tpu.memory_space<vmem>>, vector<2x8x32xf32>,
    %c0_112 = arith.constant 0 : index
    %c0_113 = arith.constant 0 : index
    %c0_114 = arith.constant 0 : index
    %367 = vector.load %arg11[%c0_112, %c0_113, %c0_114] : memref<2x8x32xf32, #tpu.memory_space<vmem>>, vector<2x8x32xf32>
    tpu.vector_store %arg11[%c0_112, %c0_113, %c0_114], %365 {strides = array<i32>} : memref<2x8x32xf32, #tpu.memory_space<vmem>>, vector<2x8x32xf32>,
    return
  }
}

</mosaic_0001>

<bundles_post_ra>
// kernel: cross_attention_wide_forward.1
= control target key start
LH: loop header
LB: loop body
LE: loop exit
PB: predicated region body
PF: predicated region fallthrough
CT: control target
= control target key end

     0   :  { %17 = vsyncpa [#allocation3], 0  ;;  %s6990_s0 = inlined_call_operand.vmem [shape: f32[16,384], index: 0, kind: input, shape index: {}]   ;;  %s6991_s1 = inlined_call_operand.vmem [shape: f32[16,2048], index: 1, kind: input, shape index: {}]   ;;  %s6992_s2 = inlined_call_operand.vmem [shape: f32[384,32], index: 2, kind: input, shape index: {}]   ;;  %s6993_s3 = inlined_call_operand.vmem [shape: f32[32,32], index: 3, kind: input, shape index: {}]   ;;  %s6994_s4 = inlined_call_operand.vmem [shape: f32[4,32], index: 4, kind: input, shape index: {}]   ;;  %s6995_s5 = inlined_call_operand.vmem [shape: f32[2048,32], index: 5, kind: input, shape index: {}]   ;;  %s6996_s6 = inlined_call_operand.vmem [shape: f32[32,32], index: 6, kind: input, shape index: {}]   ;;  %s6997_s7 = inlined_call_operand.vmem [shape: f32[4,32], index: 7, kind: input, shape index: {}]   ;;  %s6998_s8 = inlined_call_operand.vmem [shape: f32[3,2,32,32], index: 8, kind: input, shape index: {}]   ;;  %s6999_s9 = inlined_call_operand.vmem [shape: f32[3,6,32], index: 9, kind: input, shape index: {}]   ;;  %s7000_s10 = inlined_call_operand.hbm [shape: f32[2,8,32], index: 10, kind: output, shape index: {0}]   ;;  %s7001_s11 = inlined_call_operand.hbm [shape: f32[2,8,32], index: 11, kind: output, shape index: {1}]  }
   0x1   :  { %v61_v0 = vld [vmem:[%s6992_s2 + $0x80] sm:$0xff]  ;;  %v62_v1 = vld [vmem:[%s6992_s2 + $0x88] sm:$0xff]  ;;  %v63_v5 = vld [vmem:[%s6992_s2 + $0x90] sm:$0xff] }
   0x2   :  { %v45_v2 = vld [vmem:[%s6992_s2] sm:$0xff]  ;;  %v4872_v3 = vpack.c.bf16 %v62_v1, %v61_v0  ;;  %v46_v4 = vld [vmem:[%s6992_s2 + $0x8] sm:$0xff]  ;;  %v64_v6 = vld [vmem:[%s6992_s2 + $0x98] sm:$0xff] }
   0x3   :  { %v4874_v7 = vpack.c.bf16 %v46_v4, %v45_v2  ;;  %v4876_v8 = vpack.c.bf16 %v64_v6, %v63_v5  ;;  %v77_v9 = vld [vmem:[%s6992_s2 + $0x100] sm:$0xff]  ;;  %v78_v10 = vld [vmem:[%s6992_s2 + $0x108] sm:$0xff]  ;;  %v47_v11 = vld [vmem:[%s6992_s2 + $0x10] sm:$0xff] }
   0x4   :  { %4873 = vmatprep.subr.bf16.mxu0 %v4872_v3  ;;  %v4904_v12 = vpack.c.bf16 %v78_v10, %v77_v9  ;;  %v48_v13 = vld [vmem:[%s6992_s2 + $0x18] sm:$0xff]  ;;  %v65_v14 = vld [vmem:[%s6992_s2 + $0xa0] sm:$0xff]  ;;  %v66_v15 = vld [vmem:[%s6992_s2 + $0xa8] sm:$0xff] }
   0x5   :  { %4875 = vmatpush3.bf16.msra.mxu0 %v4874_v7  ;;  %v4878_v16 = vpack.c.bf16 %v48_v13, %v47_v11  ;;  %v79_v17 = vld [vmem:[%s6992_s2 + $0x110] sm:$0xff]  ;;  %v80_v18 = vld [vmem:[%s6992_s2 + $0x118] sm:$0xff]  ;;  %v4880_v19 = vpack.c.bf16 %v66_v15, %v65_v14  ;;  %v49_v21 = vld [vmem:[%s6992_s2 + $0x20] sm:$0xff] }
   0x6   :  { %4877 = vmatprep.subr.bf16.mxu0 %v4876_v8  ;;  %4905 = vmatprep.subr.bf16.mxu1 %v4904_v12  ;;  %v4908_v20 = vpack.c.bf16 %v80_v18, %v79_v17  ;;  %v50_v22 = vld [vmem:[%s6992_s2 + $0x28] sm:$0xff]  ;;  %v67_v23 = vld [vmem:[%s6992_s2 + $0xb0] sm:$0xff]  ;;  %v68_v24 = vld [vmem:[%s6992_s2 + $0xb8] sm:$0xff] }
   0x7   :  { %4907 = vmatpush3.bf16.msra.mxu1 %v4904_v12  ;;  %v81_v25 = vld [vmem:[%s6992_s2 + $0x120] sm:$0xff]  ;;  %v82_v26 = vld [vmem:[%s6992_s2 + $0x128] sm:$0xff]  ;;  %v4882_v28 = vpack.c.bf16 %v50_v22, %v49_v21  ;;  %v83_v29 = vld [vmem:[%s6992_s2 + $0x130] sm:$0xff]  ;;  %v4884_v31 = vpack.c.bf16 %v68_v24, %v67_v23 }
   0x8   :  { %4909 = vmatprep.subr.bf16.mxu1 %v4908_v20  ;;  %v4912_v27 = vpack.c.bf16 %v82_v26, %v81_v25  ;;  %v84_v30 = vld [vmem:[%s6992_s2 + $0x138] sm:$0xff]  ;;  %v51_v32 = vld [vmem:[%s6992_s2 + $0x30] sm:$0xff]  ;;  %v69_v34 = vld [vmem:[%s6992_s2 + $0xc0] sm:$0xff] }
   0x9   :  { %4879 = vmatpush3.bf16.msra.mxu0 %v4878_v16  ;;  %v52_v33 = vld [vmem:[%s6992_s2 + $0x38] sm:$0xff]  ;;  %v70_v35 = vld [vmem:[%s6992_s2 + $0xc8] sm:$0xff]  ;;  %v4916_v36 = vpack.c.bf16 %v84_v30, %v83_v29  ;;  %v85_v38 = vld [vmem:[%s6992_s2 + $0x140] sm:$0xff] }
   0xa   :  { %4881 = vmatprep.subr.bf16.mxu0 %v4880_v19  ;;  %v4886_v37 = vpack.c.bf16 %v52_v33, %v51_v32  ;;  %v86_v39 = vld [vmem:[%s6992_s2 + $0x148] sm:$0xff]  ;;  %v4888_v40 = vpack.c.bf16 %v70_v35, %v69_v34  ;;  %v53_v41 = vld [vmem:[%s6992_s2 + $0x40] sm:$0xff]  ;;  %v71_v43 = vld [vmem:[%s6992_s2 + $0xd0] sm:$0xff] }
   0xb   :  { %4911 = vmatpush3.bf16.msra.mxu1 %v4908_v20  ;;  %v54_v42 = vld [vmem:[%s6992_s2 + $0x48] sm:$0xff]  ;;  %v72_v44 = vld [vmem:[%s6992_s2 + $0xd8] sm:$0xff]  ;;  %v4920_v45 = vpack.c.bf16 %v86_v39, %v85_v38  ;;  %v87_v48 = vld [vmem:[%s6992_s2 + $0x150] sm:$0xff] }
   0xc   :  { %4913 = vmatprep.subr.bf16.mxu1 %v4912_v27  ;;  %v40_v46 = vld [vmem:[%s6990_s0 + $0x8] sm:$0xff]  ;;  %v4890_v47 = vpack.c.bf16 %v54_v42, %v53_v41  ;;  %v88_v49 = vld [vmem:[%s6992_s2 + $0x158] sm:$0xff]  ;;  %v4892_v50 = vpack.c.bf16 %v72_v44, %v71_v43  ;;  %v55_v51 = vld [vmem:[%s6992_s2 + $0x50] sm:$0xff] }
   0xd   :  { %4883 = vmatpush3.bf16.msra.mxu0 %v4882_v28  ;;  %166 = vmatprep.mubr.f32.mxu0 %v40_v46  ;;  %v56_v52 = vld [vmem:[%s6992_s2 + $0x58] sm:$0xff]  ;;  %v41_v53 = vld [vmem:[%s6990_s0 + $0x10] sm:$0xff]  ;;  %v73_v54 = vld [vmem:[%s6992_s2 + $0xe0] sm:$0xff]  ;;  %v4924_v56 = vpack.c.bf16 %v88_v49, %v87_v48 }
   0xe   :  { %4885 = vmatprep.subr.bf16.mxu0 %v4884_v31  ;;  %v74_v55 = vld [vmem:[%s6992_s2 + $0xe8] sm:$0xff]  ;;  %4661 = vmatprep.mubr.f32.mxu1 %v41_v53  ;;  %v4894_v57 = vpack.c.bf16 %v56_v52, %v55_v51  ;;  %v89_v58 = vld [vmem:[%s6992_s2 + $0x160] sm:$0xff]  ;;  %v75_v63 = vld [vmem:[%s6992_s2 + $0xf0] sm:$0xff] }
   0xf   :  { %4915 = vmatpush3.bf16.msra.mxu1 %v4912_v27  ;;  %v90_v59 = vld [vmem:[%s6992_s2 + $0x168] sm:$0xff]  ;;  %v4896_v60 = vpack.c.bf16 %v74_v55, %v73_v54  ;;  %v57_v61 = vld [vmem:[%s6992_s2 + $0x60] sm:$0xff]  ;;  %v76_v0 = vld [vmem:[%s6992_s2 + $0xf8] sm:$0xff] }
  0x10   :  { %4917 = vmatprep.subr.bf16.mxu1 %v4916_v36  ;;  %v58_v62 = vld [vmem:[%s6992_s2 + $0x68] sm:$0xff]  ;;  %v4928_v1 = vpack.c.bf16 %v90_v59, %v89_v58  ;;  %v91_v3 = vld [vmem:[%s6992_s2 + $0x170] sm:$0xff]  ;;  %v92_v4 = vld [vmem:[%s6992_s2 + $0x178] sm:$0xff] }
  0x11   :  { %4887 = vmatpush3.bf16.msra.mxu0 %v4886_v37  ;;  %v4898_v2 = vpack.c.bf16 %v58_v62, %v57_v61 }
  0x12   :  { %4889 = vmatprep.subr.bf16.mxu0 %v4888_v40 }
  0x13   :  { %4919 = vmatpush3.bf16.msra.mxu1 %v4916_v36 }
  0x14   :  { %4921 = vmatprep.subr.bf16.mxu1 %v4920_v45 }
  0x15   :  { %4891 = vmatpush3.bf16.msra.mxu0 %v4890_v47 }
  0x16   :  { %4893 = vmatprep.subr.bf16.mxu0 %v4892_v50 }
  0x17   :  { %4923 = vmatpush3.bf16.msra.mxu1 %v4920_v45 }
  0x18   :  { %4925 = vmatprep.subr.bf16.mxu1 %v4924_v56 }
  0x19   :  { %4895 = vmatpush3.bf16.msra.mxu0 %v4894_v57 }
  0x1a   :  { %18 = vsyncpa [#allocation5], 0  ;;  %4897 = vmatprep.subr.bf16.mxu0 %v4896_v60  ;;  %v4900_v5 = vpack.c.bf16 %v76_v0, %v75_v63  ;;  %v59_v6 = vld [vmem:[%s6992_s2 + $0x70] sm:$0xff]  ;;  %v60_v7 = vld [vmem:[%s6992_s2 + $0x78] sm:$0xff]  ;;  %v4932_v8 = vpack.c.bf16 %v92_v4, %v91_v3  ;;  %vm258_vm0 = vcmask 261120   ;;  %vm5391_vm1 = vmmov 0  }
  0x1b   :  { %4927 = vmatpush3.bf16.msra.mxu1 %v4924_v56  ;;  %v4902_v9 = vpack.c.bf16 %v60_v7, %v59_v6  ;;  %v427_v10 = vld [vmem:[%s6995_s5 + $0x80] sm:$0xff]  ;;  %v428_v11 = vld [vmem:[%s6995_s5 + $0x88] sm:$0xff]  ;;  %v429_v16 = vld [vmem:[%s6995_s5 + $0x90] sm:$0xff]  ;;  %vm1562_vm2 = vcmask 64512  }
  0x1c   :  { %4929 = vmatprep.subr.bf16.mxu1 %v4928_v1  ;;  %v4944_v12 = vpack.c.bf16 %v428_v11, %v427_v10  ;;  %v411_v13 = vld [vmem:[%s6995_s5] sm:$0xff]  ;;  %v412_v14 = vld [vmem:[%s6995_s5 + $0x8] sm:$0xff]  ;;  %v430_v17 = vld [vmem:[%s6995_s5 + $0x98] sm:$0xff] }
  0x1d   :  { %4899 = vmatpush3.bf16.msra.mxu0 %v4898_v2  ;;  %v39_v15 = vld [vmem:[%s6990_s0] sm:$0xff]  ;;  %v44_v19 = vld [vmem:[%s6990_s0 + $0x28] sm:$0xff]  ;;  %v4946_v20 = vpack.c.bf16 %v412_v14, %v411_v13  ;;  %v4948_v21 = vpack.c.bf16 %v430_v17, %v429_v16  ;;  %v413_v22 = vld [vmem:[%s6995_s5 + $0x10] sm:$0xff] }
  0x1e   :  { %4901 = vmatprep.subr.bf16.mxu0 %v4900_v5  ;;  %v43_v18 = vld [vmem:[%s6990_s0 + $0x20] sm:$0xff]  ;;  %v414_v23 = vld [vmem:[%s6995_s5 + $0x18] sm:$0xff]  ;;  %v432_v26 = vld [vmem:[%s6995_s5 + $0xa8] sm:$0xff] }
  0x1f   :  { %4931 = vmatpush3.bf16.msra.mxu1 %v4928_v1  ;;  %v42_v24 = vld [vmem:[%s6990_s0 + $0x18] sm:$0xff]  ;;  %v431_v25 = vld [vmem:[%s6995_s5 + $0xa0] sm:$0xff]  ;;  %v4950_v27 = vpack.c.bf16 %v414_v23, %v413_v22  ;;  %v416_v30 = vld [vmem:[%s6995_s5 + $0x28] sm:$0xff] }
  0x20   :  { %4933 = vmatprep.subr.bf16.mxu1 %v4932_v8  ;;  %v4952_v28 = vpack.c.bf16 %v432_v26, %v431_v25  ;;  %v415_v29 = vld [vmem:[%s6995_s5 + $0x20] sm:$0xff]  ;;  %v433_v31 = vld [vmem:[%s6995_s5 + $0xb0] sm:$0xff]  ;;  %v434_v32 = vld [vmem:[%s6995_s5 + $0xb8] sm:$0xff] }
  0x21   :  { %4903 = vmatpush3.bf16.msra.mxu0 %v4902_v9  ;;  %v4954_v33 = vpack.c.bf16 %v416_v30, %v415_v29  ;;  %v4956_v34 = vpack.c.bf16 %v434_v32, %v433_v31  ;;  %v417_v35 = vld [vmem:[%s6995_s5 + $0x30] sm:$0xff]  ;;  %v418_v36 = vld [vmem:[%s6995_s5 + $0x38] sm:$0xff]  ;;  %v435_v37 = vld [vmem:[%s6995_s5 + $0xc0] sm:$0xff] }
  0x22   :  { %v436_v38 = vld [vmem:[%s6995_s5 + $0xc8] sm:$0xff]  ;;  %v4958_v39 = vpack.c.bf16 %v418_v36, %v417_v35  ;;  %v419_v41 = vld [vmem:[%s6995_s5 + $0x40] sm:$0xff]  ;;  %v437_v44 = vld [vmem:[%s6995_s5 + $0xd0] sm:$0xff] }
  0x23   :  { %4935 = vmatpush3.bf16.msra.mxu1 %v4932_v8  ;;  %v4960_v40 = vpack.c.bf16 %v436_v38, %v435_v37  ;;  %v420_v42 = vld [vmem:[%s6995_s5 + $0x48] sm:$0xff]  ;;  %v438_v45 = vld [vmem:[%s6995_s5 + $0xd8] sm:$0xff]  ;;  %v421_v47 = vld [vmem:[%s6995_s5 + $0x50] sm:$0xff] }
  0x24   :  { %167 = vmatmul.mubr.f32.vlgmr.msra.gmra.mrb[0].mxu0 %v39_v15  ;;  %4945 = vmatprep.subr.bf16.mxu1 %v4944_v12  ;;  %v4962_v43 = vpack.c.bf16 %v420_v42, %v419_v41  ;;  %v4964_v46 = vpack.c.bf16 %v438_v45, %v437_v44  ;;  %v422_v48 = vld [vmem:[%s6995_s5 + $0x58] sm:$0xff]  ;;  %v93_v50 = vld [vmem:[%s6993_s3] sm:$0xff]  ;;  %v94_v51 = vld [vmem:[%s6993_s3 + $0x8] sm:$0xff] }
  0x25   :  { %171 = vmatprep.mubr.f32.mxu0 %v43_v18  ;;  %v4966_v49 = vpack.c.bf16 %v422_v48, %v421_v47  ;;  %v4936_v52 = vpack.c.bf16 %v94_v51, %v93_v50  ;;  %v439_v53 = vld [vmem:[%s6995_s5 + $0xe0] sm:$0xff]  ;;  %v440_v54 = vld [vmem:[%s6995_s5 + $0xe8] sm:$0xff]  ;;  %v95_v59 = vld [vmem:[%s6993_s3 + $0x10] sm:$0xff] }
  0x26   :  { %4662 = vmatmul.mubr.f32.vlgmr.msra.gmra.mrb[0].mxu1 %v44_v19  ;;  %v4968_v55 = vpack.c.bf16 %v440_v54, %v439_v53  ;;  %v423_v56 = vld [vmem:[%s6995_s5 + $0x60] sm:$0xff]  ;;  %v424_v57 = vld [vmem:[%s6995_s5 + $0x68] sm:$0xff]  ;;  %v96_v60 = vld [vmem:[%s6993_s3 + $0x18] sm:$0xff] }
  0x27   :  { %4947 = vmatpush3.bf16.msra.mxu1 %v4946_v20  ;;  %4937 = vmatprep.subr.bf16.mxu0 %v4936_v52  ;;  %v4970_v58 = vpack.c.bf16 %v424_v57, %v423_v56  ;;  %v4940_v61 = vpack.c.bf16 %v96_v60, %v95_v59  ;;  %v441_v62 = vld [vmem:[%s6995_s5 + $0xf0] sm:$0xff]  ;;  %v442_v63 = vld [vmem:[%s6995_s5 + $0xf8] sm:$0xff]  ;;  %v459_v4 = vld [vmem:[%s6995_s5 + $0x180] sm:$0xff] }
  0x28   :  { %172 = vmatmul.mubr.f32.gmra.mrb[2].mxu0 %v42_v24  ;;  %4949 = vmatprep.subr.bf16.mxu1 %v4948_v21  ;;  %v4972_v0 = vpack.c.bf16 %v442_v63, %v441_v62  ;;  %v425_v1 = vld [vmem:[%s6995_s5 + $0x70] sm:$0xff]  ;;  %v426_v2 = vld [vmem:[%s6995_s5 + $0x78] sm:$0xff]  ;;  %v460_v5 = vld [vmem:[%s6995_s5 + $0x188] sm:$0xff] }
  0x29   :  { %4939 = vmatpush3.bf16.msra.mxu0 %v4936_v52  ;;  %v4974_v3 = vpack.c.bf16 %v426_v2, %v425_v1  ;;  %v4976_v6 = vpack.c.bf16 %v460_v5, %v459_v4  ;;  %v491_v7 = vld [vmem:[%s6995_s5 + $0x280] sm:$0xff]  ;;  %v492_v8 = vld [vmem:[%s6995_s5 + $0x288] sm:$0xff]  ;;  %v493_v15 = vld [vmem:[%s6995_s5 + $0x290] sm:$0xff] }
  0x2a   :  { %4941 = vmatprep.subr.bf16.mxu0 %v4940_v61  ;;  %v5008_v9 = vpack.c.bf16 %v492_v8, %v491_v7  ;;  %v475_v10 = vld [vmem:[%s6995_s5 + $0x200] sm:$0xff]  ;;  %v476_v11 = vld [vmem:[%s6995_s5 + $0x208] sm:$0xff]  ;;  %v494_v16 = vld [vmem:[%s6995_s5 + $0x298] sm:$0xff] }
  0x2b   :  { %4951 = vmatpush3.bf16.msra.mxu1 %v4950_v27  ;;  %v380_v12 = vld [vmem:[%s6991_s1 + $0x8] sm:$0xff]  ;;  %v379_v13 = vld [vmem:[%s6991_s1] sm:$0xff]  ;;  %v5010_v14 = vpack.c.bf16 %v476_v11, %v475_v10  ;;  %v5012_v17 = vpack.c.bf16 %v494_v16, %v493_v15  ;;  %v477_v18 = vld [vmem:[%s6995_s5 + $0x210] sm:$0xff] }
  0x2c   :  { %4953 = vmatprep.subr.bf16.mxu1 %v4952_v28  ;;  %740 = vmatprep.mubr.f32.mxu1 %v380_v12  ;;  %v478_v19 = vld [vmem:[%s6995_s5 + $0x218] sm:$0xff]  ;;  %v495_v21 = vld [vmem:[%s6995_s5 + $0x2a0] sm:$0xff]  ;;  %v496_v22 = vld [vmem:[%s6995_s5 + $0x2a8] sm:$0xff] }
  0x2d   :  { %4943 = vmatpush3.bf16.msra.mxu0 %v4940_v61  ;;  %v5014_v20 = vpack.c.bf16 %v478_v19, %v477_v18  ;;  %v5016_v23 = vpack.c.bf16 %v496_v22, %v495_v21  ;;  %v479_v24 = vld [vmem:[%s6995_s5 + $0x220] sm:$0xff]  ;;  %v480_v25 = vld [vmem:[%s6995_s5 + $0x228] sm:$0xff]  ;;  %v497_v27 = vld [vmem:[%s6995_s5 + $0x2b0] sm:$0xff] }
  0x2e   :  { %4977 = vmatprep.subr.bf16.mxu0 %v4976_v6  ;;  %v5018_v26 = vpack.c.bf16 %v480_v25, %v479_v24  ;;  %v498_v28 = vld [vmem:[%s6995_s5 + $0x2b8] sm:$0xff]  ;;  %v481_v30 = vld [vmem:[%s6995_s5 + $0x230] sm:$0xff]  ;;  %v483_v36 = vld [vmem:[%s6995_s5 + $0x240] sm:$0xff] }
  0x2f   :  { %4955 = vmatpush3.bf16.msra.mxu1 %v4954_v33  ;;  %v5020_v29 = vpack.c.bf16 %v498_v28, %v497_v27  ;;  %v482_v31 = vld [vmem:[%s6995_s5 + $0x238] sm:$0xff]  ;;  %v499_v33 = vld [vmem:[%s6995_s5 + $0x2c0] sm:$0xff]  ;;  %v484_v37 = vld [vmem:[%s6995_s5 + $0x248] sm:$0xff] }
  0x30   :  { %4957 = vmatprep.subr.bf16.mxu1 %v4956_v34  ;;  %v5022_v32 = vpack.c.bf16 %v482_v31, %v481_v30  ;;  %v500_v34 = vld [vmem:[%s6995_s5 + $0x2c8] sm:$0xff]  ;;  %v5026_v38 = vpack.c.bf16 %v484_v37, %v483_v36  ;;  %v485_v42 = vld [vmem:[%s6995_s5 + $0x250] sm:$0xff]  ;;  %v503_v45 = vld [vmem:[%s6995_s5 + $0x2e0] sm:$0xff] }
  0x31   :  { %v5024_v35 = vpack.c.bf16 %v500_v34, %v499_v33  ;;  %v487_v48 = vld [vmem:[%s6995_s5 + $0x260] sm:$0xff]  ;;  %v396_v51 = vld [vmem:[%s6991_s1 + $0x88] sm:$0xff]  ;;  %v505_v52 = vld [vmem:[%s6995_s5 + $0x2f0] sm:$0xff] }
  0x32   :  { %v506_v53 = vld [vmem:[%s6995_s5 + $0x2f8] sm:$0xff]  ;;  %v395_v57 = vld [vmem:[%s6991_s1 + $0x80] sm:$0xff]  ;;  %v556_v60 = vld [vmem:[%s6995_s5 + $0x488] sm:$0xff] }
  0x33   :  { %4959 = vmatpush3.bf16.msra.mxu1 %v4958_v39  ;;  %v501_v39 = vld [vmem:[%s6995_s5 + $0x2d0] sm:$0xff]  ;;  %v5036_v54 = vpack.c.bf16 %v506_v53, %v505_v52  ;;  %v490_v56 = vld [vmem:[%s6995_s5 + $0x278] sm:$0xff]  ;;  %v555_v59 = vld [vmem:[%s6995_s5 + $0x480] sm:$0xff] }
  0x34   :  { %4961 = vmatprep.subr.bf16.mxu1 %v4960_v40  ;;  %v502_v40 = vld [vmem:[%s6995_s5 + $0x2d8] sm:$0xff]  ;;  %v384_v61 = vld [vmem:[%s6991_s1 + $0x28] sm:$0xff]  ;;  %v5072_v62 = vpack.c.bf16 %v556_v60, %v555_v59  ;;  %v539_v63 = vld [vmem:[%s6995_s5 + $0x400] sm:$0xff] }
  0x35   :  { %v5028_v41 = vpack.c.bf16 %v502_v40, %v501_v39  ;;  %v383_v1 = vld [vmem:[%s6991_s1 + $0x20] sm:$0xff]  ;;  %v558_v4 = vld [vmem:[%s6995_s5 + $0x498] sm:$0xff]  ;;  %v541_v6 = vld [vmem:[%s6995_s5 + $0x410] sm:$0xff] }
  0x36   :  { %v542_v7 = vld [vmem:[%s6995_s5 + $0x418] sm:$0xff]  ;;  %v560_v10 = vld [vmem:[%s6995_s5 + $0x4a8] sm:$0xff]  ;;  %v543_v12 = vld [vmem:[%s6995_s5 + $0x420] sm:$0xff] }
  0x37   :  { %4963 = vmatpush3.bf16.msra.mxu1 %v4962_v43  ;;  %v486_v43 = vld [vmem:[%s6995_s5 + $0x258] sm:$0xff]  ;;  %v5078_v8 = vpack.c.bf16 %v542_v7, %v541_v6  ;;  %v561_v15 = vld [vmem:[%s6995_s5 + $0x4b0] sm:$0xff]  ;;  %v563_v21 = vld [vmem:[%s6995_s5 + $0x4c0] sm:$0xff] }
  0x38   :  { %4965 = vmatprep.subr.bf16.mxu1 %v4964_v46  ;;  %v5030_v44 = vpack.c.bf16 %v486_v43, %v485_v42  ;;  %v504_v46 = vld [vmem:[%s6995_s5 + $0x2e8] sm:$0xff]  ;;  %v562_v16 = vld [vmem:[%s6995_s5 + $0x4b8] sm:$0xff]  ;;  %v545_v18 = vld [vmem:[%s6995_s5 + $0x430] sm:$0xff] }
  0x39   :  { %v5032_v47 = vpack.c.bf16 %v504_v46, %v503_v45  ;;  %v546_v19 = vld [vmem:[%s6995_s5 + $0x438] sm:$0xff]  ;;  %v564_v22 = vld [vmem:[%s6995_s5 + $0x4c8] sm:$0xff]  ;;  %v547_v24 = vld [vmem:[%s6995_s5 + $0x440] sm:$0xff] }
  0x3a   :  { %v548_v25 = vld [vmem:[%s6995_s5 + $0x448] sm:$0xff]  ;;  %v565_v27 = vld [vmem:[%s6995_s5 + $0x4d0] sm:$0xff]  ;;  %v566_v28 = vld [vmem:[%s6995_s5 + $0x4d8] sm:$0xff] }
  0x3b   :  { %4967 = vmatpush3.bf16.msra.mxu1 %v4966_v49  ;;  %v488_v49 = vld [vmem:[%s6995_s5 + $0x268] sm:$0xff]  ;;  %v549_v30 = vld [vmem:[%s6995_s5 + $0x450] sm:$0xff]  ;;  %v550_v31 = vld [vmem:[%s6995_s5 + $0x458] sm:$0xff] }
  0x3c   :  { %4969 = vmatprep.subr.bf16.mxu1 %v4968_v55  ;;  %v5034_v50 = vpack.c.bf16 %v488_v49, %v487_v48  ;;  %v489_v55 = vld [vmem:[%s6995_s5 + $0x270] sm:$0xff]  ;;  %v567_v33 = vld [vmem:[%s6995_s5 + $0x4e0] sm:$0xff]  ;;  %v568_v34 = vld [vmem:[%s6995_s5 + $0x4e8] sm:$0xff] }
  0x3d   :  { %v551_v36 = vld [vmem:[%s6995_s5 + $0x460] sm:$0xff]  ;;  %v552_v37 = vld [vmem:[%s6995_s5 + $0x468] sm:$0xff]  ;;  %v569_v40 = vld [vmem:[%s6995_s5 + $0x4f0] sm:$0xff] }
  0x3e   :  { %v400_v39 = vld [vmem:[%s6991_s1 + $0xa8] sm:$0xff]  ;;  %v553_v43 = vld [vmem:[%s6995_s5 + $0x470] sm:$0xff]  ;;  %v399_v45 = vld [vmem:[%s6991_s1 + $0xa0] sm:$0xff] }
  0x3f   :  { %4971 = vmatpush3.bf16.msra.mxu1 %v4970_v58  ;;  %v5038_v58 = vpack.c.bf16 %v490_v56, %v489_v55  ;;  %v620_v48 = vld [vmem:[%s6995_s5 + $0x688] sm:$0xff]  ;;  %v387_v53 = vld [vmem:[%s6991_s1 + $0x40] sm:$0xff]  ;;  %v621_v55 = vld [vmem:[%s6995_s5 + $0x690] sm:$0xff] }
  0x40   :  { %4973 = vmatprep.subr.bf16.mxu1 %v4972_v0  ;;  %v540_v0 = vld [vmem:[%s6995_s5 + $0x408] sm:$0xff]  ;;  %v622_v56 = vld [vmem:[%s6995_s5 + $0x698] sm:$0xff]  ;;  %v605_v59 = vld [vmem:[%s6995_s5 + $0x610] sm:$0xff] }
  0x41   :  { %v5074_v2 = vpack.c.bf16 %v540_v0, %v539_v63  ;;  %v388_v49 = vld [vmem:[%s6991_s1 + $0x48] sm:$0xff]  ;;  %v606_v60 = vld [vmem:[%s6995_s5 + $0x618] sm:$0xff]  ;;  %v623_v63 = vld [vmem:[%s6995_s5 + $0x6a0] sm:$0xff] }
  0x42   :  { %v604_v52 = vld [vmem:[%s6995_s5 + $0x608] sm:$0xff]  ;;  %v626_v6 = vld [vmem:[%s6995_s5 + $0x6b8] sm:$0xff] }
  0x43   :  { %4975 = vmatpush3.bf16.msra.mxu1 %v4974_v3  ;;  %v557_v3 = vld [vmem:[%s6995_s5 + $0x490] sm:$0xff]  ;;  %v624_v0 = vld [vmem:[%s6995_s5 + $0x6a8] sm:$0xff] }
  0x44   :  { %5009 = vmatprep.subr.bf16.mxu1 %v5008_v9  ;;  %v5076_v5 = vpack.c.bf16 %v558_v4, %v557_v3  ;;  %v559_v9 = vld [vmem:[%s6995_s5 + $0x4a0] sm:$0xff]  ;;  %v608_v3 = vld [vmem:[%s6995_s5 + $0x628] sm:$0xff] }
  0x45   :  { %v5080_v11 = vpack.c.bf16 %v560_v10, %v559_v9  ;;  %v610_v9 = vld [vmem:[%s6995_s5 + $0x638] sm:$0xff] }
  0x46   :  { %741 = vmatmul.mubr.f32.vlgmr.msra.gmra.mrb[2].mxu1 %v379_v13  ;;  %v544_v13 = vld [vmem:[%s6995_s5 + $0x428] sm:$0xff] }
  0x47   :  { %5011 = vmatpush3.bf16.msra.mxu1 %v5010_v14  ;;  %745 = vmatprep.mubr.f32.mxu1 %v396_v51  ;;  %v5082_v14 = vpack.c.bf16 %v544_v13, %v543_v12  ;;  %v603_v51 = vld [vmem:[%s6995_s5 + $0x600] sm:$0xff]  ;;  %v628_v12 = vld [vmem:[%s6995_s5 + $0x6c8] sm:$0xff] }
  0x48   :  { %5013 = vmatprep.subr.bf16.mxu1 %v5012_v17  ;;  %v5084_v17 = vpack.c.bf16 %v562_v16, %v561_v15  ;;  %v612_v15 = vld [vmem:[%s6995_s5 + $0x648] sm:$0xff] }
  0x4a   :  { %746 = vmatmul.mubr.f32.gmra.mrb[4].mxu1 %v395_v57  ;;  %v404_v57 = vld [vmem:[%s6991_s1 + $0xc8] sm:$0xff] }
  0x4b   :  { %5015 = vmatpush3.bf16.msra.mxu1 %v5014_v20  ;;  %890 = vmatprep.mubr.f32.mxu1 %v384_v61  ;;  %v5086_v20 = vpack.c.bf16 %v546_v19, %v545_v18  ;;  %v403_v61 = vld [vmem:[%s6991_s1 + $0xc0] sm:$0xff]  ;;  %v630_v18 = vld [vmem:[%s6995_s5 + $0x6d8] sm:$0xff] }
  0x4c   :  { %5017 = vmatprep.subr.bf16.mxu1 %v5016_v23  ;;  %v5088_v23 = vpack.c.bf16 %v564_v22, %v563_v21  ;;  %v614_v21 = vld [vmem:[%s6995_s5 + $0x658] sm:$0xff] }
  0x4f   :  { %5019 = vmatpush3.bf16.msra.mxu1 %v5018_v26  ;;  %v5090_v26 = vpack.c.bf16 %v548_v25, %v547_v24  ;;  %v632_v24 = vld [vmem:[%s6995_s5 + $0x6e8] sm:$0xff] }
  0x50   :  { %5021 = vmatprep.subr.bf16.mxu1 %v5020_v29  ;;  %v5092_v29 = vpack.c.bf16 %v566_v28, %v565_v27  ;;  %v616_v27 = vld [vmem:[%s6995_s5 + $0x668] sm:$0xff] }
  0x53   :  { %5023 = vmatpush3.bf16.msra.mxu1 %v5022_v32  ;;  %v5094_v32 = vpack.c.bf16 %v550_v31, %v549_v30  ;;  %v634_v30 = vld [vmem:[%s6995_s5 + $0x6f8] sm:$0xff] }
  0x54   :  { %5025 = vmatprep.subr.bf16.mxu1 %v5024_v35  ;;  %v5096_v35 = vpack.c.bf16 %v568_v34, %v567_v33  ;;  %v618_v33 = vld [vmem:[%s6995_s5 + $0x678] sm:$0xff] }
  0x57   :  { %5027 = vmatpush3.bf16.msra.mxu1 %v5026_v38  ;;  %v5098_v38 = vpack.c.bf16 %v552_v37, %v551_v36  ;;  %v391_v36 = vld [vmem:[%s6991_s1 + $0x60] sm:$0xff]  ;;  %v408_v37 = vld [vmem:[%s6991_s1 + $0xe8] sm:$0xff] }
  0x58   :  { %5029 = vmatprep.subr.bf16.mxu1 %v5028_v41  ;;  %v570_v41 = vld [vmem:[%s6995_s5 + $0x4f8] sm:$0xff] }
  0x59   :  { %v5100_v42 = vpack.c.bf16 %v570_v41, %v569_v40 }
  0x5b   :  { %5031 = vmatpush3.bf16.msra.mxu1 %v5030_v44  ;;  %v554_v44 = vld [vmem:[%s6995_s5 + $0x478] sm:$0xff] }
  0x5c   :  { %5033 = vmatprep.subr.bf16.mxu1 %v5032_v47  ;;  %v5102_v46 = vpack.c.bf16 %v554_v44, %v553_v43  ;;  %v619_v47 = vld [vmem:[%s6995_s5 + $0x680] sm:$0xff] }
  0x5f   :  { %5035 = vmatpush3.bf16.msra.mxu1 %v5034_v50  ;;  %v5136_v50 = vpack.c.bf16 %v620_v48, %v619_v47 }
  0x60   :  { %5037 = vmatprep.subr.bf16.mxu1 %v5036_v54  ;;  %v5138_v54 = vpack.c.bf16 %v604_v52, %v603_v51 }
  0x63   :  { %5039 = vmatpush3.bf16.msra.mxu1 %v5038_v58  ;;  %v5140_v58 = vpack.c.bf16 %v622_v56, %v621_v55  ;;  %v443_v56 = vld [vmem:[%s6995_s5 + $0x100] sm:$0xff] }
  0x64   :  { %5073 = vmatprep.subr.bf16.mxu1 %v5072_v62  ;;  %v5142_v62 = vpack.c.bf16 %v606_v60, %v605_v59  ;;  %v462_v59 = vld [vmem:[%s6995_s5 + $0x198] sm:$0xff] }
  0x66   :  { %891 = vmatmul.mubr.f32.vlgmr.msra.gmra.mrb[6].mxu1 %v383_v1  ;;  %v5144_v1 = vpack.c.bf16 %v624_v0, %v623_v63  ;;  %v445_v0 = vld [vmem:[%s6995_s5 + $0x110] sm:$0xff] }
  0x67   :  { %5075 = vmatpush3.bf16.msra.mxu1 %v5074_v2  ;;  %895 = vmatprep.mubr.f32.mxu1 %v400_v39  ;;  %v607_v2 = vld [vmem:[%s6995_s5 + $0x620] sm:$0xff]  ;;  %v98_v39 = vlaneseq }
  0x68   :  { %5077 = vmatprep.subr.bf16.mxu1 %v5076_v5  ;;  %v5146_v4 = vpack.c.bf16 %v608_v3, %v607_v2  ;;  %v625_v5 = vld [vmem:[%s6995_s5 + $0x6b0] sm:$0xff]  ;;  %v382_v2 = vld [vmem:[%s6991_s1 + $0x18] sm:$0xff]  ;;  %v463_v3 = vld [vmem:[%s6995_s5 + $0x1a0] sm:$0xff] }
  0x69   :  { %v5148_v7 = vpack.c.bf16 %v626_v6, %v625_v5  ;;  %v6068_v40 = vshrl.u32 %v98_v39, 7  ;;  %v523_v39 = vld [vmem:[%s6995_s5 + $0x380] sm:$0xff] }
  0x6a   :  { %896 = vmatmul.mubr.f32.gmra.mrb[8].mxu1 %v399_v45 }
  0x6b   :  { %5079 = vmatpush3.bf16.msra.mxu1 %v5078_v8  ;;  %1040 = vmatprep.mubr.f32.mxu1 %v388_v49  ;;  %v609_v8 = vld [vmem:[%s6995_s5 + $0x630] sm:$0xff]  ;;  %v6071_v41 = vsub.s32 0, %v6068_v40 }
  0x6c   :  { %5081 = vmatprep.subr.bf16.mxu1 %v5080_v11  ;;  %v5150_v10 = vpack.c.bf16 %v610_v9, %v609_v8  ;;  %v627_v11 = vld [vmem:[%s6995_s5 + $0x6c0] sm:$0xff]  ;;  %v448_v8 = vld [vmem:[%s6995_s5 + $0x128] sm:$0xff]  ;;  %v465_v9 = vld [vmem:[%s6995_s5 + $0x1b0] sm:$0xff] }
  0x6d   :  { %v5152_v13 = vpack.c.bf16 %v628_v12, %v627_v11 }
  0x6f   :  { %5083 = vmatpush3.bf16.msra.mxu1 %v5082_v14  ;;  %v611_v14 = vld [vmem:[%s6995_s5 + $0x640] sm:$0xff] }
  0x70   :  { %5085 = vmatprep.subr.bf16.mxu1 %v5084_v17  ;;  %v5154_v16 = vpack.c.bf16 %v612_v15, %v611_v14  ;;  %v629_v17 = vld [vmem:[%s6995_s5 + $0x6d0] sm:$0xff]  ;;  %v450_v14 = vld [vmem:[%s6995_s5 + $0x138] sm:$0xff]  ;;  %v467_v15 = vld [vmem:[%s6995_s5 + $0x1c0] sm:$0xff] }
  0x71   :  { %v5156_v19 = vpack.c.bf16 %v630_v18, %v629_v17 }
  0x73   :  { %5087 = vmatpush3.bf16.msra.mxu1 %v5086_v20  ;;  %v613_v20 = vld [vmem:[%s6995_s5 + $0x650] sm:$0xff] }
  0x74   :  { %5089 = vmatprep.subr.bf16.mxu1 %v5088_v23  ;;  %v5158_v22 = vpack.c.bf16 %v614_v21, %v613_v20  ;;  %v631_v23 = vld [vmem:[%s6995_s5 + $0x6e0] sm:$0xff]  ;;  %v452_v20 = vld [vmem:[%s6995_s5 + $0x148] sm:$0xff]  ;;  %v469_v21 = vld [vmem:[%s6995_s5 + $0x1d0] sm:$0xff] }
  0x75   :  { %v5160_v25 = vpack.c.bf16 %v632_v24, %v631_v23 }
  0x77   :  { %5091 = vmatpush3.bf16.msra.mxu1 %v5090_v26  ;;  %v615_v26 = vld [vmem:[%s6995_s5 + $0x660] sm:$0xff] }
  0x78   :  { %5093 = vmatprep.subr.bf16.mxu1 %v5092_v29  ;;  %v5162_v28 = vpack.c.bf16 %v616_v27, %v615_v26  ;;  %v633_v29 = vld [vmem:[%s6995_s5 + $0x6f0] sm:$0xff]  ;;  %v454_v26 = vld [vmem:[%s6995_s5 + $0x158] sm:$0xff]  ;;  %v471_v27 = vld [vmem:[%s6995_s5 + $0x1e0] sm:$0xff] }
  0x79   :  { %v5164_v31 = vpack.c.bf16 %v634_v30, %v633_v29 }
  0x7b   :  { %5095 = vmatpush3.bf16.msra.mxu1 %v5094_v32  ;;  %v617_v32 = vld [vmem:[%s6995_s5 + $0x670] sm:$0xff] }
  0x7c   :  { %5097 = vmatprep.subr.bf16.mxu1 %v5096_v35  ;;  %v5166_v34 = vpack.c.bf16 %v618_v33, %v617_v32  ;;  %v392_v35 = vld [vmem:[%s6991_s1 + $0x68] sm:$0xff]  ;;  %v473_v33 = vld [vmem:[%s6995_s5 + $0x1f0] sm:$0xff] }
  0x7d   :  { %v456_v32 = vld [vmem:[%s6995_s5 + $0x168] sm:$0xff] }
  0x7f   :  { %5099 = vmatpush3.bf16.msra.mxu1 %v5098_v38  ;;  %v407_v38 = vld [vmem:[%s6991_s1 + $0xe0] sm:$0xff] }
  0x80   :  { %5101 = vmatprep.subr.bf16.mxu1 %v5100_v42  ;;  %v6076_v42 = vld [vmem:[%s6994_s4] sm:$0xf] }
  0x81   :  { %v101_v44 = vrot.slane %v6076_v42, %v6071_v41 }
  0x83   :  { %5103 = vmatpush3.bf16.msra.mxu1 %v5102_v46 }
  0x84   :  { %5137 = vmatprep.subr.bf16.mxu1 %v5136_v50 }
  0x86   :  { %1041 = vmatmul.mubr.f32.vlgmr.msra.gmra.mrb[10].mxu1 %v387_v53 }
  0x87   :  { %5139 = vmatpush3.bf16.msra.mxu1 %v5138_v54  ;;  %1045 = vmatprep.mubr.f32.mxu1 %v404_v57  ;;  %v444_v57 = vld [vmem:[%s6995_s5 + $0x108] sm:$0xff] }
  0x88   :  { %5141 = vmatprep.subr.bf16.mxu1 %v5140_v58  ;;  %v461_v58 = vld [vmem:[%s6995_s5 + $0x190] sm:$0xff] }
  0x89   :  { %v4980_v63 = vpack.c.bf16 %v462_v59, %v461_v58  ;;  %v397_v59 = vld [vmem:[%s6991_s1 + $0x90] sm:$0xff] }
  0x8a   :  { %1046 = vmatmul.mubr.f32.gmra.mrb[12].mxu1 %v403_v61  ;;  %v4978_v61 = vpack.c.bf16 %v444_v57, %v443_v56  ;;  %v527_v56 = vld [vmem:[%s6995_s5 + $0x3a0] sm:$0xff]  ;;  %v528_v57 = vld [vmem:[%s6995_s5 + $0x3a8] sm:$0xff] }
  0x8b   :  { %5143 = vmatpush3.bf16.msra.mxu1 %v5142_v62  ;;  %1190 = vmatprep.mubr.f32.mxu1 %v392_v35 }
  0x8c   :  { %5145 = vmatprep.subr.bf16.mxu1 %v5144_v1  ;;  %v446_v1 = vld [vmem:[%s6995_s5 + $0x118] sm:$0xff] }
  0x8d   :  { %v4982_v5 = vpack.c.bf16 %v446_v1, %v445_v0  ;;  %v529_v0 = vld [vmem:[%s6995_s5 + $0x3b0] sm:$0xff]  ;;  %v530_v1 = vld [vmem:[%s6995_s5 + $0x3b8] sm:$0xff] }
  0x8f   :  { %5147 = vmatpush3.bf16.msra.mxu1 %v5146_v4  ;;  %v464_v4 = vld [vmem:[%s6995_s5 + $0x1a8] sm:$0xff] }
  0x90   :  { %5149 = vmatprep.subr.bf16.mxu1 %v5148_v7  ;;  %v4984_v6 = vpack.c.bf16 %v464_v4, %v463_v3  ;;  %v447_v7 = vld [vmem:[%s6995_s5 + $0x120] sm:$0xff]  ;;  %v5052_v3 = vpack.c.bf16 %v530_v1, %v529_v0  ;;  %v513_v4 = vld [vmem:[%s6995_s5 + $0x330] sm:$0xff] }
  0x91   :  { %v4986_v11 = vpack.c.bf16 %v448_v8, %v447_v7  ;;  %v532_v7 = vld [vmem:[%s6995_s5 + $0x3c8] sm:$0xff]  ;;  %v579_v1 = vld [vmem:[%s6995_s5 + $0x540] sm:$0xff] }
  0x93   :  { %5151 = vmatpush3.bf16.msra.mxu1 %v5150_v10  ;;  %v466_v10 = vld [vmem:[%s6995_s5 + $0x1b8] sm:$0xff] }
  0x94   :  { %5153 = vmatprep.subr.bf16.mxu1 %v5152_v13  ;;  %v4988_v12 = vpack.c.bf16 %v466_v10, %v465_v9  ;;  %v449_v13 = vld [vmem:[%s6995_s5 + $0x130] sm:$0xff]  ;;  %v515_v10 = vld [vmem:[%s6995_s5 + $0x340] sm:$0xff] }
  0x95   :  { %v4990_v17 = vpack.c.bf16 %v450_v14, %v449_v13  ;;  %v534_v13 = vld [vmem:[%s6995_s5 + $0x3d8] sm:$0xff] }
  0x97   :  { %5155 = vmatpush3.bf16.msra.mxu1 %v5154_v16  ;;  %v468_v16 = vld [vmem:[%s6995_s5 + $0x1c8] sm:$0xff] }
  0x98   :  { %5157 = vmatprep.subr.bf16.mxu1 %v5156_v19  ;;  %v4992_v18 = vpack.c.bf16 %v468_v16, %v467_v15  ;;  %v451_v19 = vld [vmem:[%s6995_s5 + $0x140] sm:$0xff]  ;;  %v517_v16 = vld [vmem:[%s6995_s5 + $0x350] sm:$0xff] }
  0x99   :  { %v4994_v23 = vpack.c.bf16 %v452_v20, %v451_v19  ;;  %v536_v19 = vld [vmem:[%s6995_s5 + $0x3e8] sm:$0xff] }
  0x9b   :  { %5159 = vmatpush3.bf16.msra.mxu1 %v5158_v22  ;;  %v470_v22 = vld [vmem:[%s6995_s5 + $0x1d8] sm:$0xff] }
  0x9c   :  { %5161 = vmatprep.subr.bf16.mxu1 %v5160_v25  ;;  %v4996_v24 = vpack.c.bf16 %v470_v22, %v469_v21  ;;  %v453_v25 = vld [vmem:[%s6995_s5 + $0x150] sm:$0xff]  ;;  %v519_v22 = vld [vmem:[%s6995_s5 + $0x360] sm:$0xff] }
  0x9d   :  { %v4998_v29 = vpack.c.bf16 %v454_v26, %v453_v25  ;;  %v538_v25 = vld [vmem:[%s6995_s5 + $0x3f8] sm:$0xff] }
  0x9f   :  { %5163 = vmatpush3.bf16.msra.mxu1 %v5162_v28  ;;  %v472_v28 = vld [vmem:[%s6995_s5 + $0x1e8] sm:$0xff] }
  0xa0   :  { %5165 = vmatprep.subr.bf16.mxu1 %v5164_v31  ;;  %v5000_v30 = vpack.c.bf16 %v472_v28, %v471_v27  ;;  %v455_v31 = vld [vmem:[%s6995_s5 + $0x160] sm:$0xff]  ;;  %v521_v28 = vld [vmem:[%s6995_s5 + $0x370] sm:$0xff] }
  0xa1   :  { %v5002_v35 = vpack.c.bf16 %v456_v32, %v455_v31  ;;  %v588_v31 = vld [vmem:[%s6995_s5 + $0x588] sm:$0xff] }
  0xa3   :  { %5167 = vmatpush3.bf16.msra.mxu1 %v5166_v34  ;;  %v474_v34 = vld [vmem:[%s6995_s5 + $0x1f8] sm:$0xff] }
  0xa6   :  { %1191 = vmatmul.mubr.f32.vlgmr.msra.gmra.mrb[14].mxu1 %v391_v36  ;;  %v5004_v36 = vpack.c.bf16 %v474_v34, %v473_v33  ;;  %v571_v34 = vld [vmem:[%s6995_s5 + $0x500] sm:$0xff] }
  0xa7   :  { %1195 = vmatprep.mubr.f32.mxu1 %v408_v37  ;;  %v457_v37 = vld [vmem:[%s6995_s5 + $0x170] sm:$0xff] }
  0xaa   :  { %1196 = vmatmul.mubr.f32.gmra.mrb[16].mxu1 %v407_v38  ;;  %v458_v38 = vld [vmem:[%s6995_s5 + $0x178] sm:$0xff] }
  0xf7   :  { %v4205_v43 = vpop.f32.mrb[0].mxu0 }
  0xf8   :  { %v4206_v45 = vpop.f32.mrb[1].mxu0 }
  0xf9   :  { %v4207_v46 = vadd.f32 %v4206_v45, %v4205_v43  ;;  %v4663_v47 = vpop.f32.mrb[0].mxu1  ;;  %v524_v43 = vld [vmem:[%s6995_s5 + $0x388] sm:$0xff] }
  0xfa   :  { %v243_v48 = vpop.f32.mrb[1].mxu1  ;;  %v5040_v45 = vpack.c.bf16 %v524_v43, %v523_v39  ;;  %v402_v43 = vld [vmem:[%s6991_s1 + $0xb8] sm:$0xff] }
  0xfb   :  { %v4208_v49 = vpop.f32.mrb[2].mxu0  ;;  %v169_v50 = vadd.f32 %v4207_v46, %v101_v44  ;;  %v507_v46 = vld [vmem:[%s6995_s5 + $0x300] sm:$0xff] }
  0xfc   :  { %v4209_v51 = vpop.f32.mrb[3].mxu0 }
  0xfd   :  { %v4210_v52 = vadd.f32 %v4209_v51, %v4208_v49  ;;  %v244_v53 = vadd.f32 %v243_v48, %v169_v50  ;;  %v525_v48 = vld [vmem:[%s6995_s5 + $0x390] sm:$0xff]  ;;  %v526_v49 = vld [vmem:[%s6995_s5 + $0x398] sm:$0xff] }
  0xfe   :  { %v381_v50 = vld [vmem:[%s6991_s1 + $0x10] sm:$0xff] }
  0xff   :  { %v174_v54 = vadd.f32 %v4210_v52, %v101_v44  ;;  %v252_v55 = vmax.f32 %v244_v53, 0.0  ;;  %v5006_v44 = vpack.c.bf16 %v458_v38, %v457_v37  ;;  %v5044_v52 = vpack.c.bf16 %v526_v49, %v525_v48  ;;  %v509_v53 = vld [vmem:[%s6995_s5 + $0x310] sm:$0xff]  ;;  %v590_v37 = vld [vmem:[%s6995_s5 + $0x598] sm:$0xff]  ;;  %v592_v48 = vld [vmem:[%s6995_s5 + $0x5a8] sm:$0xff] }
 0x100   :  { %v385_v38 = vld [vmem:[%s6991_s1 + $0x30] sm:$0xff] }
 0x101   :  { %v249_v60 = vadd.f32 %v4663_v47, %v174_v54  ;;  %4672 = vmatprep.mubr.msk.f32.mxu0 %vm258_vm0, %v252_v55  ;;  %v508_v47 = vld [vmem:[%s6995_s5 + $0x308] sm:$0xff]  ;;  %v510_v54 = vld [vmem:[%s6995_s5 + $0x318] sm:$0xff]  ;;  %v401_v49 = vld [vmem:[%s6991_s1 + $0xb0] sm:$0xff] }
 0x102   :  { %v5042_v51 = vpack.c.bf16 %v508_v47, %v507_v46  ;;  %v398_v55 = vld [vmem:[%s6991_s1 + $0x98] sm:$0xff]  ;;  %v5046_v58 = vpack.c.bf16 %v510_v54, %v509_v53  ;;  %v591_v47 = vld [vmem:[%s6995_s5 + $0x5a0] sm:$0xff]  ;;  %v576_v53 = vld [vmem:[%s6995_s5 + $0x528] sm:$0xff] }
 0x103   :  { %v253_v62 = vmax.f32 %v249_v60, 0.0  ;;  %v5048_v60 = vpack.c.bf16 %v528_v57, %v527_v56  ;;  %v574_v46 = vld [vmem:[%s6995_s5 + $0x518] sm:$0xff] }
 0x104   :  { %v390_v54 = vld [vmem:[%s6991_s1 + $0x58] sm:$0xff] }
 0x105   :  { %4673 = vmatmul.mubr.msk.f32.vlgmr.msra.gmra.mrb[4].mxu0 %vm258_vm0, %v253_v62  ;;  %v512_v62 = vld [vmem:[%s6995_s5 + $0x328] sm:$0xff]  ;;  %v594_v56 = vld [vmem:[%s6995_s5 + $0x5b8] sm:$0xff] }
 0x106   :  { %4979 = vmatpush3.bf16.msra.mxu0 %v4978_v61  ;;  %815 = vmatprep.mubr.f32.mxu0 %v382_v2  ;;  %v511_v61 = vld [vmem:[%s6995_s5 + $0x320] sm:$0xff] }
 0x107   :  { %4981 = vmatprep.subr.bf16.mxu0 %v4980_v63  ;;  %v386_v63 = vld [vmem:[%s6991_s1 + $0x38] sm:$0xff]  ;;  %v5050_v2 = vpack.c.bf16 %v512_v62, %v511_v61  ;;  %v595_v61 = vld [vmem:[%s6995_s5 + $0x5c0] sm:$0xff]  ;;  %v596_v62 = vld [vmem:[%s6995_s5 + $0x5c8] sm:$0xff] }
 0x108   :  { %v5120_v0 = vpack.c.bf16 %v596_v62, %v595_v61  ;;  %v661_v61 = vld [vmem:[%s6995_s5 + $0x7d0] sm:$0xff]  ;;  %v662_v62 = vld [vmem:[%s6995_s5 + $0x7d8] sm:$0xff] }
 0x10a   :  { %4983 = vmatpush3.bf16.msra.mxu0 %v4982_v5  ;;  %v514_v5 = vld [vmem:[%s6995_s5 + $0x338] sm:$0xff] }
 0x10b   :  { %4985 = vmatprep.subr.bf16.mxu0 %v4984_v6  ;;  %v531_v6 = vld [vmem:[%s6995_s5 + $0x3c0] sm:$0xff]  ;;  %v5054_v8 = vpack.c.bf16 %v514_v5, %v513_v4  ;;  %v598_v4 = vld [vmem:[%s6995_s5 + $0x5d8] sm:$0xff] }
 0x10c   :  { %v5056_v9 = vpack.c.bf16 %v532_v7, %v531_v6  ;;  %v581_v7 = vld [vmem:[%s6995_s5 + $0x550] sm:$0xff] }
 0x10e   :  { %4987 = vmatpush3.bf16.msra.mxu0 %v4986_v11  ;;  %v516_v11 = vld [vmem:[%s6995_s5 + $0x348] sm:$0xff] }
 0x10f   :  { %4989 = vmatprep.subr.bf16.mxu0 %v4988_v12  ;;  %v533_v12 = vld [vmem:[%s6995_s5 + $0x3d0] sm:$0xff]  ;;  %v5058_v14 = vpack.c.bf16 %v516_v11, %v515_v10  ;;  %v600_v10 = vld [vmem:[%s6995_s5 + $0x5e8] sm:$0xff] }
 0x110   :  { %v5060_v15 = vpack.c.bf16 %v534_v13, %v533_v12  ;;  %v583_v13 = vld [vmem:[%s6995_s5 + $0x560] sm:$0xff] }
 0x112   :  { %4991 = vmatpush3.bf16.msra.mxu0 %v4990_v17  ;;  %v518_v17 = vld [vmem:[%s6995_s5 + $0x358] sm:$0xff] }
 0x113   :  { %4993 = vmatprep.subr.bf16.mxu0 %v4992_v18  ;;  %v535_v18 = vld [vmem:[%s6995_s5 + $0x3e0] sm:$0xff]  ;;  %v5062_v20 = vpack.c.bf16 %v518_v17, %v517_v16  ;;  %v602_v16 = vld [vmem:[%s6995_s5 + $0x5f8] sm:$0xff] }
 0x114   :  { %v5064_v21 = vpack.c.bf16 %v536_v19, %v535_v18  ;;  %v585_v19 = vld [vmem:[%s6995_s5 + $0x570] sm:$0xff] }
 0x116   :  { %4995 = vmatpush3.bf16.msra.mxu0 %v4994_v23  ;;  %v520_v23 = vld [vmem:[%s6995_s5 + $0x368] sm:$0xff] }
 0x117   :  { %4997 = vmatprep.subr.bf16.mxu0 %v4996_v24  ;;  %v537_v24 = vld [vmem:[%s6995_s5 + $0x3f0] sm:$0xff]  ;;  %v5066_v26 = vpack.c.bf16 %v520_v23, %v519_v22  ;;  %v651_v22 = vld [vmem:[%s6995_s5 + $0x780] sm:$0xff]  ;;  %v652_v23 = vld [vmem:[%s6995_s5 + $0x788] sm:$0xff] }
 0x118   :  { %v5068_v27 = vpack.c.bf16 %v538_v25, %v537_v24 }
 0x11a   :  { %4999 = vmatpush3.bf16.msra.mxu0 %v4998_v29  ;;  %v522_v29 = vld [vmem:[%s6995_s5 + $0x378] sm:$0xff] }
 0x11b   :  { %5001 = vmatprep.subr.bf16.mxu0 %v5000_v30  ;;  %v587_v30 = vld [vmem:[%s6995_s5 + $0x580] sm:$0xff]  ;;  %v5070_v32 = vpack.c.bf16 %v522_v29, %v521_v28  ;;  %v636_v29 = vld [vmem:[%s6995_s5 + $0x708] sm:$0xff] }
 0x11c   :  { %v5104_v33 = vpack.c.bf16 %v588_v31, %v587_v30  ;;  %v635_v28 = vld [vmem:[%s6995_s5 + $0x700] sm:$0xff]  ;;  %v653_v30 = vld [vmem:[%s6995_s5 + $0x790] sm:$0xff]  ;;  %v654_v31 = vld [vmem:[%s6995_s5 + $0x798] sm:$0xff] }
 0x11e   :  { %5003 = vmatpush3.bf16.msra.mxu0 %v5002_v35  ;;  %v572_v35 = vld [vmem:[%s6995_s5 + $0x508] sm:$0xff] }
 0x11f   :  { %5005 = vmatprep.subr.bf16.mxu0 %v5004_v36  ;;  %v589_v36 = vld [vmem:[%s6995_s5 + $0x590] sm:$0xff]  ;;  %v5106_v39 = vpack.c.bf16 %v572_v35, %v571_v34  ;;  %v406_v34 = vld [vmem:[%s6991_s1 + $0xd8] sm:$0xff]  ;;  %v5172_v35 = vpack.c.bf16 %v654_v31, %v653_v30 }
 0x122   :  { %5007 = vmatpush3.bf16.msra.mxu0 %v5006_v44  ;;  %v5108_v44 = vpack.c.bf16 %v590_v37, %v589_v36  ;;  %v637_v36 = vld [vmem:[%s6995_s5 + $0x710] sm:$0xff]  ;;  %v638_v37 = vld [vmem:[%s6995_s5 + $0x718] sm:$0xff] }
 0x123   :  { %5041 = vmatprep.subr.bf16.mxu0 %v5040_v45  ;;  %v573_v45 = vld [vmem:[%s6995_s5 + $0x510] sm:$0xff] }
 0x125   :  { %816 = vmatmul.mubr.f32.vlgmr.msra.gmra.mrb[6].mxu0 %v381_v50  ;;  %v5110_v50 = vpack.c.bf16 %v574_v46, %v573_v45  ;;  %v639_v46 = vld [vmem:[%s6995_s5 + $0x720] sm:$0xff] }
 0x126   :  { %5043 = vmatpush3.bf16.msra.mxu0 %v5042_v51  ;;  %820 = vmatprep.mubr.f32.mxu0 %v398_v55  ;;  %v5112_v51 = vpack.c.bf16 %v592_v48, %v591_v47  ;;  %v593_v55 = vld [vmem:[%s6995_s5 + $0x5b0] sm:$0xff]  ;;  %v640_v47 = vld [vmem:[%s6995_s5 + $0x728] sm:$0xff]  ;;  %v394_v48 = vld [vmem:[%s6991_s1 + $0x78] sm:$0xff] }
 0x127   :  { %5045 = vmatprep.subr.bf16.mxu0 %v5044_v52  ;;  %v575_v52 = vld [vmem:[%s6995_s5 + $0x520] sm:$0xff] }
 0x128   :  { %v5114_v57 = vpack.c.bf16 %v576_v53, %v575_v52  ;;  %v641_v53 = vld [vmem:[%s6995_s5 + $0x730] sm:$0xff] }
 0x129   :  { %821 = vmatmul.mubr.f32.gmra.mrb[8].mxu0 %v397_v59  ;;  %v577_v59 = vld [vmem:[%s6995_s5 + $0x530] sm:$0xff] }
 0x12a   :  { %5047 = vmatpush3.bf16.msra.mxu0 %v5046_v58  ;;  %965 = vmatprep.mubr.f32.mxu0 %v386_v63  ;;  %v5116_v58 = vpack.c.bf16 %v594_v56, %v593_v55  ;;  %v659_v55 = vld [vmem:[%s6995_s5 + $0x7c0] sm:$0xff]  ;;  %v660_v56 = vld [vmem:[%s6995_s5 + $0x7c8] sm:$0xff] }
 0x12b   :  { %5049 = vmatprep.subr.bf16.mxu0 %v5048_v60  ;;  %v578_v60 = vld [vmem:[%s6995_s5 + $0x538] sm:$0xff] }
 0x12c   :  { %v5118_v63 = vpack.c.bf16 %v578_v60, %v577_v59  ;;  %v643_v59 = vld [vmem:[%s6995_s5 + $0x740] sm:$0xff]  ;;  %v644_v60 = vld [vmem:[%s6995_s5 + $0x748] sm:$0xff] }
 0x12e   :  { %5051 = vmatpush3.bf16.msra.mxu0 %v5050_v2  ;;  %v580_v2 = vld [vmem:[%s6995_s5 + $0x548] sm:$0xff] }
 0x12f   :  { %5053 = vmatprep.subr.bf16.mxu0 %v5052_v3  ;;  %v597_v3 = vld [vmem:[%s6995_s5 + $0x5d0] sm:$0xff]  ;;  %v5122_v5 = vpack.c.bf16 %v580_v2, %v579_v1  ;;  %v646_v2 = vld [vmem:[%s6995_s5 + $0x758] sm:$0xff] }
 0x130   :  { %v5124_v6 = vpack.c.bf16 %v598_v4, %v597_v3  ;;  %v645_v1 = vld [vmem:[%s6995_s5 + $0x750] sm:$0xff]  ;;  %v663_v3 = vld [vmem:[%s6995_s5 + $0x7e0] sm:$0xff]  ;;  %v664_v4 = vld [vmem:[%s6995_s5 + $0x7e8] sm:$0xff] }
 0x132   :  { %5055 = vmatpush3.bf16.msra.mxu0 %v5054_v8  ;;  %v582_v8 = vld [vmem:[%s6995_s5 + $0x558] sm:$0xff] }
 0x133   :  { %5057 = vmatprep.subr.bf16.mxu0 %v5056_v9  ;;  %v599_v9 = vld [vmem:[%s6995_s5 + $0x5e0] sm:$0xff]  ;;  %v5126_v11 = vpack.c.bf16 %v582_v8, %v581_v7  ;;  %v5192_v7 = vpack.c.bf16 %v664_v4, %v663_v3 }
 0x134   :  { %v5128_v12 = vpack.c.bf16 %v600_v10, %v599_v9  ;;  %v647_v8 = vld [vmem:[%s6995_s5 + $0x760] sm:$0xff]  ;;  %v648_v9 = vld [vmem:[%s6995_s5 + $0x768] sm:$0xff]  ;;  %v665_v10 = vld [vmem:[%s6995_s5 + $0x7f0] sm:$0xff] }
 0x136   :  { %5059 = vmatpush3.bf16.msra.mxu0 %v5058_v14  ;;  %v584_v14 = vld [vmem:[%s6995_s5 + $0x568] sm:$0xff] }
 0x137   :  { %5061 = vmatprep.subr.bf16.mxu0 %v5060_v15  ;;  %v601_v15 = vld [vmem:[%s6995_s5 + $0x5f0] sm:$0xff]  ;;  %v5130_v17 = vpack.c.bf16 %v584_v14, %v583_v13  ;;  %v5194_v14 = vpack.c.bf16 %v648_v9, %v647_v8 }
 0x138   :  { %v5132_v18 = vpack.c.bf16 %v602_v16, %v601_v15  ;;  %v649_v16 = vld [vmem:[%s6995_s5 + $0x770] sm:$0xff] }
 0x13a   :  { %5063 = vmatpush3.bf16.msra.mxu0 %v5062_v20  ;;  %v586_v20 = vld [vmem:[%s6995_s5 + $0x578] sm:$0xff] }
 0x13b   :  { %5065 = vmatprep.subr.bf16.mxu0 %v5064_v21  ;;  %v4267_v21 = vpop.f32.mrb[2].mxu1 }
 0x13c   :  { %v4268_v24 = vpop.f32.mrb[3].mxu1 }
 0x13d   :  { %v6397_v25 = vadd.f32 %v4268_v24, %v4267_v21  ;;  %v409_v24 = vld [vmem:[%s6991_s1 + $0xf0] sm:$0xff] }
 0x13e   :  { %5067 = vmatpush3.bf16.msra.mxu0 %v5066_v26  ;;  %v5134_v26 = vpack.c.bf16 %v586_v20, %v585_v19 }
 0x13f   :  { %5069 = vmatprep.subr.bf16.mxu0 %v5068_v27  ;;  %v5168_v27 = vpack.c.bf16 %v652_v23, %v651_v22  ;;  %v393_v22 = vld [vmem:[%s6991_s1 + $0x70] sm:$0xff]  ;;  %v410_v23 = vld [vmem:[%s6991_s1 + $0xf8] sm:$0xff] }
 0x142   :  { %5071 = vmatpush3.bf16.msra.mxu0 %v5070_v32  ;;  %v389_v32 = vld [vmem:[%s6991_s1 + $0x50] sm:$0xff] }
 0x143   :  { %5105 = vmatprep.subr.bf16.mxu0 %v5104_v33  ;;  %v5170_v33 = vpack.c.bf16 %v636_v29, %v635_v28 }
 0x145   :  { %966 = vmatmul.mubr.f32.vlgmr.msra.gmra.mrb[10].mxu0 %v385_v38  ;;  %v655_v38 = vld [vmem:[%s6995_s5 + $0x7a0] sm:$0xff] }
 0x146   :  { %5107 = vmatpush3.bf16.msra.mxu0 %v5106_v39  ;;  %970 = vmatprep.mubr.f32.mxu0 %v402_v43  ;;  %v656_v39 = vld [vmem:[%s6995_s5 + $0x7a8] sm:$0xff]  ;;  %v405_v43 = vld [vmem:[%s6991_s1 + $0xd0] sm:$0xff] }
 0x147   :  { %5109 = vmatprep.subr.bf16.mxu0 %v5108_v44  ;;  %v5174_v44 = vpack.c.bf16 %v638_v37, %v637_v36  ;;  %v5176_v45 = vpack.c.bf16 %v656_v39, %v655_v38 }
 0x149   :  { %971 = vmatmul.mubr.f32.gmra.mrb[12].mxu0 %v401_v49  ;;  %v657_v49 = vld [vmem:[%s6995_s5 + $0x7b0] sm:$0xff] }
 0x14a   :  { %5111 = vmatpush3.bf16.msra.mxu0 %v5110_v50  ;;  %1115 = vmatprep.mubr.f32.mxu0 %v390_v54  ;;  %v658_v50 = vld [vmem:[%s6995_s5 + $0x7b8] sm:$0xff] }
 0x14b   :  { %5113 = vmatprep.subr.bf16.mxu0 %v5112_v51  ;;  %v5178_v51 = vpack.c.bf16 %v640_v47, %v639_v46  ;;  %v5180_v52 = vpack.c.bf16 %v658_v50, %v657_v49  ;;  %v642_v54 = vld [vmem:[%s6995_s5 + $0x738] sm:$0xff]  ;;  %v668_v49 = vld [vmem:[%s6996_s6 + $0x8] sm:$0xff] }
 0x14e   :  { %5115 = vmatpush3.bf16.msra.mxu0 %v5114_v57  ;;  %v5182_v57 = vpack.c.bf16 %v642_v54, %v641_v53  ;;  %v670_v53 = vld [vmem:[%s6996_s6 + $0x18] sm:$0xff] }
 0x14f   :  { %5117 = vmatprep.subr.bf16.mxu0 %v5116_v58  ;;  %v5184_v58 = vpack.c.bf16 %v660_v56, %v659_v55  ;;  %v6537_v55 = vld [vmem:[%s6997_s7] sm:$0xf] }
 0x150   :  { %v675_v56 = vrot.slane %v6537_v55, %v6071_v41 }
 0x152   :  { %5119 = vmatpush3.bf16.msra.mxu0 %v5118_v63  ;;  %v5186_v63 = vpack.c.bf16 %v644_v60, %v643_v59 }
 0x153   :  { %5121 = vmatprep.subr.bf16.mxu0 %v5120_v0  ;;  %v5188_v0 = vpack.c.bf16 %v662_v62, %v661_v61 }
 0x156   :  { %5123 = vmatpush3.bf16.msra.mxu0 %v5122_v5  ;;  %v5190_v5 = vpack.c.bf16 %v646_v2, %v645_v1 }
 0x157   :  { %5125 = vmatprep.subr.bf16.mxu0 %v5124_v6  ;;  %v4270_v6 = vpop.f32.mrb[4].mxu1 }
 0x15a   :  { %5127 = vmatpush3.bf16.msra.mxu0 %v5126_v11  ;;  %v666_v11 = vld [vmem:[%s6995_s5 + $0x7f8] sm:$0xff] }
 0x15b   :  { %5129 = vmatprep.subr.bf16.mxu0 %v5128_v12  ;;  %v4271_v12 = vpop.f32.mrb[5].mxu1  ;;  %v5196_v15 = vpack.c.bf16 %v666_v11, %v665_v10 }
 0x15c   :  { %v4272_v13 = vadd.f32 %v4271_v12, %v4270_v6 }
 0x15e   :  { %5131 = vmatpush3.bf16.msra.mxu0 %v5130_v17  ;;  %v650_v17 = vld [vmem:[%s6995_s5 + $0x778] sm:$0xff]  ;;  %v748_v61 = vadd.f32 %v4272_v13, %v675_v56 }
 0x15f   :  { %5133 = vmatprep.subr.bf16.mxu0 %v5132_v18  ;;  %v4343_v18 = vpop.f32.mrb[6].mxu1  ;;  %v5198_v21 = vpack.c.bf16 %v650_v17, %v649_v16 }
 0x160   :  { %v4344_v19 = vpop.f32.mrb[7].mxu1 }
 0x161   :  { %v4345_v20 = vadd.f32 %v4344_v19, %v4343_v18 }
 0x162   :  { %5135 = vmatpush3.bf16.msra.mxu0 %v5134_v26  ;;  %v4346_v26 = vpop.f32.mrb[8].mxu1 }
 0x163   :  { %5169 = vmatprep.subr.bf16.mxu0 %v5168_v27  ;;  %v4347_v27 = vpop.f32.mrb[9].mxu1 }
 0x164   :  { %v4348_v28 = vadd.f32 %v4347_v27, %v4346_v26  ;;  %v4419_v29 = vpop.f32.mrb[10].mxu1 }
 0x165   :  { %1116 = vmatmul.mubr.f32.vlgmr.msra.gmra.mrb[14].mxu0 %v389_v32  ;;  %v4420_v30 = vpop.f32.mrb[11].mxu1 }
 0x166   :  { %5171 = vmatpush3.bf16.msra.mxu0 %v5170_v33  ;;  %1120 = vmatprep.mubr.f32.mxu0 %v406_v34  ;;  %v4421_v31 = vadd.f32 %v4420_v30, %v4419_v29  ;;  %v4422_v32 = vpop.f32.mrb[12].mxu1 }
 0x167   :  { %5173 = vmatprep.subr.bf16.mxu0 %v5172_v35  ;;  %v4423_v33 = vpop.f32.mrb[13].mxu1 }
 0x168   :  { %v4424_v34 = vadd.f32 %v4423_v33, %v4422_v32 }
 0x169   :  { %1121 = vmatmul.mubr.f32.gmra.mrb[16].mxu0 %v405_v43 }
 0x16a   :  { %5175 = vmatpush3.bf16.msra.mxu0 %v5174_v44  ;;  %1265 = vmatprep.mubr.f32.mxu0 %v394_v48  ;;  %v6511_v44 = vsub.s32 1, %v6068_v40  ;;  %v667_v48 = vld [vmem:[%s6996_s6] sm:$0xff] }
 0x16b   :  { %5177 = vmatprep.subr.bf16.mxu0 %v5176_v45 }
 0x16c   :  { %v6515_v45 = vrot.slane %v6076_v42, %v6511_v44 }
 0x16e   :  { %5179 = vmatpush3.bf16.msra.mxu0 %v5178_v51  ;;  %v5200_v51 = vpack.c.bf16 %v668_v49, %v667_v48 }
 0x16f   :  { %5181 = vmatprep.subr.bf16.mxu0 %v5180_v52  ;;  %v669_v52 = vld [vmem:[%s6996_s6 + $0x10] sm:$0xff] }
 0x170   :  { %5201 = vmatprep.subr.bf16.mxu1 %v5200_v51  ;;  %v5204_v54 = vpack.c.bf16 %v670_v53, %v669_v52 }
 0x171   :  { %5203 = vmatpush3.bf16.msra.mxu1 %v5200_v51 }
 0x172   :  { %5183 = vmatpush3.bf16.msra.mxu0 %v5182_v57  ;;  %5205 = vmatprep.subr.bf16.mxu1 %v5204_v54  ;;  %v743_v57 = vadd.f32 %v6397_v25, %v675_v56 }
 0x173   :  { %5185 = vmatprep.subr.bf16.mxu0 %v5184_v58 }
 0x175   :  { %5207 = vmatpush3.bf16.msra.mxu1 %v5204_v54 }
 0x176   :  { %5187 = vmatpush3.bf16.msra.mxu0 %v5186_v63 }
 0x177   :  { %5189 = vmatprep.subr.bf16.mxu0 %v5188_v0 }
 0x179   :  { %v4495_v35 = vpop.f32.mrb[14].mxu1 }
 0x17a   :  { %5191 = vmatpush3.bf16.msra.mxu0 %v5190_v5  ;;  %v4496_v36 = vpop.f32.mrb[15].mxu1 }
 0x17b   :  { %5193 = vmatprep.subr.bf16.mxu0 %v5192_v7  ;;  %v4497_v37 = vadd.f32 %v4496_v36, %v4495_v35  ;;  %v1281_v35 = vrot.slane %v6537_v55, %v6511_v44 }
 0x17d   :  { %v4498_v38 = vpop.f32.mrb[16].mxu1 }
 0x17e   :  { %5195 = vmatpush3.bf16.msra.mxu0 %v5194_v14  ;;  %v4499_v39 = vpop.f32.mrb[17].mxu1 }
 0x17f   :  { %5197 = vmatprep.subr.bf16.mxu0 %v5196_v15  ;;  %v4500_v43 = vadd.f32 %v4499_v39, %v4498_v38 }
 0x182   :  { %5199 = vmatpush3.bf16.msra.mxu0 %v5198_v21 }
 0x185   :  { %1266 = vmatmul.mubr.f32.vlgmr.msra.gmra.mrb[18].mxu0 %v393_v22 }
 0x186   :  { %1270 = vmatprep.mubr.f32.mxu0 %v410_v23 }
 0x189   :  { %1271 = vmatmul.mubr.f32.gmra.mrb[20].mxu0 %v409_v24 }
 0x1d8   :  { %v6517_v46 = vpop.f32.mrb[4].mxu0 }
 0x1d9   :  { %v331_v47 = vpop.f32.mrb[5].mxu0  ;;  %v337_v39 = vadd.f32 %v6517_v46, %v6515_v45 }
 0x1da   :  { %v6526_v50 = vadd.f32 %v331_v47, %v6515_v45 }
 0x1db   :  { %v343_v48 = vsel %vm258_vm0, %v337_v39, 0.0 }
 0x1f8   :  { %v4305_v58 = vpop.f32.mrb[6].mxu0 }
 0x1f9   :  { %v4306_v59 = vpop.f32.mrb[7].mxu0 }
 0x1fa   :  { %v4307_v60 = vadd.f32 %v4306_v59, %v4305_v58 }
 0x1fc   :  { %v818_v62 = vadd.f32 %v4307_v60, %v743_v57  ;;  %v4308_v63 = vpop.f32.mrb[8].mxu0 }
 0x1fd   :  { %v4309_v0 = vpop.f32.mrb[9].mxu0 }
 0x1fe   :  { %v893_v1 = vadd.f32 %v4345_v20, %v818_v62  ;;  %v4310_v2 = vadd.f32 %v4309_v0, %v4308_v63 }
 0x200   :  { %v823_v3 = vadd.f32 %v4310_v2, %v748_v61  ;;  %v5390_v2 = vmov 0.0  }
 0x201   :  { %4691 = vmatprep.subr.mxu0 %v5390_v2  ;;  %4686 = vmatprep.subr.mxu1 %v5390_v2 }
 0x202   :  { %v898_v4 = vadd.f32 %v4348_v28, %v823_v3  ;;  %4693 = vmatprep.mubr.msk.f32.mxu0 %vm5391_vm1, %v5390_v2 }
 0x218   :  { %v4381_v5 = vpop.f32.mrb[10].mxu0 }
 0x219   :  { %v4382_v6 = vpop.f32.mrb[11].mxu0 }
 0x21a   :  { %v4383_v7 = vadd.f32 %v4382_v6, %v4381_v5 }
 0x21c   :  { %v968_v8 = vadd.f32 %v4383_v7, %v893_v1  ;;  %v4384_v9 = vpop.f32.mrb[12].mxu0  ;;  %v340_v1 = vsel %vm258_vm0, %v6526_v50, 0.0 }
 0x21d   :  { %v4385_v10 = vpop.f32.mrb[13].mxu0 }
 0x21e   :  { %v1043_v11 = vadd.f32 %v4421_v31, %v968_v8  ;;  %v4386_v12 = vadd.f32 %v4385_v10, %v4384_v9 }
 0x220   :  { %v973_v25 = vadd.f32 %v4386_v12, %v898_v4 }
 0x222   :  { %v1048_v14 = vadd.f32 %v4424_v34, %v973_v25  ;;  %v6563_v25 = vsub.s32 2, %v6068_v40 }
 0x238   :  { %v4457_v15 = vpop.f32.mrb[14].mxu0 }
 0x239   :  { %v4458_v16 = vpop.f32.mrb[15].mxu0 }
 0x23a   :  { %v4459_v13 = vadd.f32 %v4458_v16, %v4457_v15  ;;  %v6567_v16 = vsub.s32 3, %v6068_v40 }
 0x23c   :  { %v1118_v17 = vadd.f32 %v4459_v13, %v1043_v11  ;;  %v4460_v18 = vpop.f32.mrb[16].mxu0 }
 0x23d   :  { %v4461_v19 = vpop.f32.mrb[17].mxu0 }
 0x23e   :  { %v1193_v20 = vadd.f32 %v4497_v37, %v1118_v17  ;;  %v4462_v21 = vadd.f32 %v4461_v19, %v4460_v18  ;;  %v1392_v17 = vrot.slane %v6537_v55, %v6563_v25 }
 0x240   :  { %v1123_v22 = vadd.f32 %v4462_v21, %v1048_v14 }
 0x242   :  { %v1198_v23 = vadd.f32 %v4500_v43, %v1123_v22  ;;  %v370_v22 = vrot.slane %v6076_v42, %v6563_v25 }
 0x258   :  { %v4533_v24 = vpop.f32.mrb[18].mxu0 }
 0x259   :  { %v4534_v26 = vpop.f32.mrb[19].mxu0 }
 0x25a   :  { %v4535_v27 = vadd.f32 %v4534_v26, %v4533_v24  ;;  %v376_v24 = vrot.slane %v6076_v42, %v6567_v16 }
 0x25c   :  { %v1268_v28 = vadd.f32 %v4535_v27, %v1193_v20  ;;  %v4536_v29 = vpop.f32.mrb[20].mxu0  ;;  %v1398_v20 = vrot.slane %v6537_v55, %v6567_v16 }
 0x25d   :  { %v4537_v30 = vpop.f32.mrb[21].mxu0 }
 0x25e   :  { %v1276_v31 = vmax.f32 %v1268_v28, 0.0  ;;  %v4538_v32 = vadd.f32 %v4537_v30, %v4536_v29 }
 0x260   :  { %v1273_v33 = vadd.f32 %v4538_v32, %v1198_v23  ;;  %4683 = vmatprep.mubr.msk.f32.mxu1 %vm258_vm0, %v1276_v31 }
 0x262   :  { %v1277_v34 = vmax.f32 %v1273_v33, 0.0 }
 0x264   :  { %4684 = vmatmul.mubr.msk.f32.vlgmr.msra.gmra.mrb[18].mxu1 %vm258_vm0, %v1277_v34 }
 0x265   :  { %4688 = vmatprep.mubr.msk.f32.mxu1 %vm5391_vm1, %v5390_v2 }
 0x337   :  { %v4685_v36 = vpop.f32.mrb[18].mxu1 }
 0x338   :  { %v1360_v37 = vadd.f32 %v4685_v36, %v1281_v35  ;;  %v1354_v38 = vpop.f32.mrb[19].mxu1 }
 0x339   :  { %v1355_v47 = vadd.f32 %v1354_v38, %v1281_v35 }
 0x33a   :  { %v1366_v43 = vsel %vm258_vm0, %v1360_v37, 0.0 }
 0x33b   :  { %1367 = vadd.xlane.f32.xlu0 %v1366_v43  ;;  %v1363_v49 = vsel %vm258_vm0, %v1355_v47, 0.0 }
 0x33f   :  { %344 = vadd.xlane.f32.xlu0 %v343_v48 }
 0x343   :  { %1364 = vadd.xlane.f32.xlu0 %v1363_v49 }
 0x3c8   :  { %v1368_v51 = vpop.xlane.xlu0 %1367 }
 0x3c9   :  { %v1370_v52 = vmul.f32 0.03125, %v1368_v51 }
 0x3cb   :  { %v1372_v53 = vsub.f32 %v1360_v37, %v1370_v52 }
 0x3cc   :  { %v345_v54 = vpop.xlane.xlu0 %344 }
 0x3cd   :  { %v348_v56 = vmul.f32 0.03125, %v345_v54  ;;  %v1374_v57 = vmul.f32 %v1372_v53, %v1372_v53 }
 0x3cf   :  { %v350_v58 = vsub.f32 %v337_v39, %v348_v56  ;;  %v1378_v59 = vsel %vm258_vm0, %v1374_v57, 0.0 }
 0x3d0   :  { %1379 = vadd.xlane.f32.xlu1 %v1378_v59  ;;  %v1365_v45 = vpop.xlane.xlu0 %1364 }
 0x3d1   :  { %v1369_v46 = vmul.f32 0.03125, %v1365_v45  ;;  %v352_v60 = vmul.f32 %v350_v58, %v350_v58 }
 0x3d3   :  { %v1371_v61 = vsub.f32 %v1355_v47, %v1369_v46  ;;  %v356_v62 = vsel %vm258_vm0, %v352_v60, 0.0 }
 0x3d4   :  { %357 = vadd.xlane.f32.xlu1 %v356_v62 }
 0x3d5   :  { %v1373_v63 = vmul.f32 %v1371_v61, %v1371_v61 }
 0x3d7   :  { %v1375_v0 = vsel %vm258_vm0, %v1373_v63, 0.0 }
 0x3d8   :  { %1376 = vadd.xlane.f32.xlu0 %v1375_v0  ;;  %341 = vadd.xlane.f32.xlu1 %v340_v1  ;;  %v1401_v0 = vld [vmem:[%s6998_s8] sm:$0xff]  ;;  %v1402_v1 = vld [vmem:[%s6998_s8 + $0x8] sm:$0xff] }
 0x45d   :  { %v1380_v3 = vpop.xlane.xlu1 %1379 }
 0x45e   :  { %v1382_v4 = vmul.f32 0.03125, %v1380_v3  ;;  %v5208_v3 = vpack.c.bf16 %v1402_v1, %v1401_v0 }
 0x460   :  { %v1384_v5 = vadd.f32 1e-12, %v1382_v4 }
 0x461   :  { %v358_v6 = vpop.xlane.xlu1 %357 }
 0x462   :  { %5262 = vrsqrt.f32 %v1384_v5  ;;  %v360_v7 = vmul.f32 0.03125, %v358_v6 }
 0x464   :  { %v362_v8 = vadd.f32 1e-12, %v360_v7 }
 0x465   :  { %v1377_v9 = vpop.xlane.xlu0 %1376  ;;  %v342_v10 = vpop.xlane.xlu1 %341 }
 0x466   :  { %5264 = vrsqrt.f32 %v362_v8  ;;  %v1381_v11 = vmul.f32 0.03125, %v1377_v9  ;;  %v347_v12 = vmul.f32 0.03125, %v342_v10 }
 0x468   :  { %v1383_v14 = vadd.f32 1e-12, %v1381_v11  ;;  %v349_v15 = vsub.f32 %v6526_v50, %v347_v12 }
 0x46a   :  { %5266 = vrsqrt.f32 %v1383_v14  ;;  %v351_v13 = vmul.f32 %v349_v15, %v349_v15 }
 0x46c   :  { %v5263_v18 = vpop.eup %5262  ;;  %v353_v19 = vsel %vm258_vm0, %v351_v13, 0.0  ;;  %v1403_v13 = vld [vmem:[%s6998_s8 + $0x10] sm:$0xff] }
 0x46d   :  { %v1388_v21 = vmul.f32 %v5263_v18, %v1372_v53  ;;  %354 = vadd.xlane.f32.xlu1 %v353_v19 }
 0x46f   :  { %v1394_v50 = vmul.f32 %v1392_v17, %v1388_v21 }
 0x470   :  { %v5265_v23 = vpop.eup %5264 }
 0x471   :  { %v366_v26 = vmul.f32 %v5265_v23, %v350_v58  ;;  %v6578_v27 = vadd.f32 %v1398_v20, %v1394_v50 }
 0x473   :  { %v372_v28 = vmul.f32 %v370_v22, %v366_v26  ;;  %4692 = vmatpush3.xpose.msk.msra.mxu0 %vm258_vm0, %v6578_v27 }
 0x474   :  { %v5267_v29 = vpop.eup %5266  ;;  %4701 = vmatprep.subr.mxu0 %v5390_v2 }
 0x475   :  { %v6583_v55 = vadd.f32 %v376_v24, %v372_v28  ;;  %v1387_v30 = vmul.f32 %v5267_v29, %v1371_v61 }
 0x477   :  { %4694 = vmatmul.mubr.msk.f32.vlgmr.msra.gmra.mrb[22].mxu0 %vm258_vm0, %v6583_v55  ;;  %v1393_v31 = vmul.f32 %v1392_v17, %v1387_v30  ;;  %v1404_v17 = vld [vmem:[%s6998_s8 + $0x18] sm:$0xff] }
 0x478   :  { %4702 = vmatpush3.msra.mxu0 %v6578_v27  ;;  %4703 = vmatprep.mubr.msk.f32.mxu0 %vm5391_vm1, %v5390_v2  ;;  %v5212_v18 = vpack.c.bf16 %v1404_v17, %v1403_v13 }
 0x479   :  { %v6590_v42 = vadd.f32 %v1398_v20, %v1393_v31  ;;  %4717 = vmatprep.subr.mxu0 %v5390_v2 }
 0x47b   :  { %4687 = vmatpush3.xpose.msk.msra.mxu1 %vm258_vm0, %v6590_v42 }
 0x47c   :  { %4696 = vmatprep.subr.mxu1 %v5390_v2 }
 0x4fa   :  { %v355_v32 = vpop.xlane.xlu1 %354 }
 0x4fb   :  { %v359_v33 = vmul.f32 0.03125, %v355_v32 }
 0x4fd   :  { %v361_v34 = vadd.f32 1e-12, %v359_v33 }
 0x4ff   :  { %5268 = vrsqrt.f32 %v361_v34 }
 0x509   :  { %v5269_v35 = vpop.eup %5268 }
 0x50a   :  { %v365_v36 = vmul.f32 %v5269_v35, %v349_v15 }
 0x50c   :  { %v371_v37 = vmul.f32 %v370_v22, %v365_v36 }
 0x50e   :  { %v6596_v38 = vadd.f32 %v376_v24, %v371_v37 }
 0x510   :  { %4689 = vmatmul.mubr.msk.f32.vlgmr.msra.gmra.mrb[20].mxu1 %vm258_vm0, %v6596_v38 }
 0x511   :  { %4697 = vmatpush3.msra.mxu1 %v6590_v42  ;;  %4698 = vmatprep.mubr.msk.f32.mxu1 %vm5391_vm1, %v5390_v2 }
 0x512   :  { %5209 = vmatprep.subr.bf16.mxu1 %v5208_v3 }
 0x54a   :  { %v1558_v39 = vpop.f32.mrb[22].mxu0 }
 0x54b   :  { %v4695_v43 = vpop.f32.mrb[23].mxu0  ;;  %v1566_v47 = vsel %vm1562_vm2, %v1558_v39, -inf }
 0x54c   :  { %1567 = vmax.xlane.f32.xlu0 %v1566_v47 }
 0x5d9   :  { %v1568_v48 = vpop.xlane.xlu0 %1567 }
 0x5da   :  { %v1570_v49 = vsub.f32 %v1558_v39, %v1568_v48  ;;  %v6656_v39 = vld [vmem:[%s6999_s9] sm:$0x3f] }
 0x5db   :  { %v1734_v43 = vrot.slane %v6656_v39, %v6071_v41 }
 0x5dc   :  { %v1573_v51 = vmul.f32 1.442695, %v1570_v49 }
 0x5de   :  { %5270 = vpow2.f32 %v1573_v51 }
 0x5e3   :  { %v1482_v52 = vpop.f32.mrb[20].mxu1 }
 0x5e4   :  { %v4690_v53 = vpop.f32.mrb[21].mxu1  ;;  %v1563_v54 = vsel %vm1562_vm2, %v1482_v52, -inf }
 0x5e5   :  { %1564 = vmax.xlane.f32.xlu0 %v1563_v54 }
 0x5e8   :  { %v5271_v56 = vpop.eup %5270 }
 0x5e9   :  { %v1578_v57 = vsel %vm1562_vm2, %v5271_v56, 0.0 }
 0x5ea   :  { %1579 = vadd.xlane.f32.xlu1 %v1578_v57  ;;  %v1405_v57 = vld [vmem:[%s6998_s8 + $0x20] sm:$0xff] }
 0x672   :  { %v1565_v58 = vpop.xlane.xlu0 %1564 }
 0x673   :  { %v1569_v59 = vsub.f32 %v1482_v52, %v1565_v58  ;;  %v1406_v58 = vld [vmem:[%s6998_s8 + $0x28] sm:$0xff] }
 0x675   :  { %v1571_v45 = vmul.f32 1.442695, %v1569_v59  ;;  %v5216_v59 = vpack.c.bf16 %v1406_v58, %v1405_v57  ;;  %v1847_v57 = vrot.slane %v6656_v39, %v6511_v44 }
 0x677   :  { %5272 = vpow2.f32 %v1571_v45  ;;  %v1580_v46 = vpop.xlane.xlu1 %1579 }
 0x678   :  { %5274 = vrcp.f32 %v1580_v46 }
 0x681   :  { %v5273_v60 = vpop.eup %5272 }
 0x682   :  { %v5275_v61 = vpop.eup %5274  ;;  %v1575_v62 = vsel %vm1562_vm2, %v5273_v60, 0.0 }
 0x683   :  { %v1584_v63 = vmul.f32 %v5275_v61, %v5271_v56  ;;  %1576 = vadd.xlane.f32.xlu1 %v1575_v62 }
 0x685   :  { %4704 = vmatmul.mubr.msk.f32.vlgmr.msra.gmra.mrb[24].mxu0 %vm1562_vm2, %v1584_v63 }
 0x686   :  { %4718 = vmatpush3.xpose.msk.msra.mxu0 %vm258_vm0, %v6596_v38  ;;  %4719 = vmatprep.mubr.msk.f32.mxu0 %vm5391_vm1, %v5390_v2 }
 0x687   :  { %4722 = vmatprep.subr.mxu0 %v5390_v2 }
 0x689   :  { %4720 = vmatmul.mubr.msk.f32.vlgmr.msra.gmra.mrb[26].mxu0 %vm258_vm0, %v6590_v42 }
 0x68a   :  { %4723 = vmatpush3.xpose.msk.msra.mxu0 %vm258_vm0, %v6583_v55  ;;  %4724 = vmatprep.mubr.msk.f32.mxu0 %vm5391_vm1, %v5390_v2 }
 0x68b   :  { %4732 = vmatprep.subr.mxu0 %v5390_v2 }
 0x68d   :  { %4725 = vmatmul.mubr.msk.f32.vlgmr.msra.gmra.mrb[28].mxu0 %vm258_vm0, %v6578_v27 }
 0x68e   :  { %4733 = vmatpush3.msra.mxu0 %v6583_v55  ;;  %4734 = vmatprep.mubr.msk.f32.mxu0 %vm5391_vm1, %v5390_v2 }
 0x68f   :  { %4748 = vmatprep.subr.mxu0 %v5390_v2 }
 0x710   :  { %v1577_v4 = vpop.xlane.xlu1 %1576 }
 0x711   :  { %5276 = vrcp.f32 %v1577_v4 }
 0x71b   :  { %v5277_v5 = vpop.eup %5276 }
 0x71c   :  { %v1582_v6 = vmul.f32 %v5277_v5, %v5273_v60 }
 0x71e   :  { %4699 = vmatmul.mubr.msk.f32.vlgmr.msra.gmra.mrb[22].mxu1 %vm1562_vm2, %v1582_v6 }
 0x71f   :  { %5211 = vmatpush3.bf16.msra.mxu1 %v5208_v3 }
 0x720   :  { %5213 = vmatprep.subr.bf16.mxu1 %v5212_v18 }
 0x723   :  { %5215 = vmatpush3.bf16.msra.mxu1 %v5212_v18 }
 0x724   :  { %4727 = vmatprep.subr.mxu1 %v5390_v2 }
 0x758   :  { %v1727_v7 = vpop.f32.mrb[24].mxu0 }
 0x759   :  { %v4705_v8 = vpop.f32.mrb[25].mxu0 }
 0x75c   :  { %v1922_v9 = vpop.f32.mrb[26].mxu0 }
 0x75d   :  { %v4721_v10 = vpop.f32.mrb[27].mxu0  ;;  %v1996_v11 = vsel %vm1562_vm2, %v1922_v9, -inf }
 0x75e   :  { %1997 = vmax.xlane.f32.xlu0 %v1996_v11  ;;  %v2167_v10 = vrot.slane %v6656_v39, %v6567_v16 }
 0x760   :  { %v1992_v12 = vpop.f32.mrb[28].mxu0 }
 0x761   :  { %v4726_v14 = vpop.f32.mrb[29].mxu0  ;;  %v1999_v15 = vsel %vm1562_vm2, %v1992_v12, -inf }
 0x762   :  { %2000 = vmax.xlane.f32.xlu1 %v1999_v15 }
 0x7eb   :  { %v1998_v19 = vpop.xlane.xlu0 %1997 }
 0x7ec   :  { %v2002_v20 = vsub.f32 %v1922_v9, %v1998_v19 }
 0x7ee   :  { %v2004_v21 = vmul.f32 1.442695, %v2002_v20 }
 0x7ef   :  { %v2001_v22 = vpop.xlane.xlu1 %2000 }
 0x7f0   :  { %5278 = vpow2.f32 %v2004_v21  ;;  %v2003_v50 = vsub.f32 %v1992_v12, %v2001_v22 }
 0x7f1   :  { %v1654_v23 = vpop.f32.mrb[22].mxu1 }
 0x7f2   :  { %v2006_v24 = vmul.f32 1.442695, %v2003_v50  ;;  %v4700_v26 = vpop.f32.mrb[23].mxu1  ;;  %4714 = vmatprep.mubr.msk.f32.mxu1 %vm258_vm0, %v1654_v23 }
 0x7f3   :  { %4715 = vmatmul.mubr.msk.f32.vlgmr.msra.gmra.mrb[24].mxu1 %vm258_vm0, %v1727_v7 }
 0x7f4   :  { %5280 = vpow2.f32 %v2006_v24  ;;  %4728 = vmatpush3.msra.mxu1 %v6596_v38  ;;  %4729 = vmatprep.mubr.msk.f32.mxu1 %vm5391_vm1, %v5390_v2 }
 0x7f5   :  { %5217 = vmatprep.subr.bf16.mxu1 %v5216_v59 }
 0x7fa   :  { %v5279_v28 = vpop.eup %5278 }
 0x7fb   :  { %v2008_v29 = vsel %vm1562_vm2, %v5279_v28, 0.0 }
 0x7fc   :  { %2009 = vadd.xlane.f32.xlu0 %v2008_v29 }
 0x7fe   :  { %v5281_v30 = vpop.eup %5280 }
 0x7ff   :  { %v2011_v31 = vsel %vm1562_vm2, %v5281_v30, 0.0 }
 0x800   :  { %2012 = vadd.xlane.f32.xlu1 %v2011_v31 }
 0x889   :  { %v2010_v32 = vpop.xlane.xlu0 %2009 }
 0x88a   :  { %5282 = vrcp.f32 %v2010_v32 }
 0x88d   :  { %v2013_v33 = vpop.xlane.xlu1 %2012 }
 0x88e   :  { %5284 = vrcp.f32 %v2013_v33 }
 0x894   :  { %v5283_v34 = vpop.eup %5282 }
 0x895   :  { %v2015_v35 = vmul.f32 %v5283_v34, %v5279_v28 }
 0x897   :  { %4730 = vmatmul.mubr.msk.f32.vlgmr.msra.gmra.mrb[26].mxu1 %vm1562_vm2, %v2015_v35 }
 0x898   :  { %v5285_v36 = vpop.eup %5284  ;;  %5219 = vmatpush3.bf16.msra.mxu1 %v5216_v59 }
 0x899   :  { %v2017_v37 = vmul.f32 %v5285_v36, %v5281_v30 }
 0x89b   :  { %4735 = vmatmul.mubr.msk.f32.vlgmr.msra.gmra.mrb[30].mxu0 %vm1562_vm2, %v2017_v37 }
 0x89c   :  { %4750 = vmatprep.mubr.msk.f32.mxu0 %vm5391_vm1, %v5390_v2 }
 0x8c6   :  { %v4716_v47 = vpop.f32.mrb[24].mxu1 }
 0x8c7   :  { %v1807_v48 = vpop.f32.mrb[25].mxu1  ;;  %v1813_v49 = vadd.f32 %v4716_v47, %v1734_v43 }
 0x8c8   :  { %v1808_v51 = vadd.f32 %v1807_v48, %v1734_v43 }
 0x8c9   :  { %v1817_v54 = vadd.f32 %v1813_v49, %v6583_v55  ;;  %v1408_v55 = vld [vmem:[%s6998_s8 + $0x38] sm:$0xff]  ;;  %v6696_v49 = vsub.s32 4, %v6068_v40 }
 0x8ca   :  { %v1816_v52 = vadd.f32 %v1808_v51, %v6596_v38  ;;  %v1407_v38 = vld [vmem:[%s6998_s8 + $0x30] sm:$0xff] }
 0x8cb   :  { %v1821_v56 = vsel %vm258_vm0, %v1817_v54, 0.0  ;;  %v5220_v45 = vpack.c.bf16 %v1408_v55, %v1407_v38 }
 0x8cc   :  { %v1818_v53 = vsel %vm258_vm0, %v1816_v52, 0.0 }
 0x8cd   :  { %1819 = vadd.xlane.f32.xlu1 %v1818_v53  ;;  %5221 = vmatprep.subr.bf16.mxu1 %v5220_v45  ;;  %v2280_v53 = vrot.slane %v6656_v39, %v6696_v49 }
 0x8ce   :  { %5223 = vmatpush3.bf16.msra.mxu1 %v5220_v45 }
 0x8cf   :  { %4758 = vmatprep.subr.mxu1 %v5390_v2 }
 0x8d1   :  { %1822 = vadd.xlane.f32.xlu1 %v1821_v56 }
 0x95a   :  { %v1820_v46 = vpop.xlane.xlu1 %1819 }
 0x95b   :  { %v1824_v60 = vmul.f32 0.03125, %v1820_v46 }
 0x95d   :  { %v1826_v61 = vsub.f32 %v1816_v52, %v1824_v60  ;;  %v6699_v52 = vsub.s32 5, %v6068_v40  ;;  %v1853_v40 = vrot.slane %v6656_v39, %v6563_v25 }
 0x95e   :  { %v1823_v62 = vpop.xlane.xlu1 %1822 }
 0x95f   :  { %v1825_v63 = vmul.f32 0.03125, %v1823_v62  ;;  %v1828_v0 = vmul.f32 %v1826_v61, %v1826_v61  ;;  %v2286_v38 = vrot.slane %v6656_v39, %v6699_v52 }
 0x961   :  { %v6677_v1 = vsub.f32 %v1817_v54, %v1825_v63  ;;  %v1830_v3 = vsel %vm258_vm0, %v1828_v0, 0.0 }
 0x962   :  { %1831 = vadd.xlane.f32.xlu1 %v1830_v3 }
 0x963   :  { %v1829_v4 = vmul.f32 %v6677_v1, %v6677_v1 }
 0x965   :  { %v1833_v5 = vsel %vm258_vm0, %v1829_v4, 0.0 }
 0x966   :  { %1834 = vadd.xlane.f32.xlu1 %v1833_v5 }
 0x96a   :  { %v2087_v6 = vpop.f32.mrb[26].mxu1 }
 0x96b   :  { %v4731_v7 = vpop.f32.mrb[27].mxu1  ;;  %4745 = vmatprep.mubr.msk.f32.mxu1 %vm258_vm0, %v2087_v6 }
 0x96e   :  { %v2160_v8 = vpop.f32.mrb[30].mxu0 }
 0x96f   :  { %v4736_v9 = vpop.f32.mrb[31].mxu0  ;;  %4746 = vmatmul.mubr.msk.f32.vlgmr.msra.gmra.mrb[28].mxu1 %vm258_vm0, %v2160_v8 }
 0x970   :  { %4760 = vmatprep.mubr.msk.f32.mxu1 %vm5391_vm1, %v5390_v2 }
 0x9ef   :  { %v1832_v30 = vpop.xlane.xlu1 %1831 }
 0x9f3   :  { %v1835_v31 = vpop.xlane.xlu1 %1834 }
 0x9f4   :  { %v1837_v33 = vmul.f32 0.03125, %v1835_v31 }
 0x9f6   :  { %v1839_v36 = vadd.f32 1e-12, %v1837_v33 }
 0xa42   :  { %v4747_v11 = vpop.f32.mrb[28].mxu1 }
 0xa43   :  { %v2240_v12 = vpop.f32.mrb[29].mxu1  ;;  %v2246_v14 = vadd.f32 %v4747_v11, %v2167_v10 }
 0xa44   :  { %v2241_v15 = vadd.f32 %v2240_v12, %v2167_v10 }
 0xa45   :  { %v2250_v18 = vadd.f32 %v2246_v14, %v6578_v27  ;;  %v1836_v27 = vmul.f32 0.03125, %v1832_v30  ;;  %v4125_v30 = vld [vmem:[%s6998_s8 + $0x50] sm:$0xff] }
 0xa46   :  { %v2249_v13 = vadd.f32 %v2241_v15, %v6590_v42 }
 0xa47   :  { %v2254_v19 = vsel %vm258_vm0, %v2250_v18, 0.0  ;;  %v1838_v32 = vadd.f32 1e-12, %v1836_v27  ;;  %v4126_v27 = vld [vmem:[%s6998_s8 + $0x58] sm:$0xff] }
 0xa48   :  { %v2251_v17 = vsel %vm258_vm0, %v2249_v13, 0.0  ;;  %v5228_v31 = vpack.c.bf16 %v4126_v27, %v4125_v30 }
 0xa49   :  { %2252 = vadd.xlane.f32.xlu0 %v2251_v17  ;;  %5286 = vrsqrt.f32 %v1838_v32 }
 0xa4d   :  { %2255 = vadd.xlane.f32.xlu0 %v2254_v19 }
 0xa53   :  { %v5287_v51 = vpop.eup %5286 }
 0xa54   :  { %v1842_v56 = vmul.f32 %v5287_v51, %v1826_v61 }
 0xa56   :  { %v1848_v60 = vmul.f32 %v1847_v57, %v1842_v56 }
 0xa58   :  { %v6715_v0 = vadd.f32 %v1853_v40, %v1848_v60  ;;  %v6784_v60 = vld [vmem:[%s6999_s9 + $0x8] sm:$0x3f] }
 0xad6   :  { %v2253_v20 = vpop.xlane.xlu0 %2252 }
 0xad7   :  { %v2257_v21 = vmul.f32 0.03125, %v2253_v20 }
 0xad9   :  { %v2259_v22 = vsub.f32 %v2249_v13, %v2257_v21  ;;  %v4123_v21 = vld [vmem:[%s6998_s8 + $0x40] sm:$0xff] }
 0xada   :  { %v2256_v50 = vpop.xlane.xlu0 %2255 }
 0xadb   :  { %v2258_v23 = vmul.f32 0.03125, %v2256_v50  ;;  %v2261_v24 = vmul.f32 %v2259_v22, %v2259_v22 }
 0xadd   :  { %v2260_v26 = vsub.f32 %v2250_v18, %v2258_v23  ;;  %v2263_v28 = vsel %vm258_vm0, %v2261_v24, 0.0 }
 0xade   :  { %2264 = vadd.xlane.f32.xlu0 %v2263_v28 }
 0xadf   :  { %v2262_v29 = vmul.f32 %v2260_v26, %v2260_v26 }
 0xae1   :  { %v2266_v42 = vsel %vm258_vm0, %v2262_v29, 0.0 }
 0xae2   :  { %2267 = vadd.xlane.f32.xlu0 %v2266_v42 }
 0xb6b   :  { %v2265_v34 = vpop.xlane.xlu0 %2264 }
 0xb6c   :  { %v2269_v35 = vmul.f32 0.03125, %v2265_v34 }
 0xb6e   :  { %v2271_v37 = vadd.f32 1e-12, %v2269_v35 }
 0xb6f   :  { %v2268_v43 = vpop.xlane.xlu0 %2267 }
 0xb70   :  { %5288 = vrsqrt.f32 %v2271_v37  ;;  %v2270_v47 = vmul.f32 0.03125, %v2268_v43 }
 0xb71   :  { %5290 = vrsqrt.f32 %v1839_v36 }
 0xb72   :  { %v2272_v48 = vadd.f32 1e-12, %v2270_v47 }
 0xb74   :  { %5292 = vrsqrt.f32 %v2272_v48 }
 0xb7a   :  { %v5289_v54 = vpop.eup %5288 }
 0xb7b   :  { %v5291_v58 = vpop.eup %5290  ;;  %v2275_v59 = vmul.f32 %v5289_v54, %v2259_v22  ;;  %v4124_v22 = vld [vmem:[%s6998_s8 + $0x48] sm:$0xff] }
 0xb7c   :  { %v1843_v46 = vmul.f32 %v5291_v58, %v6677_v1  ;;  %v5224_v50 = vpack.c.bf16 %v4124_v22, %v4123_v21 }
 0xb7d   :  { %v2281_v55 = vmul.f32 %v2280_v53, %v2275_v59 }
 0xb7e   :  { %v5293_v45 = vpop.eup %5292  ;;  %v1849_v3 = vmul.f32 %v1847_v57, %v1843_v46 }
 0xb7f   :  { %v2276_v62 = vmul.f32 %v5293_v45, %v2260_v26  ;;  %v6710_v63 = vadd.f32 %v2286_v38, %v2281_v55 }
 0xb80   :  { %v6726_v39 = vadd.f32 %v1853_v40, %v1849_v3  ;;  %v2623_v40 = vrot.slane %v6784_v60, %v6071_v41 }
 0xb81   :  { %4749 = vmatpush3.xpose.msk.msra.mxu0 %vm258_vm0, %v6710_v63  ;;  %4759 = vmatpush3.msra.mxu1 %v6710_v63  ;;  %v2282_v61 = vmul.f32 %v2280_v53, %v2276_v62 }
 0xb82   :  { %4753 = vmatprep.subr.mxu0 %v5390_v2  ;;  %5225 = vmatprep.subr.bf16.mxu1 %v5224_v50 }
 0xb83   :  { %v6718_v4 = vadd.f32 %v2286_v38, %v2282_v61 }
 0xb84   :  { %4751 = vmatmul.mubr.msk.f32.vlgmr.msra.gmra.mrb[32].mxu0 %vm258_vm0, %v6715_v0 }
 0xb85   :  { %4754 = vmatpush3.xpose.msk.msra.mxu0 %vm258_vm0, %v6718_v4  ;;  %4755 = vmatprep.mubr.msk.f32.mxu0 %vm5391_vm1, %v5390_v2 }
 0xb86   :  { %4763 = vmatprep.subr.mxu0 %v5390_v2 }
 0xb88   :  { %4756 = vmatmul.mubr.msk.f32.vlgmr.msra.gmra.mrb[34].mxu0 %vm258_vm0, %v6726_v39 }
 0xb89   :  { %4764 = vmatpush3.msra.mxu0 %v6718_v4  ;;  %4765 = vmatprep.mubr.msk.f32.mxu0 %vm5391_vm1, %v5390_v2 }
 0xb8a   :  { %4779 = vmatprep.subr.mxu0 %v5390_v2 }
 0xc57   :  { %v2372_v1 = vpop.f32.mrb[32].mxu0 }
 0xc58   :  { %v4752_v5 = vpop.f32.mrb[33].mxu0  ;;  %v2452_v9 = vsel %vm1562_vm2, %v2372_v1, -inf }
 0xc5b   :  { %v2448_v6 = vpop.f32.mrb[34].mxu0 }
 0xc5c   :  { %v4757_v7 = vpop.f32.mrb[35].mxu0  ;;  %v2455_v8 = vsel %vm1562_vm2, %v2448_v6, -inf }
 0xc5d   :  { %2456 = vmax.xlane.f32.xlu0 %v2455_v8 }
 0xc61   :  { %2453 = vmax.xlane.f32.xlu0 %v2452_v9 }
 0xcea   :  { %v2457_v10 = vpop.xlane.xlu0 %2456 }
 0xceb   :  { %v2459_v11 = vsub.f32 %v2448_v6, %v2457_v10 }
 0xced   :  { %v2462_v12 = vmul.f32 1.442695, %v2459_v11 }
 0xcee   :  { %v2454_v14 = vpop.xlane.xlu0 %2453 }
 0xcef   :  { %5294 = vpow2.f32 %v2462_v12  ;;  %v2458_v15 = vsub.f32 %v2372_v1, %v2454_v14 }
 0xcf1   :  { %v2460_v13 = vmul.f32 1.442695, %v2458_v15 }
 0xcf3   :  { %5296 = vpow2.f32 %v2460_v13 }
 0xcf9   :  { %v5295_v17 = vpop.eup %5294 }
 0xcfa   :  { %v2467_v18 = vsel %vm1562_vm2, %v5295_v17, 0.0 }
 0xcfb   :  { %2468 = vadd.xlane.f32.xlu1 %v2467_v18 }
 0xcfd   :  { %v5297_v19 = vpop.eup %5296 }
 0xcfe   :  { %v2464_v20 = vsel %vm1562_vm2, %v5297_v19, 0.0 }
 0xcff   :  { %2465 = vadd.xlane.f32.xlu1 %v2464_v20 }
 0xd88   :  { %v2469_v23 = vpop.xlane.xlu1 %2468 }
 0xd89   :  { %5298 = vrcp.f32 %v2469_v23  ;;  %v4127_v23 = vld [vmem:[%s6998_s8 + $0x60] sm:$0xff] }
 0xd8c   :  { %v2466_v24 = vpop.xlane.xlu1 %2465 }
 0xd8d   :  { %5300 = vrcp.f32 %v2466_v24  ;;  %v4128_v24 = vld [vmem:[%s6998_s8 + $0x68] sm:$0xff] }
 0xd93   :  { %v5299_v26 = vpop.eup %5298 }
 0xd94   :  { %v2473_v28 = vmul.f32 %v5299_v26, %v5295_v17  ;;  %v5232_v26 = vpack.c.bf16 %v4128_v24, %v4127_v23 }
 0xd96   :  { %4766 = vmatmul.mubr.msk.f32.vlgmr.msra.gmra.mrb[36].mxu0 %vm1562_vm2, %v2473_v28  ;;  %v4129_v28 = vld [vmem:[%s6998_s8 + $0x70] sm:$0xff] }
 0xd97   :  { %v5301_v29 = vpop.eup %5300  ;;  %4780 = vmatpush3.xpose.msk.msra.mxu0 %vm258_vm0, %v6715_v0  ;;  %4781 = vmatprep.mubr.msk.f32.mxu0 %vm5391_vm1, %v5390_v2 }
 0xd98   :  { %v2471_v42 = vmul.f32 %v5301_v29, %v5297_v19  ;;  %4784 = vmatprep.subr.mxu0 %v5390_v2  ;;  %v4130_v29 = vld [vmem:[%s6998_s8 + $0x78] sm:$0xff] }
 0xd9a   :  { %4761 = vmatmul.mubr.msk.f32.vlgmr.msra.gmra.mrb[30].mxu1 %vm1562_vm2, %v2471_v42  ;;  %4782 = vmatmul.mubr.msk.f32.vlgmr.msra.gmra.mrb[38].mxu0 %vm258_vm0, %v6710_v63  ;;  %v5236_v42 = vpack.c.bf16 %v4130_v29, %v4129_v28 }
 0xd9b   :  { %4785 = vmatpush3.xpose.msk.msra.mxu0 %vm258_vm0, %v6726_v39  ;;  %4786 = vmatprep.mubr.msk.f32.mxu0 %vm5391_vm1, %v5390_v2 }
 0xd9c   :  { %4794 = vmatprep.subr.mxu0 %v5390_v2  ;;  %5227 = vmatpush3.bf16.msra.mxu1 %v5224_v50 }
 0xd9d   :  { %5229 = vmatprep.subr.bf16.mxu1 %v5228_v31 }
 0xd9e   :  { %4787 = vmatmul.mubr.msk.f32.vlgmr.msra.gmra.mrb[40].mxu0 %vm258_vm0, %v6718_v4 }
 0xd9f   :  { %4795 = vmatpush3.msra.mxu0 %v6726_v39  ;;  %4796 = vmatprep.mubr.msk.f32.mxu0 %vm5391_vm1, %v5390_v2 }
 0xda0   :  { %4810 = vmatprep.subr.mxu0 %v5390_v2  ;;  %5231 = vmatpush3.bf16.msra.mxu1 %v5228_v31 }
 0xda1   :  { %4789 = vmatprep.subr.mxu1 %v5390_v2 }
 0xe69   :  { %v2616_v32 = vpop.f32.mrb[36].mxu0 }
 0xe6a   :  { %v4767_v33 = vpop.f32.mrb[37].mxu0 }
 0xe6b   :  { %v3056_v33 = vrot.slane %v6784_v60, %v6567_v16 }
 0xe6d   :  { %v2543_v34 = vpop.f32.mrb[30].mxu1  ;;  %v2811_v35 = vpop.f32.mrb[38].mxu0 }
 0xe6e   :  { %v4762_v36 = vpop.f32.mrb[31].mxu1  ;;  %4776 = vmatprep.mubr.msk.f32.mxu1 %vm258_vm0, %v2543_v34  ;;  %v4783_v37 = vpop.f32.mrb[39].mxu0  ;;  %v2885_v43 = vsel %vm1562_vm2, %v2811_v35, -inf }
 0xe6f   :  { %4777 = vmatmul.mubr.msk.f32.vlgmr.msra.gmra.mrb[32].mxu1 %vm258_vm0, %v2616_v32  ;;  %2886 = vmax.xlane.f32.xlu0 %v2885_v43 }
 0xe70   :  { %4790 = vmatpush3.msra.mxu1 %v6715_v0  ;;  %4791 = vmatprep.mubr.msk.f32.mxu1 %vm5391_vm1, %v5390_v2 }
 0xe71   :  { %v2881_v47 = vpop.f32.mrb[40].mxu0  ;;  %5233 = vmatprep.subr.bf16.mxu1 %v5232_v26 }
 0xe72   :  { %v4788_v48 = vpop.f32.mrb[41].mxu0  ;;  %v2888_v51 = vsel %vm1562_vm2, %v2881_v47, -inf }
 0xe73   :  { %2889 = vmax.xlane.f32.xlu1 %v2888_v51 }
 0xefc   :  { %v2887_v53 = vpop.xlane.xlu0 %2886 }
 0xefd   :  { %v2891_v54 = vsub.f32 %v2811_v35, %v2887_v53 }
 0xeff   :  { %v2893_v56 = vmul.f32 1.442695, %v2891_v54 }
 0xf00   :  { %v2890_v57 = vpop.xlane.xlu1 %2889 }
 0xf01   :  { %5302 = vpow2.f32 %v2893_v56  ;;  %v2892_v58 = vsub.f32 %v2881_v47, %v2890_v57 }
 0xf03   :  { %v2895_v59 = vmul.f32 1.442695, %v2892_v58 }
 0xf05   :  { %5304 = vpow2.f32 %v2895_v59 }
 0xf0b   :  { %v5303_v38 = vpop.eup %5302 }
 0xf0c   :  { %v2897_v55 = vsel %vm1562_vm2, %v5303_v38, 0.0 }
 0xf0d   :  { %2898 = vadd.xlane.f32.xlu0 %v2897_v55 }
 0xf0f   :  { %v5305_v45 = vpop.eup %5304 }
 0xf10   :  { %v2900_v46 = vsel %vm1562_vm2, %v5305_v45, 0.0 }
 0xf11   :  { %2901 = vadd.xlane.f32.xlu1 %v2900_v46 }
 0xf42   :  { %v4778_v62 = vpop.f32.mrb[32].mxu1 }
 0xf43   :  { %v2696_v61 = vpop.f32.mrb[33].mxu1  ;;  %v2702_v3 = vadd.f32 %v4778_v62, %v2623_v40 }
 0xf44   :  { %v2697_v1 = vadd.f32 %v2696_v61, %v2623_v40 }
 0xf45   :  { %v2706_v7 = vadd.f32 %v2702_v3, %v6726_v39 }
 0xf46   :  { %v2705_v5 = vadd.f32 %v2697_v1, %v6715_v0 }
 0xf47   :  { %v2710_v8 = vsel %vm258_vm0, %v2706_v7, 0.0 }
 0xf48   :  { %v2707_v6 = vsel %vm258_vm0, %v2705_v5, 0.0 }
 0xf49   :  { %2708 = vadd.xlane.f32.xlu1 %v2707_v6 }
 0xf4d   :  { %2711 = vadd.xlane.f32.xlu1 %v2710_v8 }
 0xf9a   :  { %v2899_v9 = vpop.xlane.xlu0 %2898 }
 0xf9b   :  { %5306 = vrcp.f32 %v2899_v9 }
 0xf9e   :  { %v2902_v10 = vpop.xlane.xlu1 %2901 }
 0xf9f   :  { %5308 = vrcp.f32 %v2902_v10 }
 0xfa5   :  { %v5307_v11 = vpop.eup %5306 }
 0xfa6   :  { %v2904_v12 = vmul.f32 %v5307_v11, %v5303_v38  ;;  %v3169_v11 = vrot.slane %v6784_v60, %v6696_v49 }
 0xfa8   :  { %4792 = vmatmul.mubr.msk.f32.vlgmr.msra.gmra.mrb[34].mxu1 %vm1562_vm2, %v2904_v12 }
 0xfa9   :  { %v5309_v14 = vpop.eup %5308  ;;  %5235 = vmatpush3.bf16.msra.mxu1 %v5232_v26 }
 0xfaa   :  { %v2906_v15 = vmul.f32 %v5309_v14, %v5305_v45  ;;  %5237 = vmatprep.subr.bf16.mxu1 %v5236_v42 }
 0xfac   :  { %4797 = vmatmul.mubr.msk.f32.vlgmr.msra.gmra.mrb[42].mxu0 %vm1562_vm2, %v2906_v15  ;;  %v2736_v15 = vrot.slane %v6784_v60, %v6511_v44 }
 0xfad   :  { %4812 = vmatprep.mubr.msk.f32.mxu0 %vm5391_vm1, %v5390_v2  ;;  %5239 = vmatpush3.bf16.msra.mxu1 %v5236_v42 }
 0xfae   :  { %4820 = vmatprep.subr.mxu1 %v5390_v2 }
 0xfd6   :  { %v2709_v0 = vpop.xlane.xlu1 %2708 }
 0xfd7   :  { %v2713_v39 = vmul.f32 0.03125, %v2709_v0 }
 0xfd9   :  { %v6796_v13 = vsub.f32 %v2705_v5, %v2713_v39 }
 0xfda   :  { %v2712_v17 = vpop.xlane.xlu1 %2711 }
 0xfdb   :  { %v2714_v18 = vmul.f32 0.03125, %v2712_v17  ;;  %v2717_v19 = vmul.f32 %v6796_v13, %v6796_v13  ;;  %v3175_v17 = vrot.slane %v6784_v60, %v6699_v52 }
 0xfdd   :  { %v6800_v20 = vsub.f32 %v2706_v7, %v2714_v18  ;;  %v2719_v21 = vsel %vm258_vm0, %v2717_v19, 0.0 }
 0xfde   :  { %2720 = vadd.xlane.f32.xlu1 %v2719_v21 }
 0xfdf   :  { %v2718_v22 = vmul.f32 %v6800_v20, %v6800_v20 }
 0xfe1   :  { %v2722_v50 = vsel %vm258_vm0, %v2718_v22, 0.0 }
 0xfe2   :  { %2723 = vadd.xlane.f32.xlu1 %v2722_v50  ;;  %v2742_v50 = vrot.slane %v6784_v60, %v6563_v25 }
0x106b   :  { %v2721_v46 = vpop.xlane.xlu1 %2720 }
0x106f   :  { %v2724_v40 = vpop.xlane.xlu1 %2723 }
0x1070   :  { %v2726_v61 = vmul.f32 0.03125, %v2724_v40 }
0x1072   :  { %v2728_v5 = vadd.f32 1e-12, %v2726_v61 }
0x107b   :  { %v2976_v30 = vpop.f32.mrb[34].mxu1 }
0x107c   :  { %v4793_v27 = vpop.f32.mrb[35].mxu1  ;;  %4807 = vmatprep.mubr.msk.f32.mxu1 %vm258_vm0, %v2976_v30 }
0x107f   :  { %v3049_v31 = vpop.f32.mrb[42].mxu0 }
0x1080   :  { %v4798_v32 = vpop.f32.mrb[43].mxu0  ;;  %4808 = vmatmul.mubr.msk.f32.vlgmr.msra.gmra.mrb[36].mxu1 %vm258_vm0, %v3049_v31 }
0x1081   :  { %4822 = vmatprep.mubr.msk.f32.mxu1 %vm5391_vm1, %v5390_v2 }
0x1153   :  { %v4809_v34 = vpop.f32.mrb[36].mxu1 }
0x1154   :  { %v3129_v35 = vpop.f32.mrb[37].mxu1  ;;  %v3135_v36 = vadd.f32 %v4809_v34, %v3056_v33 }
0x1155   :  { %v3130_v37 = vadd.f32 %v3129_v35, %v3056_v33 }
0x1156   :  { %v3139_v48 = vadd.f32 %v3135_v36, %v6718_v4  ;;  %v2725_v4 = vmul.f32 0.03125, %v2721_v46  ;;  %v4150_v46 = vld [vmem:[%s6998_s8 + $0x90] sm:$0xff] }
0x1157   :  { %v3138_v43 = vadd.f32 %v3130_v37, %v6710_v63 }
0x1158   :  { %v3143_v51 = vsel %vm258_vm0, %v3139_v48, 0.0  ;;  %v2727_v62 = vadd.f32 1e-12, %v2725_v4  ;;  %v4151_v4 = vld [vmem:[%s6998_s8 + $0x98] sm:$0xff] }
0x1159   :  { %v3140_v47 = vsel %vm258_vm0, %v3138_v43, 0.0  ;;  %v5244_v40 = vpack.c.bf16 %v4151_v4, %v4150_v46 }
0x115a   :  { %3141 = vadd.xlane.f32.xlu0 %v3140_v47  ;;  %5310 = vrsqrt.f32 %v2727_v62 }
0x115e   :  { %3144 = vadd.xlane.f32.xlu0 %v3143_v51 }
0x1164   :  { %v5311_v10 = vpop.eup %5310 }
0x1165   :  { %v2731_v14 = vmul.f32 %v5311_v10, %v6796_v13 }
0x1167   :  { %v2737_v22 = vmul.f32 %v2736_v15, %v2731_v14 }
0x1169   :  { %v6846_v26 = vadd.f32 %v2742_v50, %v2737_v22 }
0x11e7   :  { %v3142_v53 = vpop.xlane.xlu0 %3141 }
0x11e8   :  { %v3146_v54 = vmul.f32 0.03125, %v3142_v53 }
0x11ea   :  { %v3148_v56 = vsub.f32 %v3138_v43, %v3146_v54  ;;  %v4148_v54 = vld [vmem:[%s6998_s8 + $0x80] sm:$0xff] }
0x11eb   :  { %v3145_v57 = vpop.xlane.xlu0 %3144 }
0x11ec   :  { %v3147_v58 = vmul.f32 0.03125, %v3145_v57  ;;  %v3150_v59 = vmul.f32 %v3148_v56, %v3148_v56 }
0x11ee   :  { %v3149_v38 = vsub.f32 %v3139_v48, %v3147_v58  ;;  %v3152_v55 = vsel %vm258_vm0, %v3150_v59, 0.0 }
0x11ef   :  { %3153 = vadd.xlane.f32.xlu0 %v3152_v55 }
0x11f0   :  { %v3151_v45 = vmul.f32 %v3149_v38, %v3149_v38 }
0x11f2   :  { %v3155_v63 = vsel %vm258_vm0, %v3151_v45, 0.0 }
0x11f3   :  { %3156 = vadd.xlane.f32.xlu0 %v3155_v63 }
0x127c   :  { %v3154_v3 = vpop.xlane.xlu0 %3153 }
0x127d   :  { %v3158_v1 = vmul.f32 0.03125, %v3154_v3 }
0x127f   :  { %v3160_v6 = vadd.f32 1e-12, %v3158_v1 }
0x1280   :  { %v3157_v7 = vpop.xlane.xlu0 %3156 }
0x1281   :  { %5312 = vrsqrt.f32 %v3160_v6  ;;  %v3159_v8 = vmul.f32 0.03125, %v3157_v7 }
0x1282   :  { %5314 = vrsqrt.f32 %v2728_v5 }
0x1283   :  { %v3161_v9 = vadd.f32 1e-12, %v3159_v8 }
0x1285   :  { %5316 = vrsqrt.f32 %v3161_v9 }
0x128b   :  { %v5313_v12 = vpop.eup %5312 }
0x128c   :  { %v5315_v0 = vpop.eup %5314  ;;  %v3164_v39 = vmul.f32 %v5313_v12, %v3148_v56  ;;  %v4149_v56 = vld [vmem:[%s6998_s8 + $0x88] sm:$0xff] }
0x128d   :  { %v2732_v21 = vmul.f32 %v5315_v0, %v6800_v20  ;;  %v5240_v57 = vpack.c.bf16 %v4149_v56, %v4148_v54 }
0x128e   :  { %v3170_v18 = vmul.f32 %v3169_v11, %v3164_v39 }
0x128f   :  { %v5317_v19 = vpop.eup %5316  ;;  %v2738_v28 = vmul.f32 %v2736_v15, %v2732_v21  ;;  %v6914_v21 = vld [vmem:[%s6999_s9 + $0x10] sm:$0x3f] }
0x1290   :  { %v3165_v23 = vmul.f32 %v5317_v19, %v3149_v38  ;;  %v6841_v24 = vadd.f32 %v3175_v17, %v3170_v18  ;;  %v3512_v22 = vrot.slane %v6914_v21, %v6071_v41  ;;  %v4153_v41 = vld [vmem:[%s6998_s8 + $0xa8] sm:$0xff] }
0x1291   :  { %v6857_v60 = vadd.f32 %v2742_v50, %v2738_v28 }
0x1292   :  { %4811 = vmatpush3.xpose.msk.msra.mxu0 %vm258_vm0, %v6841_v24  ;;  %4821 = vmatpush3.msra.mxu1 %v6841_v24  ;;  %v3171_v13 = vmul.f32 %v3169_v11, %v3165_v23 }
0x1293   :  { %4815 = vmatprep.subr.mxu0 %v5390_v2  ;;  %5241 = vmatprep.subr.bf16.mxu1 %v5240_v57 }
0x1294   :  { %v6849_v29 = vadd.f32 %v3175_v17, %v3171_v13 }
0x1295   :  { %4813 = vmatmul.mubr.msk.f32.vlgmr.msra.gmra.mrb[44].mxu0 %vm258_vm0, %v6846_v26 }
0x1296   :  { %4816 = vmatpush3.xpose.msk.msra.mxu0 %vm258_vm0, %v6849_v29  ;;  %4817 = vmatprep.mubr.msk.f32.mxu0 %vm5391_vm1, %v5390_v2 }
0x1297   :  { %4825 = vmatprep.subr.mxu0 %v5390_v2 }
0x1299   :  { %4818 = vmatmul.mubr.msk.f32.vlgmr.msra.gmra.mrb[46].mxu0 %vm258_vm0, %v6857_v60 }
0x129a   :  { %4826 = vmatpush3.msra.mxu0 %v6849_v29  ;;  %4827 = vmatprep.mubr.msk.f32.mxu0 %vm5391_vm1, %v5390_v2 }
0x129b   :  { %4841 = vmatprep.subr.mxu0 %v5390_v2 }
0x1368   :  { %v3261_v20 = vpop.f32.mrb[44].mxu0 }
0x1369   :  { %v4814_v42 = vpop.f32.mrb[45].mxu0  ;;  %v3341_v32 = vsel %vm1562_vm2, %v3261_v20, -inf }
0x136c   :  { %v3337_v30 = vpop.f32.mrb[46].mxu0 }
0x136d   :  { %v4819_v27 = vpop.f32.mrb[47].mxu0  ;;  %v3344_v31 = vsel %vm1562_vm2, %v3337_v30, -inf }
0x136e   :  { %3345 = vmax.xlane.f32.xlu0 %v3344_v31  ;;  %v4152_v31 = vld [vmem:[%s6998_s8 + $0xa0] sm:$0xff] }
0x1372   :  { %3342 = vmax.xlane.f32.xlu0 %v3341_v32  ;;  %v5248_v32 = vpack.c.bf16 %v4153_v41, %v4152_v31 }
0x13fb   :  { %v3346_v33 = vpop.xlane.xlu0 %3345 }
0x13fc   :  { %v3348_v34 = vsub.f32 %v3337_v30, %v3346_v33 }
0x13fe   :  { %v3351_v35 = vmul.f32 1.442695, %v3348_v34 }
0x13ff   :  { %v3343_v36 = vpop.xlane.xlu0 %3342 }
0x1400   :  { %5318 = vpow2.f32 %v3351_v35  ;;  %v3347_v37 = vsub.f32 %v3261_v20, %v3343_v36 }
0x1402   :  { %v3349_v43 = vmul.f32 1.442695, %v3347_v37  ;;  %v4154_v37 = vld [vmem:[%s6998_s8 + $0xb0] sm:$0xff] }
0x1404   :  { %5320 = vpow2.f32 %v3349_v43  ;;  %v4155_v43 = vld [vmem:[%s6998_s8 + $0xb8] sm:$0xff]  ;;  %s5392_s8 = smov [#allocation2]  }
0x1405   :  { %s4076_s20 = sshll.u32 %s5392_s8, 4  ;;  %s4077_s20 = int_to_ptr.vmem [resolvable:$true] %s4076_s20 }
0x1406   :  { %s5342_s6 = scalar_lea.vmem %s4077_s20, 256  ;;  %p5347_p1 = scmp.lt.s32.totalorder %s4077_s20, %s4077_s20 }
0x1407   :  { %p5343_p0 = scmp.ne.s32.totalorder %s4077_s20, %s5342_s6  ;;  %p5348_p2 = scmp.lt.s32.totalorder %s5342_s6, %s5342_s6 }
0x1409   :  { %p5349_p3 = por %p5348_p2, %p5347_p1 }
0x140a   :  { %v5319_v47 = vpop.eup %5318 }
0x140b   :  { %v3356_v48 = vsel %vm1562_vm2, %v5319_v47, 0.0  ;;  %p5350_p4 = pnand %p5349_p3, %p5343_p0 }
0x140c   :  { %3357 = vadd.xlane.f32.xlu1 %v3356_v48 }
0x140e   :  { %v5321_v51 = vpop.eup %5320 }
0x140f   :  { %v3353_v53 = vsel %vm1562_vm2, %v5321_v51, 0.0 }
0x1410   :  { %3354 = vadd.xlane.f32.xlu1 %v3353_v53 }
0x1499   :  { %v3358_v58 = vpop.xlane.xlu1 %3357 }
0x149a   :  { %5322 = vrcp.f32 %v3358_v58 }
0x149d   :  { %v3355_v59 = vpop.xlane.xlu1 %3354 }
0x149e   :  { %5324 = vrcp.f32 %v3355_v59  ;;  %v3945_v59 = vrot.slane %v6914_v21, %v6567_v16 }
0x14a4   :  { %v5323_v38 = vpop.eup %5322 }
0x14a5   :  { %v3362_v55 = vmul.f32 %v5323_v38, %v5319_v47  ;;  %v5252_v47 = vpack.c.bf16 %v4155_v43, %v4154_v37 }
0x14a7   :  { %4828 = vmatmul.mubr.msk.f32.vlgmr.msra.gmra.mrb[48].mxu0 %vm1562_vm2, %v3362_v55 }
0x14a8   :  { %v5325_v45 = vpop.eup %5324  ;;  %4842 = vmatpush3.xpose.msk.msra.mxu0 %vm258_vm0, %v6846_v26  ;;  %4843 = vmatprep.mubr.msk.f32.mxu0 %vm5391_vm1, %v5390_v2 }
0x14a9   :  { %v3360_v63 = vmul.f32 %v5325_v45, %v5321_v51  ;;  %4846 = vmatprep.subr.mxu0 %v5390_v2 }
0x14ab   :  { %4823 = vmatmul.mubr.msk.f32.vlgmr.msra.gmra.mrb[38].mxu1 %vm1562_vm2, %v3360_v63  ;;  %4844 = vmatmul.mubr.msk.f32.vlgmr.msra.gmra.mrb[50].mxu0 %vm258_vm0, %v6841_v24 }
0x14ac   :  { %4847 = vmatpush3.xpose.msk.msra.mxu0 %vm258_vm0, %v6857_v60  ;;  %4848 = vmatprep.mubr.msk.f32.mxu0 %vm5391_vm1, %v5390_v2 }
0x14ad   :  { %4856 = vmatprep.subr.mxu0 %v5390_v2  ;;  %5243 = vmatpush3.bf16.msra.mxu1 %v5240_v57 }
0x14ae   :  { %5245 = vmatprep.subr.bf16.mxu1 %v5244_v40 }
0x14af   :  { %4849 = vmatmul.mubr.msk.f32.vlgmr.msra.gmra.mrb[52].mxu0 %vm258_vm0, %v6849_v29 }
0x14b0   :  { %4857 = vmatpush3.msra.mxu0 %v6857_v60  ;;  %4858 = vmatprep.mubr.msk.f32.mxu0 %vm5391_vm1, %v5390_v2 }
0x14b1   :  { %5247 = vmatpush3.bf16.msra.mxu1 %v5244_v40 }
0x14b2   :  { %4851 = vmatprep.subr.mxu1 %v5390_v2 }
0x157a   :  { %v3505_v62 = vpop.f32.mrb[48].mxu0 }
0x157b   :  { %v4829_v61 = vpop.f32.mrb[49].mxu0 }
0x157e   :  { %v3432_v3 = vpop.f32.mrb[38].mxu1  ;;  %v3700_v1 = vpop.f32.mrb[50].mxu0 }
0x157f   :  { %v4824_v5 = vpop.f32.mrb[39].mxu1  ;;  %4838 = vmatprep.mubr.msk.f32.mxu1 %vm258_vm0, %v3432_v3  ;;  %v4845_v6 = vpop.f32.mrb[51].mxu0  ;;  %v3774_v7 = vsel %vm1562_vm2, %v3700_v1, -inf }
0x1580   :  { %4839 = vmatmul.mubr.msk.f32.vlgmr.msra.gmra.mrb[40].mxu1 %vm258_vm0, %v3505_v62  ;;  %3775 = vmax.xlane.f32.xlu0 %v3774_v7 }
0x1581   :  { %4852 = vmatpush3.msra.mxu1 %v6846_v26  ;;  %4853 = vmatprep.mubr.msk.f32.mxu1 %vm5391_vm1, %v5390_v2 }
0x1582   :  { %v3770_v8 = vpop.f32.mrb[52].mxu0  ;;  %5249 = vmatprep.subr.bf16.mxu1 %v5248_v32 }
0x1583   :  { %v4850_v9 = vpop.f32.mrb[53].mxu0  ;;  %v3777_v10 = vsel %vm1562_vm2, %v3770_v8, -inf }
0x1584   :  { %3778 = vmax.xlane.f32.xlu1 %v3777_v10 }
0x160d   :  { %v3776_v11 = vpop.xlane.xlu0 %3775 }
0x160e   :  { %v3780_v12 = vsub.f32 %v3700_v1, %v3776_v11 }
0x1610   :  { %v3782_v14 = vmul.f32 1.442695, %v3780_v12 }
0x1611   :  { %v3779_v15 = vpop.xlane.xlu1 %3778 }
0x1612   :  { %5326 = vpow2.f32 %v3782_v14  ;;  %v3781_v0 = vsub.f32 %v3770_v8, %v3779_v15 }
0x1614   :  { %v3784_v39 = vmul.f32 1.442695, %v3781_v0 }
0x1616   :  { %5328 = vpow2.f32 %v3784_v39 }
0x161c   :  { %v5327_v17 = vpop.eup %5326 }
0x161d   :  { %v3786_v18 = vsel %vm1562_vm2, %v5327_v17, 0.0 }
0x161e   :  { %3787 = vadd.xlane.f32.xlu0 %v3786_v18 }
0x1620   :  { %v5329_v19 = vpop.eup %5328 }
0x1621   :  { %v3789_v2 = vsel %vm1562_vm2, %v5329_v19, 0.0 }
0x1622   :  { %3790 = vadd.xlane.f32.xlu1 %v3789_v2 }
0x1653   :  { %v4840_v50 = vpop.f32.mrb[40].mxu1 }
0x1654   :  { %v3591_v23 = vadd.f32 %v4840_v50, %v3512_v22  ;;  %v3585_v13 = vpop.f32.mrb[41].mxu1  ;;  %v3625_v50 = vrot.slane %v6914_v21, %v6511_v44 }
0x1655   :  { %v3586_v28 = vadd.f32 %v3585_v13, %v3512_v22 }
0x1656   :  { %v3595_v20 = vadd.f32 %v3591_v23, %v6857_v60 }
0x1657   :  { %v3594_v42 = vadd.f32 %v3586_v28, %v6846_v26 }
0x1658   :  { %v3599_v30 = vsel %vm258_vm0, %v3595_v20, 0.0 }
0x1659   :  { %3600 = vadd.xlane.f32.xlu1 %v3599_v30  ;;  %v3596_v27 = vsel %vm258_vm0, %v3594_v42, 0.0 }
0x165a   :  { %3597 = vadd.xlane.f32.xlu0 %v3596_v27 }
0x16ab   :  { %v3788_v33 = vpop.xlane.xlu0 %3787 }
0x16ac   :  { %5330 = vrcp.f32 %v3788_v33 }
0x16af   :  { %v3791_v60 = vpop.xlane.xlu1 %3790 }
0x16b0   :  { %5332 = vrcp.f32 %v3791_v60 }
0x16b6   :  { %v5331_v26 = vpop.eup %5330 }
0x16b7   :  { %v3793_v34 = vmul.f32 %v5331_v26, %v5327_v17 }
0x16b9   :  { %4854 = vmatmul.mubr.msk.f32.vlgmr.msra.gmra.mrb[42].mxu1 %vm1562_vm2, %v3793_v34 }
0x16ba   :  { %v5333_v35 = vpop.eup %5332  ;;  %5251 = vmatpush3.bf16.msra.mxu1 %v5248_v32 }
0x16bb   :  { %v3795_v36 = vmul.f32 %v5333_v35, %v5329_v19  ;;  %5253 = vmatprep.subr.bf16.mxu1 %v5252_v47 }
0x16bd   :  { %4859 = vmatmul.mubr.msk.f32.vlgmr.msra.gmra.mrb[54].mxu0 %vm1562_vm2, %v3795_v36 }
0x16be   :  { %5255 = vmatpush3.bf16.msra.mxu1 %v5252_v47 }
0x16e6   :  { %v3601_v56 = vpop.xlane.xlu1 %3600 }
0x16e7   :  { %v3598_v57 = vpop.xlane.xlu0 %3597  ;;  %v3603_v58 = vmul.f32 0.03125, %v3601_v56 }
0x16e8   :  { %v3602_v38 = vmul.f32 0.03125, %v3598_v57 }
0x16e9   :  { %v3605_v45 = vsub.f32 %v3595_v20, %v3603_v58  ;;  %v3631_v20 = vrot.slane %v6914_v21, %v6563_v25 }
0x16ea   :  { %v3604_v4 = vsub.f32 %v3594_v42, %v3602_v38 }
0x16eb   :  { %v3607_v1 = vmul.f32 %v3605_v45, %v3605_v45 }
0x16ec   :  { %v3606_v6 = vmul.f32 %v3604_v4, %v3604_v4 }
0x16ed   :  { %v3611_v16 = vsel %vm258_vm0, %v3607_v1, 0.0 }
0x16ee   :  { %v3608_v7 = vsel %vm258_vm0, %v3606_v6, 0.0 }
0x178c   :  { %v3865_v48 = vpop.f32.mrb[42].mxu1 }
0x178d   :  { %v4855_v51 = vpop.f32.mrb[43].mxu1  ;;  %4869 = vmatprep.mubr.msk.f32.mxu1 %vm258_vm0, %v3865_v48 }
0x1790   :  { %v3938_v53 = vpop.f32.mrb[54].mxu0 }
0x1791   :  { %v4860_v54 = vpop.f32.mrb[55].mxu0  ;;  %4870 = vmatmul.mubr.msk.f32.vlgmr.msra.gmra.mrb[44].mxu1 %vm258_vm0, %v3938_v53 }
0x1864   :  { %v4871_v55 = vpop.f32.mrb[44].mxu1 }
0x1865   :  { %v4024_v63 = vadd.f32 %v4871_v55, %v3945_v59  ;;  %v4018_v46 = vpop.f32.mrb[45].mxu1 }
0x1866   :  { %v4019_v40 = vadd.f32 %v4018_v46, %v3945_v59 }
0x1867   :  { %v4028_v62 = vadd.f32 %v4024_v63, %v6849_v29 }
0x1868   :  { %v4027_v61 = vadd.f32 %v4019_v40, %v6841_v24 }
0x1869   :  { %v4032_v3 = vsel %vm258_vm0, %v4028_v62, 0.0 }
0x186a   :  { %4033 = vadd.xlane.f32.xlu1 %v4032_v3  ;;  %v4029_v5 = vsel %vm258_vm0, %v4027_v61, 0.0 }
0x186b   :  { %4030 = vadd.xlane.f32.xlu0 %v4029_v5 }
0x186e   :  { %3612 = vadd.xlane.f32.xlu1 %v3611_v16 }
0x186f   :  { %3609 = vadd.xlane.f32.xlu0 %v3608_v7 }
0x18f7   :  { %v4034_v8 = vpop.xlane.xlu1 %4033 }
0x18f8   :  { %v4036_v9 = vmul.f32 0.03125, %v4034_v8  ;;  %v4031_v10 = vpop.xlane.xlu0 %4030 }
0x18f9   :  { %v4035_v29 = vmul.f32 0.03125, %v4031_v10 }
0x18fa   :  { %v4038_v11 = vsub.f32 %v4028_v62, %v4036_v9 }
0x18fb   :  { %v4037_v24 = vsub.f32 %v4027_v61, %v4035_v29  ;;  %v3613_v12 = vpop.xlane.xlu1 %3612 }
0x18fc   :  { %v3615_v14 = vmul.f32 0.03125, %v3613_v12  ;;  %v3610_v15 = vpop.xlane.xlu0 %3609  ;;  %v4040_v0 = vmul.f32 %v4038_v11, %v4038_v11 }
0x18fd   :  { %v3614_v39 = vmul.f32 0.03125, %v3610_v15  ;;  %v4039_v17 = vmul.f32 %v4037_v24, %v4037_v24 }
0x18fe   :  { %v3617_v18 = vadd.f32 1e-12, %v3615_v14  ;;  %v4044_v19 = vsel %vm258_vm0, %v4040_v0, 0.0 }
0x18ff   :  { %v3616_v2 = vadd.f32 1e-12, %v3614_v39  ;;  %4045 = vadd.xlane.f32.xlu1 %v4044_v19  ;;  %v4041_v22 = vsel %vm258_vm0, %v4039_v17, 0.0 }
0x1900   :  { %5334 = vrsqrt.f32 %v3617_v18  ;;  %4042 = vadd.xlane.f32.xlu0 %v4041_v22 }
0x1901   :  { %5336 = vrsqrt.f32 %v3616_v2 }
0x190a   :  { %v5335_v23 = vpop.eup %5334 }
0x190b   :  { %v5337_v13 = vpop.eup %5336  ;;  %v3621_v28 = vmul.f32 %v5335_v23, %v3605_v45 }
0x190c   :  { %v3620_v42 = vmul.f32 %v5337_v13, %v3604_v4 }
0x190d   :  { %v3627_v30 = vmul.f32 %v3625_v50, %v3621_v28 }
0x190e   :  { %v3626_v27 = vmul.f32 %v3625_v50, %v3620_v42 }
0x190f   :  { %v3633_v31 = vadd.f32 %v3631_v20, %v3627_v30 }
0x1910   :  { %v3632_v41 = vadd.f32 %v3631_v20, %v3626_v27 }
0x1911   :  { %4068 = vst.msk [vmem:[#allocation2 + $0x8] sm:$0xff] %vm258_vm0, %v3633_v31 }
0x1912   :  { %4067 = vst.msk [vmem:[#allocation2] sm:$0xff] %vm258_vm0, %v3632_v41 }
0x1913   :  { %5353 = shalt.err (!%p5350_p4)
}
0x1914   :  { %s5354_s22 = scalar_lea.hbm %s7000_s10, 256 }
0x1915   :  { %p5355_p5 = scmp.ne.s32.totalorder %s7000_s10, %s5354_s22  ;;  %p5358_p6 = scmp.lt.u32.totalorder %s5354_s22, %s7000_s10 }
0x1917   :  { %p5360_p7 = pnand %p5358_p6, %p5355_p5 }
0x1919   :  { %5363 = shalt.err (!%p5360_p7)
}
0x191a   :  { %s5393_s27 = smov 128   ;;  %s5394_s2 = smov 8   ;;  %v4058_v34 = vrot.slane %v6914_v21, %v6696_v49  ;;  %v4064_v43 = vrot.slane %v6914_v21, %v6699_v52 }
0x191b   :  { %4082 = dma.vmem_to_hbm [thread:$0]  %s4077_s20, 256, %s7000_s10, [#allocation3], %s5393_s27, %s5393_s27, %s5394_s2  }
0x191c   :  { %s5395_s10 = smov [#allocation4]  }
0x191d   :  { %s4088_s29 = sshll.u32 %s5395_s10, 4  ;;  %s4089_s29 = int_to_ptr.vmem [resolvable:$true] %s4088_s29 }
0x191e   :  { %s5364_s30 = scalar_lea.vmem %s4089_s29, 256  ;;  %p5369_p9 = scmp.lt.s32.totalorder %s4089_s29, %s4089_s29 }
0x191f   :  { %p5365_p8 = scmp.ne.s32.totalorder %s4089_s29, %s5364_s30  ;;  %p5370_p10 = scmp.lt.s32.totalorder %s5364_s30, %s5364_s30 }
0x1921   :  { %p5371_p11 = por %p5370_p10, %p5369_p9 }
0x1923   :  { %p5372_p12 = pnand %p5371_p11, %p5365_p8 }
0x198c   :  { %v4046_v44 = vpop.xlane.xlu1 %4045 }
0x198d   :  { %v4048_v25 = vmul.f32 0.03125, %v4046_v44  ;;  %v4043_v32 = vpop.xlane.xlu0 %4042 }
0x198e   :  { %v4047_v33 = vmul.f32 0.03125, %v4043_v32 }
0x198f   :  { %v4050_v60 = vadd.f32 1e-12, %v4048_v25 }
0x1990   :  { %v4049_v26 = vadd.f32 1e-12, %v4047_v33 }
0x1991   :  { %5338 = vrsqrt.f32 %v4050_v60 }
0x1992   :  { %5340 = vrsqrt.f32 %v4049_v26 }
0x199b   :  { %v5339_v35 = vpop.eup %5338 }
0x199c   :  { %v5341_v36 = vpop.eup %5340  ;;  %v4054_v37 = vmul.f32 %v5339_v35, %v4038_v11 }
0x199d   :  { %v4053_v47 = vmul.f32 %v5341_v36, %v4037_v24 }
0x199e   :  { %v4060_v48 = vmul.f32 %v4058_v34, %v4054_v37 }
0x199f   :  { %v4059_v51 = vmul.f32 %v4058_v34, %v4053_v47 }
0x19a0   :  { %v4066_v53 = vadd.f32 %v4064_v43, %v4060_v48 }
0x19a1   :  { %v4065_v54 = vadd.f32 %v4064_v43, %v4059_v51 }
0x19a2   :  { %4070 = vst.msk [vmem:[#allocation4 + $0x8] sm:$0xff] %vm258_vm0, %v4066_v53 }
0x19a3   :  { %4069 = vst.msk [vmem:[#allocation4] sm:$0xff] %vm258_vm0, %v4065_v54 }
0x19a4   :  { %5375 = shalt.err (!%p5372_p12)
}
0x19a5   :  { %s5376_s13 = scalar_lea.hbm %s7001_s11, 256 }
0x19a6   :  { %p5377_p13 = scmp.ne.s32.totalorder %s7001_s11, %s5376_s13  ;;  %p5380_p0 = scmp.lt.u32.totalorder %s5376_s13, %s7001_s11 }
0x19a8   :  { %p5382_p1 = pnand %p5380_p0, %p5377_p13 }
0x19aa   :  { %5385 = shalt.err (!%p5382_p1)
}
0x19ab   :  { %4094 = dma.vmem_to_hbm [thread:$0]  %s4089_s29, 256, %s7001_s11, [#allocation5], %s5393_s27, %s5393_s27, %s5394_s2  }
0x19ac   :  { %5386 = dma.done.wait [#allocation3], 256  }
0x19ad   :  { %5387 = vsyncadd [#allocation3], 4294967040 }
0x19ae   :  { %5388 = dma.done.wait [#allocation5], 256  }
0x19af   :  { %5389 = vsyncadd [#allocation5], 4294967040 }
0x19b0   :  { %4101 = vsyncpa [#allocation3], 1 }
0x19b1   :  { %4102 = vsyncpa [#allocation5], 1 }

</bundles_post_ra>
